<compile_context>
chip_gen: v5e
topology: v5e:2x2
jax: 0.10.0
libtpu: 0.0.40
codegen_flags: <defaults>
</compile_context>

<pallas_src>
import functools
import math

import jax
import jax.numpy as jnp
from jax.experimental import pallas as pl
from jax.experimental.pallas import tpu as pltpu

EPS = 1e-5          # PyTorch LayerNorm default
NEG_BIG = -1e30     # finite "-inf": exp underflows to 0; fully-masked rows -> uniform, no NaN
_VMEM_LIMIT_BYTES = 48 * 1024 * 1024    # > 16/32 MiB scoped defaults, < v7x's 64 MiB physical
_VMEM_BUDGET_BYTES = 40 * 1024 * 1024   # tiling budget, headroom under the limit


def _layernorm(x, gamma, beta):
    mean = jnp.mean(x, axis=-1, keepdims=True)
    var = jnp.mean((x - mean) ** 2, axis=-1, keepdims=True)
    return (x - mean) * jax.lax.rsqrt(var + EPS) * gamma + beta


def cross_modal_kernel(block_b, P, T, H, dh,
                       img_ref, txt_ref, mask_ref,
                       wq_ref, bq_ref, wk_ref, bk_ref, wv_ref, bv_ref,
                       wo_ref, bo_ref,
                       ln1g_ref, ln1b_ref,
                       wff1_ref, bff1_ref, wff2_ref, bff2_ref,
                       ln2g_ref, ln2b_ref,
                       wcls_ref, bcls_ref,
                       x_ref, w_out_ref, logit_ref, prob_ref):
    f32 = jnp.float32
    bf16 = jnp.bfloat16
    D = H * dh
    BP = block_b * P
    BT = block_b * T
    G = block_b * H          # collapsed (batch, head) dim, g = b*H + h

    img_bf = img_ref[...].reshape(BP, D).astype(bf16)
    txt_bf = txt_ref[...].reshape(BT, D).astype(bf16)

    # Additive attention mask, finite negative for padded tokens (built once per grid step).
    addmask = jnp.where(mask_ref[...].reshape(block_b, T) > 0.5, 0.0, NEG_BIG).astype(f32)
    maskg = jnp.broadcast_to(addmask[:, None, :], (block_b, H, T)).reshape(G, T)[:, None, :]

    # Full-width QKV projections: one MXU pass each with N = D (per-head temperature /
    # sqrt(dh) scale already folded into wq/bq columns by the wrapper).
    q = jnp.dot(img_bf, wq_ref[...], preferred_element_type=f32) + bq_ref[...]    # (BP, D)
    k = jnp.dot(txt_bf, wk_ref[...], preferred_element_type=f32) + bk_ref[...]    # (BT, D)
    v = jnp.dot(txt_bf, wv_ref[...], preferred_element_type=f32) + bv_ref[...]    # (BT, D)

    # Split heads with lane slices + leading-dim reshapes only (no activation copies).
    def to_heads(x2d, rows):            # (block_b*rows, D) -> (G, rows, dh), g = b*H + h
        parts = [x2d[:, h * dh:(h + 1) * dh].reshape(block_b, rows, dh) for h in range(H)]
        return jnp.stack(parts, axis=1).reshape(G, rows, dh)

    qg = to_heads(q.astype(bf16), P)
    kg = to_heads(k.astype(bf16), T)
    vg = to_heads(v.astype(bf16), T)

    # Attention core: every batch element and head in single batched einsums (no unrolled
    # per-batch Python loop -> no long live ranges / spills at large block_b).
    s = jnp.einsum("gpj,gtj->gpt", qg, kg, preferred_element_type=f32)             # (G, P, T)
    s = s + maskg
    m = jnp.max(s, axis=-1, keepdims=True)
    e = jnp.exp(s - m)
    w = e * pl.reciprocal(jnp.sum(e, axis=-1, keepdims=True))        # exact reciprocal (EUP)
    # TODO(synk): T not a multiple of 128 makes this a masked store; pad T upstream for
    # production sequence lengths if the attention-weights output is kept.
    w_out_ref[...] = w.reshape(block_b, H, P, T).astype(w_out_ref.dtype)

    ctx = jnp.einsum("gpt,gtj->gpj", w.astype(bf16), vg, preferred_element_type=f32)

    # Concatenate heads back to (BP, D) and do ONE output projection: the head sum becomes
    # MXU K-accumulation instead of per-head VALU adds.
    ctx4 = ctx.astype(bf16).reshape(block_b, H, P, dh)
    attn_cat = jnp.concatenate([ctx4[:, h].reshape(BP, dh) for h in range(H)], axis=-1)
    up = jnp.dot(attn_cat, wo_ref[...], preferred_element_type=f32) + bo_ref[...]  # (BP, D)

    # Residual (re-read the resident input block; no f32 copy held live through attention)
    # + LayerNorm1.
    # TODO(synk): nn.Dropout (drop1/drop2) skipped -- eval-mode identity.
    x1 = _layernorm(img_ref[...].reshape(BP, D).astype(f32) + up,
                    ln1g_ref[...], ln1b_ref[...])

    # FFN: Linear(D, F) -> ReLU -> Linear(F, D), residual, LayerNorm2.
    hdn = jnp.maximum(
        jnp.dot(x1.astype(bf16), wff1_ref[...], preferred_element_type=f32) + bff1_ref[...],
        0.0)
    ff = jnp.dot(hdn.astype(bf16), wff2_ref[...], preferred_element_type=f32) + bff2_ref[...]
    x2 = _layernorm(x1 + ff, ln2g_ref[...], ln2b_ref[...])
    x_ref[...] = x2.reshape(block_b, P, D).astype(x_ref.dtype)

    # Classifier (num_classes == 1) as a lane reduction.
    logits = jnp.sum(x2.reshape(block_b, P, D) * wcls_ref[...][None], axis=-1) + bcls_ref[...]
    logit_ref[...] = logits[:, None, :].astype(logit_ref.dtype)
    prob_ref[...] = jax.nn.sigmoid(logits)[:, None, :].astype(prob_ref.dtype)


def _pick_block_b(B, P, T, D, H, ff_dim, w_out_itemsize):
    """Largest batch fold that (a) hits the per-generation MXU row target, (b) keeps the
    grid at >= 2 steps so both v7x TensorCores get work, (c) fits a VMEM budget."""
    try:
        kind = jax.devices()[0].device_kind.lower()
    except Exception:
        kind = ""
    rows_target = 128 if "v5" in kind else 256   # v5e MXU is 4x128^2: M=128 already fills it

    # Weights counted double-buffered (worst case, if single-buffering is unavailable).
    weight_bytes = 2 * (4 * D * D * 2 + 2 * D * ff_dim * 2 + 12 * D * 4 + ff_dim * 4)

    def step_bytes(bb):
        ins = bb * (P * D * 4 + T * D * 4 + T * 4)
        outs = bb * (P * D * 4 + H * P * T * w_out_itemsize + 2 * P * 4)
        interm = bb * (3 * H * P * T * 4 + (P + 2 * T) * D * 4 + P * ff_dim * 4)
        return 2 * (ins + outs) + interm

    best = 1
    for bb in range(1, B + 1):
        if B % bb:
            continue
        if bb > 1 and bb * P > rows_target:
            continue
        if B >= 2 and B // bb < 2:
            continue
        if weight_bytes + step_bytes(bb) > _VMEM_BUDGET_BYTES:
            continue
        best = bb
    return best


def cross_modal_block(image_embeddings, text_embeddings, text_mask, params, num_heads,
                      weights_dtype=jnp.float32):
    """Forward pass of CrossModalBlock. Returns (x, attention_weights, logits, probs)."""
    B, P, D = image_embeddings.shape
    T = text_embeddings.shape[1]
    H = num_heads
    assert D % H == 0
    dh = D // H
    ff_dim = params["wff1"].shape[1]
    assert params["wcls"].shape[1] == 1, "kernel classifier path assumes num_classes == 1"

    if text_mask is None:
        text_mask = jnp.ones((B, T), jnp.bool_)

    f32, bf16 = jnp.float32, jnp.bfloat16

    # scores / sqrt(dh) / tau_h  ==  (img @ (wq * scale_cols) + bq * scale_cols) . k
    scale_cols = jnp.repeat(jnp.exp(-params["log_tau"]).astype(f32) / math.sqrt(dh), dh)  # (D,)
    wq = (params["wq"] * scale_cols[None, :]).astype(bf16)
    bq = (params["bq"] * scale_cols[None, :]).astype(f32)
    wk = params["wk"].astype(bf16)
    bk = params["bk"].astype(f32)
    wv = params["wv"].astype(bf16)
    bv = params["bv"].astype(f32)
    wo = params["wo"].astype(bf16)
    bo = params["bo"].astype(f32)
    wff1 = params["wff1"].astype(bf16)
    bff1 = params["bff1"].astype(f32)
    wff2 = params["wff2"].astype(bf16)
    bff2 = params["bff2"].astype(f32)
    ln1g = params["ln1g"].astype(f32)
    ln1b = params["ln1b"].astype(f32)
    ln2g = params["ln2g"].astype(f32)
    ln2b = params["ln2b"].astype(f32)
    wcls_row = params["wcls"].reshape(1, D).astype(f32)
    bcls = params["bcls"].reshape(1, 1).astype(f32)
    mask_f = text_mask.astype(f32).reshape(B, 1, T)

    block_b = _pick_block_b(B, P, T, D, H, ff_dim, jnp.dtype(weights_dtype).itemsize)
    grid = (B // block_b,)

    kern = functools.partial(cross_modal_kernel, block_b, P, T, H, dh)
    batch3 = lambda g: (g, 0, 0)

    def make_in_specs(single_buffer_weights):
        def wspec(shape):
            idx = lambda g, n=len(shape): (0,) * n
            if single_buffer_weights:
                # Revisited weights only need one VMEM buffer (VMEM headroom on v7x).
                return pl.BlockSpec(shape, idx, pipeline_mode=pl.Buffered(1))
            return pl.BlockSpec(shape, idx)
        return [
            pl.BlockSpec((block_b, P, D), batch3),          # image
            pl.BlockSpec((block_b, T, D), batch3),          # text
            pl.BlockSpec((block_b, 1, T), batch3),          # mask
            wspec((D, D)), wspec((1, D)),                   # wq, bq (pre-scaled)
            wspec((D, D)), wspec((1, D)),                   # wk, bk
            wspec((D, D)), wspec((1, D)),                   # wv, bv
            wspec((D, D)), wspec((1, D)),                   # wo, bo
            wspec((1, D)), wspec((1, D)),                   # ln1 gamma / beta
            wspec((D, ff_dim)), wspec((1, ff_dim)),         # wff1, bff1
            wspec((ff_dim, D)), wspec((1, D)),              # wff2, bff2
            wspec((1, D)), wspec((1, D)),                   # ln2 gamma / beta
            wspec((1, D)), wspec((1, 1)),                   # classifier weight / bias
        ]

    out_specs = [
        pl.BlockSpec((block_b, P, D), batch3),
        pl.BlockSpec((block_b, H, P, T), lambda g: (g, 0, 0, 0)),
        pl.BlockSpec((block_b, 1, P), batch3),
        pl.BlockSpec((block_b, 1, P), batch3),
    ]
    out_shape = (
        jax.ShapeDtypeStruct((B, P, D), f32),
        jax.ShapeDtypeStruct((B, H, P, T), weights_dtype),
        jax.ShapeDtypeStruct((B, 1, P), f32),
        jax.ShapeDtypeStruct((B, 1, P), f32),
    )
    args = (image_embeddings, text_embeddings, mask_f,
            wq, bq, wk, bk, wv, bv, wo, bo, ln1g, ln1b,
            wff1, bff1, wff2, bff2, ln2g, ln2b, wcls_row, bcls)

    def call(single_buffer_weights):
        return pl.pallas_call(
            kern,
            out_shape=out_shape,
            grid=grid,
            in_specs=make_in_specs(single_buffer_weights),
            out_specs=out_specs,
            compiler_params=pltpu.CompilerParams(
                dimension_semantics=("parallel",),
                vmem_limit_bytes=_VMEM_LIMIT_BYTES),
        )(*args)

    try:
        x, w, logits3, probs3 = call(True)
    except Exception:
        # pipeline_mode=pl.Buffered(1) unsupported on this jax version -> default buffering.
        x, w, logits3, probs3 = call(False)
    return x, w, logits3.reshape(B, P), probs3.reshape(B, P)


def reference(image_embeddings, text_embeddings, text_mask, p, num_heads):
    """Pure-JAX reference mirroring the PyTorch forward (eval mode)."""
    B, P, D = image_embeddings.shape
    h = num_heads
    dh = D // h
    q = image_embeddings @ p["wq"] + p["bq"]
    k = text_embeddings @ p["wk"] + p["bk"]
    v = text_embeddings @ p["wv"] + p["bv"]
    Q = q.reshape(B, P, h, dh).transpose(0, 2, 1, 3)
    K = k.reshape(B, -1, h, dh).transpose(0, 2, 1, 3)
    V = v.reshape(B, -1, h, dh).transpose(0, 2, 1, 3)
    scores = jnp.einsum("bhpd,bhqd->bhpq", Q, K) / math.sqrt(dh)
    tau = jnp.exp(p["log_tau"]).reshape(1, h, 1, 1)
    scores = scores / tau
    scores = jnp.where(text_mask[:, None, None, :] > 0.5, scores, -jnp.inf)
    weights = jax.nn.softmax(scores, axis=-1)
    attn = jnp.einsum("bhpq,bhqd->bhpd", weights, V).transpose(0, 2, 1, 3).reshape(B, P, D)
    img_up = attn @ p["wo"] + p["bo"]
    x = _layernorm(image_embeddings + img_up, p["ln1g"], p["ln1b"])
    ff = jnp.maximum(x @ p["wff1"] + p["bff1"], 0.0) @ p["wff2"] + p["bff2"]
    x = _layernorm(x + ff, p["ln2g"], p["ln2b"])
    logits = (x @ p["wcls"] + p["bcls"])[..., 0]
    return x, weights, logits, jax.nn.sigmoid(logits)


def init_params(key, dim, num_heads, ff_hidden_ratio=2, num_classes=1):
    ff = dim * ff_hidden_ratio
    ks = jax.random.split(key, 12)
    s = 0.1
    p = {
        "wq": s * jax.random.normal(ks[0], (dim, dim), jnp.float32),
        "bq": s * jax.random.normal(ks[1], (1, dim), jnp.float32),
        "wk": s * jax.random.normal(ks[2], (dim, dim), jnp.float32),
        "bk": s * jax.random.normal(ks[3], (1, dim), jnp.float32),
        "wv": s * jax.random.normal(ks[4], (dim, dim), jnp.float32),
        "bv": s * jax.random.normal(ks[5], (1, dim), jnp.float32),
        "wo": s * jax.random.normal(ks[6], (dim, dim), jnp.float32),
        "bo": s * jax.random.normal(ks[7], (1, dim), jnp.float32),
        "ln1g": jnp.ones((1, dim), jnp.float32),
        "ln1b": jnp.zeros((1, dim), jnp.float32),
        "wff1": s * jax.random.normal(ks[8], (dim, ff), jnp.float32),
        "bff1": s * jax.random.normal(ks[9], (1, ff), jnp.float32),
        "wff2": s * jax.random.normal(ks[10], (ff, dim), jnp.float32),
        "bff2": s * jax.random.normal(ks[11], (1, dim), jnp.float32),
        "ln2g": jnp.ones((1, dim), jnp.float32),
        "ln2b": jnp.zeros((1, dim), jnp.float32),
        "wcls": s * jax.random.normal(jax.random.fold_in(key, 100), (dim, num_classes), jnp.float32),
        "bcls": s * jax.random.normal(jax.random.fold_in(key, 101), (1, num_classes), jnp.float32),
        "log_tau": jnp.zeros((num_heads,), jnp.float32),   # matches torch.zeros(num_heads)
    }
    return p


if __name__ == "__main__":
    B, P, T, D, H = 2, 8, 8, 32, 4

    key = jax.random.PRNGKey(0)
    k_img, k_txt, k_par = jax.random.split(key, 3)
    image_embeddings = jax.random.normal(k_img, (B, P, D), jnp.float32)
    text_embeddings = jax.random.normal(k_txt, (B, T, D), jnp.float32)
    # text_mask: True = valid token; last two tokens of batch 1 are padding.
    text_mask = jnp.ones((B, T), jnp.bool_).at[1, -2:].set(False)

    params = init_params(k_par, D, H)

    x, w, logits, probs = jax.block_until_ready(
        cross_modal_block(image_embeddings, text_embeddings, text_mask, params, H)
    )

    xr, wr, lr, pr = reference(image_embeddings, text_embeddings, text_mask, params, H)
    assert jnp.allclose(x, xr, atol=5e-2, rtol=5e-2)
    assert jnp.allclose(w, wr, atol=5e-2, rtol=5e-2)
    assert jnp.allclose(logits, lr, atol=5e-2, rtol=5e-2)
    assert jnp.allclose(probs, pr, atol=5e-2, rtol=5e-2)

    print("KERNEL_OK")
</pallas_src>

<mosaic_0001>
module attributes {stable_mosaic.version = 11 : i64} {
  func.func @cross_modal_kernel(%arg0: i32, %arg1: memref<1x8x32xf32, #tpu.memory_space<vmem>>, %arg2: memref<1x8x32xf32, #tpu.memory_space<vmem>>, %arg3: memref<1x1x8xf32, #tpu.memory_space<vmem>>, %arg4: memref<32x32xbf16, #tpu.memory_space<vmem>>, %arg5: memref<1x32xf32, #tpu.memory_space<vmem>>, %arg6: memref<32x32xbf16, #tpu.memory_space<vmem>>, %arg7: memref<1x32xf32, #tpu.memory_space<vmem>>, %arg8: memref<32x32xbf16, #tpu.memory_space<vmem>>, %arg9: memref<1x32xf32, #tpu.memory_space<vmem>>, %arg10: memref<32x32xbf16, #tpu.memory_space<vmem>>, %arg11: memref<1x32xf32, #tpu.memory_space<vmem>>, %arg12: memref<1x32xf32, #tpu.memory_space<vmem>>, %arg13: memref<1x32xf32, #tpu.memory_space<vmem>>, %arg14: memref<32x64xbf16, #tpu.memory_space<vmem>>, %arg15: memref<1x64xf32, #tpu.memory_space<vmem>>, %arg16: memref<64x32xbf16, #tpu.memory_space<vmem>>, %arg17: memref<1x32xf32, #tpu.memory_space<vmem>>, %arg18: memref<1x32xf32, #tpu.memory_space<vmem>>, %arg19: memref<1x32xf32, #tpu.memory_space<vmem>>, %arg20: memref<1x32xf32, #tpu.memory_space<vmem>>, %arg21: memref<1x1xf32, #tpu.memory_space<vmem>>, %arg22: memref<1x8x32xf32, #tpu.memory_space<vmem>>, %arg23: memref<1x4x8x8xf32, #tpu.memory_space<vmem>>, %arg24: memref<1x1x8xf32, #tpu.memory_space<vmem>>, %arg25: memref<1x1x8xf32, #tpu.memory_space<vmem>>) attributes {dimension_semantics = [#tpu.dimension_semantics<parallel>], iteration_bounds = array<i64: 2>, scalar_prefetch = 0 : i64, scratch_operands = 0 : i64, tpu.core_type = #tpu.core_type<tc>, window_params = [{transform_indices = @transform_0, window_bounds = array<i64: 1, 8, 32>}, {transform_indices = @transform_1, window_bounds = array<i64: 1, 8, 32>}, {transform_indices = @transform_2, window_bounds = array<i64: 1, 1, 8>}, {pipeline_mode = #tpu.pipeline_mode<synchronous>, transform_indices = @transform_3, window_bounds = array<i64: 32, 32>}, {pipeline_mode = #tpu.pipeline_mode<synchronous>, transform_indices = @transform_4, window_bounds = array<i64: 1, 32>}, {pipeline_mode = #tpu.pipeline_mode<synchronous>, transform_indices = @transform_5, window_bounds = array<i64: 32, 32>}, {pipeline_mode = #tpu.pipeline_mode<synchronous>, transform_indices = @transform_6, window_bounds = array<i64: 1, 32>}, {pipeline_mode = #tpu.pipeline_mode<synchronous>, transform_indices = @transform_7, window_bounds = array<i64: 32, 32>}, {pipeline_mode = #tpu.pipeline_mode<synchronous>, transform_indices = @transform_8, window_bounds = array<i64: 1, 32>}, {pipeline_mode = #tpu.pipeline_mode<synchronous>, transform_indices = @transform_9, window_bounds = array<i64: 32, 32>}, {pipeline_mode = #tpu.pipeline_mode<synchronous>, transform_indices = @transform_10, window_bounds = array<i64: 1, 32>}, {pipeline_mode = #tpu.pipeline_mode<synchronous>, transform_indices = @transform_11, window_bounds = array<i64: 1, 32>}, {pipeline_mode = #tpu.pipeline_mode<synchronous>, transform_indices = @transform_12, window_bounds = array<i64: 1, 32>}, {pipeline_mode = #tpu.pipeline_mode<synchronous>, transform_indices = @transform_13, window_bounds = array<i64: 32, 64>}, {pipeline_mode = #tpu.pipeline_mode<synchronous>, transform_indices = @transform_14, window_bounds = array<i64: 1, 64>}, {pipeline_mode = #tpu.pipeline_mode<synchronous>, transform_indices = @transform_15, window_bounds = array<i64: 64, 32>}, {pipeline_mode = #tpu.pipeline_mode<synchronous>, transform_indices = @transform_16, window_bounds = array<i64: 1, 32>}, {pipeline_mode = #tpu.pipeline_mode<synchronous>, transform_indices = @transform_17, window_bounds = array<i64: 1, 32>}, {pipeline_mode = #tpu.pipeline_mode<synchronous>, transform_indices = @transform_18, window_bounds = array<i64: 1, 32>}, {pipeline_mode = #tpu.pipeline_mode<synchronous>, transform_indices = @transform_19, window_bounds = array<i64: 1, 32>}, {pipeline_mode = #tpu.pipeline_mode<synchronous>, transform_indices = @transform_20, window_bounds = array<i64: 1, 1>}, {transform_indices = @transform_21, window_bounds = array<i64: 1, 8, 32>}, {transform_indices = @transform_22, window_bounds = array<i64: 1, 4, 8, 8>}, {transform_indices = @transform_23, window_bounds = array<i64: 1, 1, 8>}, {transform_indices = @transform_24, window_bounds = array<i64: 1, 1, 8>}]} {
    %c0 = arith.constant 0 : index
    %c0_0 = arith.constant 0 : index
    %c0_1 = arith.constant 0 : index
    %0 = vector.load %arg1[%c0, %c0_0, %c0_1] : memref<1x8x32xf32, #tpu.memory_space<vmem>>, vector<1x8x32xf32>
    %1 = vector.shape_cast %0 : vector<1x8x32xf32> to vector<8x32xf32>
    %2 = arith.truncf %1 : vector<8x32xf32> to vector<8x32xbf16>
    %c0_2 = arith.constant 0 : index
    %c0_3 = arith.constant 0 : index
    %c0_4 = arith.constant 0 : index
    %3 = vector.load %arg2[%c0_2, %c0_3, %c0_4] : memref<1x8x32xf32, #tpu.memory_space<vmem>>, vector<1x8x32xf32>
    %4 = vector.shape_cast %3 : vector<1x8x32xf32> to vector<8x32xf32>
    %5 = arith.truncf %4 : vector<8x32xf32> to vector<8x32xbf16>
    %c0_5 = arith.constant 0 : index
    %c0_6 = arith.constant 0 : index
    %c0_7 = arith.constant 0 : index
    %6 = vector.load %arg3[%c0_5, %c0_6, %c0_7] : memref<1x1x8xf32, #tpu.memory_space<vmem>>, vector<1x1x8xf32>
    %7 = vector.shape_cast %6 : vector<1x1x8xf32> to vector<1x8xf32>
    %cst = arith.constant 5.000000e-01 : f32
    %8 = vector.broadcast %cst : f32 to vector<1x8xf32>
    %9 = arith.cmpf ogt, %7, %8 : vector<1x8xf32>
    %cst_8 = arith.constant 0.000000e+00 : f32
    %cst_9 = arith.constant -1.000000e+30 : f32
    %10 = vector.broadcast %cst_8 : f32 to vector<1x8xf32>
    %11 = vector.broadcast %cst_9 : f32 to vector<1x8xf32>
    %12 = arith.select %9, %10, %11 : vector<1x8xi1>, vector<1x8xf32>
    %13 = vector.shape_cast %12 : vector<1x8xf32> to vector<1x1x8xf32>
    %14 = vector.shape_cast %13 : vector<1x1x8xf32> to vector<1x1x8xf32>
    %15 = vector.broadcast %14 : vector<1x1x8xf32> to vector<1x4x8xf32>
    %16 = vector.shape_cast %15 : vector<1x4x8xf32> to vector<4x8xf32>
    %17 = vector.shape_cast %16 : vector<4x8xf32> to vector<4x1x8xf32>
    %c0_10 = arith.constant 0 : index
    %c0_11 = arith.constant 0 : index
    %18 = vector.load %arg4[%c0_10, %c0_11] : memref<32x32xbf16, #tpu.memory_space<vmem>>, vector<32x32xbf16>
    %cst_12 = arith.constant dense<0.000000e+00> : vector<8x32xf32>
    %19 = tpu.matmul %2, %18, %cst_12 {dimension_numbers = #tpu.dot_dimension_numbers<[1], [0], [0], [1], [0, 0, 1, 1], [], []>} : vector<8x32xbf16>, vector<32x32xbf16>, vector<8x32xf32> -> vector<8x32xf32>
    %c0_13 = arith.constant 0 : index
    %c0_14 = arith.constant 0 : index
    %20 = vector.load %arg5[%c0_13, %c0_14] : memref<1x32xf32, #tpu.memory_space<vmem>>, vector<1x32xf32>
    %21 = vector.broadcast %20 : vector<1x32xf32> to vector<8x32xf32>
    %22 = arith.addf %19, %21 : vector<8x32xf32>
    %c0_15 = arith.constant 0 : index
    %c0_16 = arith.constant 0 : index
    %23 = vector.load %arg6[%c0_15, %c0_16] : memref<32x32xbf16, #tpu.memory_space<vmem>>, vector<32x32xbf16>
    %cst_17 = arith.constant dense<0.000000e+00> : vector<8x32xf32>
    %24 = tpu.matmul %5, %23, %cst_17 {dimension_numbers = #tpu.dot_dimension_numbers<[1], [0], [0], [1], [0, 0, 1, 1], [], []>} : vector<8x32xbf16>, vector<32x32xbf16>, vector<8x32xf32> -> vector<8x32xf32>
    %c0_18 = arith.constant 0 : index
    %c0_19 = arith.constant 0 : index
    %25 = vector.load %arg7[%c0_18, %c0_19] : memref<1x32xf32, #tpu.memory_space<vmem>>, vector<1x32xf32>
    %26 = vector.broadcast %25 : vector<1x32xf32> to vector<8x32xf32>
    %27 = arith.addf %24, %26 : vector<8x32xf32>
    %c0_20 = arith.constant 0 : index
    %c0_21 = arith.constant 0 : index
    %28 = vector.load %arg8[%c0_20, %c0_21] : memref<32x32xbf16, #tpu.memory_space<vmem>>, vector<32x32xbf16>
    %cst_22 = arith.constant dense<0.000000e+00> : vector<8x32xf32>
    %29 = tpu.matmul %5, %28, %cst_22 {dimension_numbers = #tpu.dot_dimension_numbers<[1], [0], [0], [1], [0, 0, 1, 1], [], []>} : vector<8x32xbf16>, vector<32x32xbf16>, vector<8x32xf32> -> vector<8x32xf32>
    %c0_23 = arith.constant 0 : index
    %c0_24 = arith.constant 0 : index
    %30 = vector.load %arg9[%c0_23, %c0_24] : memref<1x32xf32, #tpu.memory_space<vmem>>, vector<1x32xf32>
    %31 = vector.broadcast %30 : vector<1x32xf32> to vector<8x32xf32>
    %32 = arith.addf %29, %31 : vector<8x32xf32>
    %33 = arith.truncf %22 : vector<8x32xf32> to vector<8x32xbf16>
    %34 = vector.extract_strided_slice %33 {offsets = [0, 0], sizes = [8, 8], strides = [1, 1]} : vector<8x32xbf16> to vector<8x8xbf16>
    %35 = vector.shape_cast %34 : vector<8x8xbf16> to vector<1x8x8xbf16>
    %36 = vector.extract_strided_slice %33 {offsets = [0, 8], sizes = [8, 8], strides = [1, 1]} : vector<8x32xbf16> to vector<8x8xbf16>
    %37 = vector.shape_cast %36 : vector<8x8xbf16> to vector<1x8x8xbf16>
    %38 = vector.extract_strided_slice %33 {offsets = [0, 16], sizes = [8, 8], strides = [1, 1]} : vector<8x32xbf16> to vector<8x8xbf16>
    %39 = vector.shape_cast %38 : vector<8x8xbf16> to vector<1x8x8xbf16>
    %40 = vector.extract_strided_slice %33 {offsets = [0, 24], sizes = [8, 8], strides = [1, 1]} : vector<8x32xbf16> to vector<8x8xbf16>
    %41 = vector.shape_cast %40 : vector<8x8xbf16> to vector<1x8x8xbf16>
    %42 = vector.shape_cast %35 : vector<1x8x8xbf16> to vector<1x1x8x8xbf16>
    %43 = vector.shape_cast %37 : vector<1x8x8xbf16> to vector<1x1x8x8xbf16>
    %44 = vector.shape_cast %39 : vector<1x8x8xbf16> to vector<1x1x8x8xbf16>
    %45 = vector.shape_cast %41 : vector<1x8x8xbf16> to vector<1x1x8x8xbf16>
    %46 = tpu.concatenate %42, %43, %44, %45 in 1 : vector<1x1x8x8xbf16>, vector<1x1x8x8xbf16>, vector<1x1x8x8xbf16>, vector<1x1x8x8xbf16> -> vector<1x4x8x8xbf16>
    %47 = vector.shape_cast %46 : vector<1x4x8x8xbf16> to vector<4x8x8xbf16>
    %48 = arith.truncf %27 : vector<8x32xf32> to vector<8x32xbf16>
    %49 = vector.extract_strided_slice %48 {offsets = [0, 0], sizes = [8, 8], strides = [1, 1]} : vector<8x32xbf16> to vector<8x8xbf16>
    %50 = vector.shape_cast %49 : vector<8x8xbf16> to vector<1x8x8xbf16>
    %51 = vector.extract_strided_slice %48 {offsets = [0, 8], sizes = [8, 8], strides = [1, 1]} : vector<8x32xbf16> to vector<8x8xbf16>
    %52 = vector.shape_cast %51 : vector<8x8xbf16> to vector<1x8x8xbf16>
    %53 = vector.extract_strided_slice %48 {offsets = [0, 16], sizes = [8, 8], strides = [1, 1]} : vector<8x32xbf16> to vector<8x8xbf16>
    %54 = vector.shape_cast %53 : vector<8x8xbf16> to vector<1x8x8xbf16>
    %55 = vector.extract_strided_slice %48 {offsets = [0, 24], sizes = [8, 8], strides = [1, 1]} : vector<8x32xbf16> to vector<8x8xbf16>
    %56 = vector.shape_cast %55 : vector<8x8xbf16> to vector<1x8x8xbf16>
    %57 = vector.shape_cast %50 : vector<1x8x8xbf16> to vector<1x1x8x8xbf16>
    %58 = vector.shape_cast %52 : vector<1x8x8xbf16> to vector<1x1x8x8xbf16>
    %59 = vector.shape_cast %54 : vector<1x8x8xbf16> to vector<1x1x8x8xbf16>
    %60 = vector.shape_cast %56 : vector<1x8x8xbf16> to vector<1x1x8x8xbf16>
    %61 = tpu.concatenate %57, %58, %59, %60 in 1 : vector<1x1x8x8xbf16>, vector<1x1x8x8xbf16>, vector<1x1x8x8xbf16>, vector<1x1x8x8xbf16> -> vector<1x4x8x8xbf16>
    %62 = vector.shape_cast %61 : vector<1x4x8x8xbf16> to vector<4x8x8xbf16>
    %63 = arith.truncf %32 : vector<8x32xf32> to vector<8x32xbf16>
    %64 = vector.extract_strided_slice %63 {offsets = [0, 0], sizes = [8, 8], strides = [1, 1]} : vector<8x32xbf16> to vector<8x8xbf16>
    %65 = vector.shape_cast %64 : vector<8x8xbf16> to vector<1x8x8xbf16>
    %66 = vector.extract_strided_slice %63 {offsets = [0, 8], sizes = [8, 8], strides = [1, 1]} : vector<8x32xbf16> to vector<8x8xbf16>
    %67 = vector.shape_cast %66 : vector<8x8xbf16> to vector<1x8x8xbf16>
    %68 = vector.extract_strided_slice %63 {offsets = [0, 16], sizes = [8, 8], strides = [1, 1]} : vector<8x32xbf16> to vector<8x8xbf16>
    %69 = vector.shape_cast %68 : vector<8x8xbf16> to vector<1x8x8xbf16>
    %70 = vector.extract_strided_slice %63 {offsets = [0, 24], sizes = [8, 8], strides = [1, 1]} : vector<8x32xbf16> to vector<8x8xbf16>
    %71 = vector.shape_cast %70 : vector<8x8xbf16> to vector<1x8x8xbf16>
    %72 = vector.shape_cast %65 : vector<1x8x8xbf16> to vector<1x1x8x8xbf16>
    %73 = vector.shape_cast %67 : vector<1x8x8xbf16> to vector<1x1x8x8xbf16>
    %74 = vector.shape_cast %69 : vector<1x8x8xbf16> to vector<1x1x8x8xbf16>
    %75 = vector.shape_cast %71 : vector<1x8x8xbf16> to vector<1x1x8x8xbf16>
    %76 = tpu.concatenate %72, %73, %74, %75 in 1 : vector<1x1x8x8xbf16>, vector<1x1x8x8xbf16>, vector<1x1x8x8xbf16>, vector<1x1x8x8xbf16> -> vector<1x4x8x8xbf16>
    %77 = vector.shape_cast %76 : vector<1x4x8x8xbf16> to vector<4x8x8xbf16>
    "tpu.trace_start"() <{level = 10 : i32, message = "gpj,gtj->gpt"}> : () -> ()
    %cst_25 = arith.constant dense<0.000000e+00> : vector<4x8x8xf32>
    %78 = tpu.matmul %47, %62, %cst_25 {dimension_numbers = #tpu.dot_dimension_numbers<[2], [2], [1], [1], [0, 0, 0, 1, 1, 1], [0], [0]>} : vector<4x8x8xbf16>, vector<4x8x8xbf16>, vector<4x8x8xf32> -> vector<4x8x8xf32>
    "tpu.trace_stop"() : () -> ()
    %79 = vector.broadcast %17 : vector<4x1x8xf32> to vector<4x8x8xf32>
    %80 = arith.addf %78, %79 : vector<4x8x8xf32>
    %cst_26 = arith.constant dense<0xFF800000> : vector<4x8xf32>
    %81 = vector.multi_reduction <maximumf>, %80, %cst_26 [2] : vector<4x8x8xf32> to vector<4x8xf32>
    %82 = vector.shape_cast %81 : vector<4x8xf32> to vector<4x8x1xf32>
    %83 = vector.broadcast %82 : vector<4x8x1xf32> to vector<4x8x8xf32>
    %84 = arith.subf %80, %83 : vector<4x8x8xf32>
    %85 = math.exp %84 : vector<4x8x8xf32>
    %cst_27 = arith.constant dense<0.000000e+00> : vector<4x8xf32>
    %86 = vector.multi_reduction <add>, %85, %cst_27 [2] : vector<4x8x8xf32> to vector<4x8xf32>
    %87 = vector.shape_cast %86 : vector<4x8xf32> to vector<4x8x1xf32>
    %88 = tpu.reciprocal %87 : vector<4x8x1xf32> -> vector<4x8x1xf32>
    %89 = vector.broadcast %88 : vector<4x8x1xf32> to vector<4x8x8xf32>
    %90 = arith.mulf %85, %89 : vector<4x8x8xf32>
    %91 = vector.shape_cast %90 : vector<4x8x8xf32> to vector<1x4x8x8xf32>
    %c0_28 = arith.constant 0 : index
    %c0_29 = arith.constant 0 : index
    %c0_30 = arith.constant 0 : index
    %c0_31 = arith.constant 0 : index
    %92 = vector.load %arg23[%c0_28, %c0_29, %c0_30, %c0_31] : memref<1x4x8x8xf32, #tpu.memory_space<vmem>>, vector<1x4x8x8xf32>
    tpu.vector_store %arg23[%c0_28, %c0_29, %c0_30, %c0_31], %91 {strides = array<i32>} : memref<1x4x8x8xf32, #tpu.memory_space<vmem>>, vector<1x4x8x8xf32>,
    %93 = arith.truncf %90 : vector<4x8x8xf32> to vector<4x8x8xbf16>
    "tpu.trace_start"() <{level = 10 : i32, message = "gpt,gtj->gpj"}> : () -> ()
    %cst_32 = arith.constant dense<0.000000e+00> : vector<4x8x8xf32>
    %94 = tpu.matmul %93, %77, %cst_32 {dimension_numbers = #tpu.dot_dimension_numbers<[2], [1], [1], [2], [0, 0, 0, 1, 1, 2], [0], [0]>} : vector<4x8x8xbf16>, vector<4x8x8xbf16>, vector<4x8x8xf32> -> vector<4x8x8xf32>
    "tpu.trace_stop"() : () -> ()
    %95 = arith.truncf %94 : vector<4x8x8xf32> to vector<4x8x8xbf16>
    %96 = vector.shape_cast %95 : vector<4x8x8xbf16> to vector<1x4x8x8xbf16>
    %97 = vector.extract_strided_slice %96 {offsets = [0, 0, 0, 0], sizes = [1, 1, 8, 8], strides = [1, 1, 1, 1]} : vector<1x4x8x8xbf16> to vector<1x1x8x8xbf16>
    %98 = vector.shape_cast %97 : vector<1x1x8x8xbf16> to vector<1x8x8xbf16>
    %99 = vector.shape_cast %98 : vector<1x8x8xbf16> to vector<8x8xbf16>
    %100 = vector.extract_strided_slice %96 {offsets = [0, 1, 0, 0], sizes = [1, 1, 8, 8], strides = [1, 1, 1, 1]} : vector<1x4x8x8xbf16> to vector<1x1x8x8xbf16>
    %101 = vector.shape_cast %100 : vector<1x1x8x8xbf16> to vector<1x8x8xbf16>
    %102 = vector.shape_cast %101 : vector<1x8x8xbf16> to vector<8x8xbf16>
    %103 = vector.extract_strided_slice %96 {offsets = [0, 2, 0, 0], sizes = [1, 1, 8, 8], strides = [1, 1, 1, 1]} : vector<1x4x8x8xbf16> to vector<1x1x8x8xbf16>
    %104 = vector.shape_cast %103 : vector<1x1x8x8xbf16> to vector<1x8x8xbf16>
    %105 = vector.shape_cast %104 : vector<1x8x8xbf16> to vector<8x8xbf16>
    %106 = vector.extract_strided_slice %96 {offsets = [0, 3, 0, 0], sizes = [1, 1, 8, 8], strides = [1, 1, 1, 1]} : vector<1x4x8x8xbf16> to vector<1x1x8x8xbf16>
    %107 = vector.shape_cast %106 : vector<1x1x8x8xbf16> to vector<1x8x8xbf16>
    %108 = vector.shape_cast %107 : vector<1x8x8xbf16> to vector<8x8xbf16>
    %109 = tpu.concatenate %99, %102, %105, %108 in 1 : vector<8x8xbf16>, vector<8x8xbf16>, vector<8x8xbf16>, vector<8x8xbf16> -> vector<8x32xbf16>
    %c0_33 = arith.constant 0 : index
    %c0_34 = arith.constant 0 : index
    %110 = vector.load %arg10[%c0_33, %c0_34] : memref<32x32xbf16, #tpu.memory_space<vmem>>, vector<32x32xbf16>
    %cst_35 = arith.constant dense<0.000000e+00> : vector<8x32xf32>
    %111 = tpu.matmul %109, %110, %cst_35 {dimension_numbers = #tpu.dot_dimension_numbers<[1], [0], [0], [1], [0, 0, 1, 1], [], []>} : vector<8x32xbf16>, vector<32x32xbf16>, vector<8x32xf32> -> vector<8x32xf32>
    %c0_36 = arith.constant 0 : index
    %c0_37 = arith.constant 0 : index
    %112 = vector.load %arg11[%c0_36, %c0_37] : memref<1x32xf32, #tpu.memory_space<vmem>>, vector<1x32xf32>
    %113 = vector.broadcast %112 : vector<1x32xf32> to vector<8x32xf32>
    %114 = arith.addf %111, %113 : vector<8x32xf32>
    %c0_38 = arith.constant 0 : index
    %c0_39 = arith.constant 0 : index
    %c0_40 = arith.constant 0 : index
    %115 = vector.load %arg1[%c0_38, %c0_39, %c0_40] : memref<1x8x32xf32, #tpu.memory_space<vmem>>, vector<1x8x32xf32>
    %116 = vector.shape_cast %115 : vector<1x8x32xf32> to vector<8x32xf32>
    %117 = arith.addf %116, %114 : vector<8x32xf32>
    %c0_41 = arith.constant 0 : index
    %c0_42 = arith.constant 0 : index
    %118 = vector.load %arg12[%c0_41, %c0_42] : memref<1x32xf32, #tpu.memory_space<vmem>>, vector<1x32xf32>
    %c0_43 = arith.constant 0 : index
    %c0_44 = arith.constant 0 : index
    %119 = vector.load %arg13[%c0_43, %c0_44] : memref<1x32xf32, #tpu.memory_space<vmem>>, vector<1x32xf32>
    %cst_45 = arith.constant dense<0.000000e+00> : vector<8xf32>
    %120 = vector.multi_reduction <add>, %117, %cst_45 [1] : vector<8x32xf32> to vector<8xf32>
    %121 = vector.shape_cast %120 : vector<8xf32> to vector<8x1xf32>
    %cst_46 = arith.constant 3.200000e+01 : f32
    %122 = vector.broadcast %cst_46 : f32 to vector<8x1xf32>
    %123 = arith.divf %121, %122 : vector<8x1xf32>
    %124 = vector.broadcast %123 : vector<8x1xf32> to vector<8x32xf32>
    %125 = arith.subf %117, %124 : vector<8x32xf32>
    %126 = arith.mulf %125, %125 : vector<8x32xf32>
    %cst_47 = arith.constant dense<0.000000e+00> : vector<8xf32>
    %127 = vector.multi_reduction <add>, %126, %cst_47 [1] : vector<8x32xf32> to vector<8xf32>
    %128 = vector.shape_cast %127 : vector<8xf32> to vector<8x1xf32>
    %cst_48 = arith.constant 3.200000e+01 : f32
    %129 = vector.broadcast %cst_48 : f32 to vector<8x1xf32>
    %130 = arith.divf %128, %129 : vector<8x1xf32>
    %131 = vector.broadcast %123 : vector<8x1xf32> to vector<8x32xf32>
    %132 = arith.subf %117, %131 : vector<8x32xf32>
    %cst_49 = arith.constant 9.99999974E-6 : f32
    %133 = vector.broadcast %cst_49 : f32 to vector<8x1xf32>
    %134 = arith.addf %130, %133 : vector<8x1xf32>
    %135 = math.rsqrt %134 : vector<8x1xf32>
    %136 = vector.broadcast %135 : vector<8x1xf32> to vector<8x32xf32>
    %137 = arith.mulf %132, %136 : vector<8x32xf32>
    %138 = vector.broadcast %118 : vector<1x32xf32> to vector<8x32xf32>
    %139 = arith.mulf %137, %138 : vector<8x32xf32>
    %140 = vector.broadcast %119 : vector<1x32xf32> to vector<8x32xf32>
    %141 = arith.addf %139, %140 : vector<8x32xf32>
    %142 = arith.truncf %141 : vector<8x32xf32> to vector<8x32xbf16>
    %c0_50 = arith.constant 0 : index
    %c0_51 = arith.constant 0 : index
    %143 = vector.load %arg14[%c0_50, %c0_51] : memref<32x64xbf16, #tpu.memory_space<vmem>>, vector<32x64xbf16>
    %cst_52 = arith.constant dense<0.000000e+00> : vector<8x64xf32>
    %144 = tpu.matmul %142, %143, %cst_52 {dimension_numbers = #tpu.dot_dimension_numbers<[1], [0], [0], [1], [0, 0, 1, 1], [], []>} : vector<8x32xbf16>, vector<32x64xbf16>, vector<8x64xf32> -> vector<8x64xf32>
    %c0_53 = arith.constant 0 : index
    %c0_54 = arith.constant 0 : index
    %145 = vector.load %arg15[%c0_53, %c0_54] : memref<1x64xf32, #tpu.memory_space<vmem>>, vector<1x64xf32>
    %146 = vector.broadcast %145 : vector<1x64xf32> to vector<8x64xf32>
    %147 = arith.addf %144, %146 : vector<8x64xf32>
    %cst_55 = arith.constant 0.000000e+00 : f32
    %148 = vector.broadcast %cst_55 : f32 to vector<8x64xf32>
    %149 = arith.maximumf %147, %148 : vector<8x64xf32>
    %150 = arith.truncf %149 : vector<8x64xf32> to vector<8x64xbf16>
    %c0_56 = arith.constant 0 : index
    %c0_57 = arith.constant 0 : index
    %151 = vector.load %arg16[%c0_56, %c0_57] : memref<64x32xbf16, #tpu.memory_space<vmem>>, vector<64x32xbf16>
    %cst_58 = arith.constant dense<0.000000e+00> : vector<8x32xf32>
    %152 = tpu.matmul %150, %151, %cst_58 {dimension_numbers = #tpu.dot_dimension_numbers<[1], [0], [0], [1], [0, 0, 1, 1], [], []>} : vector<8x64xbf16>, vector<64x32xbf16>, vector<8x32xf32> -> vector<8x32xf32>
    %c0_59 = arith.constant 0 : index
    %c0_60 = arith.constant 0 : index
    %153 = vector.load %arg17[%c0_59, %c0_60] : memref<1x32xf32, #tpu.memory_space<vmem>>, vector<1x32xf32>
    %154 = vector.broadcast %153 : vector<1x32xf32> to vector<8x32xf32>
    %155 = arith.addf %152, %154 : vector<8x32xf32>
    %156 = arith.addf %141, %155 : vector<8x32xf32>
    %c0_61 = arith.constant 0 : index
    %c0_62 = arith.constant 0 : index
    %157 = vector.load %arg18[%c0_61, %c0_62] : memref<1x32xf32, #tpu.memory_space<vmem>>, vector<1x32xf32>
    %c0_63 = arith.constant 0 : index
    %c0_64 = arith.constant 0 : index
    %158 = vector.load %arg19[%c0_63, %c0_64] : memref<1x32xf32, #tpu.memory_space<vmem>>, vector<1x32xf32>
    %cst_65 = arith.constant dense<0.000000e+00> : vector<8xf32>
    %159 = vector.multi_reduction <add>, %156, %cst_65 [1] : vector<8x32xf32> to vector<8xf32>
    %160 = vector.shape_cast %159 : vector<8xf32> to vector<8x1xf32>
    %cst_66 = arith.constant 3.200000e+01 : f32
    %161 = vector.broadcast %cst_66 : f32 to vector<8x1xf32>
    %162 = arith.divf %160, %161 : vector<8x1xf32>
    %163 = vector.broadcast %162 : vector<8x1xf32> to vector<8x32xf32>
    %164 = arith.subf %156, %163 : vector<8x32xf32>
    %165 = arith.mulf %164, %164 : vector<8x32xf32>
    %cst_67 = arith.constant dense<0.000000e+00> : vector<8xf32>
    %166 = vector.multi_reduction <add>, %165, %cst_67 [1] : vector<8x32xf32> to vector<8xf32>
    %167 = vector.shape_cast %166 : vector<8xf32> to vector<8x1xf32>
    %cst_68 = arith.constant 3.200000e+01 : f32
    %168 = vector.broadcast %cst_68 : f32 to vector<8x1xf32>
    %169 = arith.divf %167, %168 : vector<8x1xf32>
    %170 = vector.broadcast %162 : vector<8x1xf32> to vector<8x32xf32>
    %171 = arith.subf %156, %170 : vector<8x32xf32>
    %cst_69 = arith.constant 9.99999974E-6 : f32
    %172 = vector.broadcast %cst_69 : f32 to vector<8x1xf32>
    %173 = arith.addf %169, %172 : vector<8x1xf32>
    %174 = math.rsqrt %173 : vector<8x1xf32>
    %175 = vector.broadcast %174 : vector<8x1xf32> to vector<8x32xf32>
    %176 = arith.mulf %171, %175 : vector<8x32xf32>
    %177 = vector.broadcast %157 : vector<1x32xf32> to vector<8x32xf32>
    %178 = arith.mulf %176, %177 : vector<8x32xf32>
    %179 = vector.broadcast %158 : vector<1x32xf32> to vector<8x32xf32>
    %180 = arith.addf %178, %179 : vector<8x32xf32>
    %181 = vector.shape_cast %180 : vector<8x32xf32> to vector<1x8x32xf32>
    %c0_70 = arith.constant 0 : index
    %c0_71 = arith.constant 0 : index
    %c0_72 = arith.constant 0 : index
    %182 = vector.load %arg22[%c0_70, %c0_71, %c0_72] : memref<1x8x32xf32, #tpu.memory_space<vmem>>, vector<1x8x32xf32>
    tpu.vector_store %arg22[%c0_70, %c0_71, %c0_72], %181 {strides = array<i32>} : memref<1x8x32xf32, #tpu.memory_space<vmem>>, vector<1x8x32xf32>,
    %183 = vector.shape_cast %180 : vector<8x32xf32> to vector<1x8x32xf32>
    %c0_73 = arith.constant 0 : index
    %c0_74 = arith.constant 0 : index
    %184 = vector.load %arg20[%c0_73, %c0_74] : memref<1x32xf32, #tpu.memory_space<vmem>>, vector<1x32xf32>
    %185 = vector.shape_cast %184 : vector<1x32xf32> to vector<1x1x32xf32>
    %186 = vector.broadcast %185 : vector<1x1x32xf32> to vector<1x8x32xf32>
    %187 = arith.mulf %183, %186 : vector<1x8x32xf32>
    %cst_75 = arith.constant dense<0.000000e+00> : vector<1x8xf32>
    %188 = vector.multi_reduction <add>, %187, %cst_75 [2] : vector<1x8x32xf32> to vector<1x8xf32>
    %c0_76 = arith.constant 0 : index
    %c0_77 = arith.constant 0 : index
    %189 = vector.load %arg21[%c0_76, %c0_77] : memref<1x1xf32, #tpu.memory_space<vmem>>, vector<1x1xf32>
    %190 = vector.broadcast %189 : vector<1x1xf32> to vector<1x8xf32>
    %191 = arith.addf %188, %190 : vector<1x8xf32>
    %192 = vector.shape_cast %191 : vector<1x8xf32> to vector<1x1x8xf32>
    %c0_78 = arith.constant 0 : index
    %c0_79 = arith.constant 0 : index
    %c0_80 = arith.constant 0 : index
    %193 = vector.load %arg24[%c0_78, %c0_79, %c0_80] : memref<1x1x8xf32, #tpu.memory_space<vmem>>, vector<1x1x8xf32>
    tpu.vector_store %arg24[%c0_78, %c0_79, %c0_80], %192 {strides = array<i32>} : memref<1x1x8xf32, #tpu.memory_space<vmem>>, vector<1x1x8xf32>,
    %194 = arith.negf %191 : vector<1x8xf32>
    %195 = math.exp %194 : vector<1x8xf32>
    %cst_81 = arith.constant 1.000000e+00 : f32
    %196 = vector.broadcast %cst_81 : f32 to vector<1x8xf32>
    %197 = arith.addf %196, %195 : vector<1x8xf32>
    %198 = arith.divf %196, %197 : vector<1x8xf32>
    %199 = vector.shape_cast %198 : vector<1x8xf32> to vector<1x1x8xf32>
    %c0_82 = arith.constant 0 : index
    %c0_83 = arith.constant 0 : index
    %c0_84 = arith.constant 0 : index
    %200 = vector.load %arg25[%c0_82, %c0_83, %c0_84] : memref<1x1x8xf32, #tpu.memory_space<vmem>>, vector<1x1x8xf32>
    tpu.vector_store %arg25[%c0_82, %c0_83, %c0_84], %199 {strides = array<i32>} : memref<1x1x8xf32, #tpu.memory_space<vmem>>, vector<1x1x8xf32>,
    return
  }
  func.func @transform_0(%arg0: i32) -> (i32, i32, i32) {
    %c0_i32 = arith.constant 0 : i32
    %c0_i32_0 = arith.constant 0 : i32
    %c0_i32_1 = arith.constant 0 : i32
    return %arg0, %c0_i32, %c0_i32_0 : i32, i32, i32
  }
  func.func @transform_1(%arg0: i32) -> (i32, i32, i32) {
    %c0_i32 = arith.constant 0 : i32
    %c0_i32_0 = arith.constant 0 : i32
    %c0_i32_1 = arith.constant 0 : i32
    return %arg0, %c0_i32, %c0_i32_0 : i32, i32, i32
  }
  func.func @transform_2(%arg0: i32) -> (i32, i32, i32) {
    %c0_i32 = arith.constant 0 : i32
    %c0_i32_0 = arith.constant 0 : i32
    %c0_i32_1 = arith.constant 0 : i32
    return %arg0, %c0_i32, %c0_i32_0 : i32, i32, i32
  }
  func.func @transform_3(%arg0: i32) -> (i32, i32) {
    %c0_i32 = arith.constant 0 : i32
    %c0_i32_0 = arith.constant 0 : i32
    %c0_i32_1 = arith.constant 0 : i32
    return %c0_i32, %c0_i32_0 : i32, i32
  }
  func.func @transform_4(%arg0: i32) -> (i32, i32) {
    %c0_i32 = arith.constant 0 : i32
    %c0_i32_0 = arith.constant 0 : i32
    %c0_i32_1 = arith.constant 0 : i32
    return %c0_i32, %c0_i32_0 : i32, i32
  }
  func.func @transform_5(%arg0: i32) -> (i32, i32) {
    %c0_i32 = arith.constant 0 : i32
    %c0_i32_0 = arith.constant 0 : i32
    %c0_i32_1 = arith.constant 0 : i32
    return %c0_i32, %c0_i32_0 : i32, i32
  }
  func.func @transform_6(%arg0: i32) -> (i32, i32) {
    %c0_i32 = arith.constant 0 : i32
    %c0_i32_0 = arith.constant 0 : i32
    %c0_i32_1 = arith.constant 0 : i32
    return %c0_i32, %c0_i32_0 : i32, i32
  }
  func.func @transform_7(%arg0: i32) -> (i32, i32) {
    %c0_i32 = arith.constant 0 : i32
    %c0_i32_0 = arith.constant 0 : i32
    %c0_i32_1 = arith.constant 0 : i32
    return %c0_i32, %c0_i32_0 : i32, i32
  }
  func.func @transform_8(%arg0: i32) -> (i32, i32) {
    %c0_i32 = arith.constant 0 : i32
    %c0_i32_0 = arith.constant 0 : i32
    %c0_i32_1 = arith.constant 0 : i32
    return %c0_i32, %c0_i32_0 : i32, i32
  }
  func.func @transform_9(%arg0: i32) -> (i32, i32) {
    %c0_i32 = arith.constant 0 : i32
    %c0_i32_0 = arith.constant 0 : i32
    %c0_i32_1 = arith.constant 0 : i32
    return %c0_i32, %c0_i32_0 : i32, i32
  }
  func.func @transform_10(%arg0: i32) -> (i32, i32) {
    %c0_i32 = arith.constant 0 : i32
    %c0_i32_0 = arith.constant 0 : i32
    %c0_i32_1 = arith.constant 0 : i32
    return %c0_i32, %c0_i32_0 : i32, i32
  }
  func.func @transform_11(%arg0: i32) -> (i32, i32) {
    %c0_i32 = arith.constant 0 : i32
    %c0_i32_0 = arith.constant 0 : i32
    %c0_i32_1 = arith.constant 0 : i32
    return %c0_i32, %c0_i32_0 : i32, i32
  }
  func.func @transform_12(%arg0: i32) -> (i32, i32) {
    %c0_i32 = arith.constant 0 : i32
    %c0_i32_0 = arith.constant 0 : i32
    %c0_i32_1 = arith.constant 0 : i32
    return %c0_i32, %c0_i32_0 : i32, i32
  }
  func.func @transform_13(%arg0: i32) -> (i32, i32) {
    %c0_i32 = arith.constant 0 : i32
    %c0_i32_0 = arith.constant 0 : i32
    %c0_i32_1 = arith.constant 0 : i32
    return %c0_i32, %c0_i32_0 : i32, i32
  }
  func.func @transform_14(%arg0: i32) -> (i32, i32) {
    %c0_i32 = arith.constant 0 : i32
    %c0_i32_0 = arith.constant 0 : i32
    %c0_i32_1 = arith.constant 0 : i32
    return %c0_i32, %c0_i32_0 : i32, i32
  }
  func.func @transform_15(%arg0: i32) -> (i32, i32) {
    %c0_i32 = arith.constant 0 : i32
    %c0_i32_0 = arith.constant 0 : i32
    %c0_i32_1 = arith.constant 0 : i32
    return %c0_i32, %c0_i32_0 : i32, i32
  }
  func.func @transform_16(%arg0: i32) -> (i32, i32) {
    %c0_i32 = arith.constant 0 : i32
    %c0_i32_0 = arith.constant 0 : i32
    %c0_i32_1 = arith.constant 0 : i32
    return %c0_i32, %c0_i32_0 : i32, i32
  }
  func.func @transform_17(%arg0: i32) -> (i32, i32) {
    %c0_i32 = arith.constant 0 : i32
    %c0_i32_0 = arith.constant 0 : i32
    %c0_i32_1 = arith.constant 0 : i32
    return %c0_i32, %c0_i32_0 : i32, i32
  }
  func.func @transform_18(%arg0: i32) -> (i32, i32) {
    %c0_i32 = arith.constant 0 : i32
    %c0_i32_0 = arith.constant 0 : i32
    %c0_i32_1 = arith.constant 0 : i32
    return %c0_i32, %c0_i32_0 : i32, i32
  }
  func.func @transform_19(%arg0: i32) -> (i32, i32) {
    %c0_i32 = arith.constant 0 : i32
    %c0_i32_0 = arith.constant 0 : i32
    %c0_i32_1 = arith.constant 0 : i32
    return %c0_i32, %c0_i32_0 : i32, i32
  }
  func.func @transform_20(%arg0: i32) -> (i32, i32) {
    %c0_i32 = arith.constant 0 : i32
    %c0_i32_0 = arith.constant 0 : i32
    %c0_i32_1 = arith.constant 0 : i32
    return %c0_i32, %c0_i32_0 : i32, i32
  }
  func.func @transform_21(%arg0: i32) -> (i32, i32, i32) {
    %c0_i32 = arith.constant 0 : i32
    %c0_i32_0 = arith.constant 0 : i32
    %c0_i32_1 = arith.constant 0 : i32
    return %arg0, %c0_i32, %c0_i32_0 : i32, i32, i32
  }
  func.func @transform_22(%arg0: i32) -> (i32, i32, i32, i32) {
    %c0_i32 = arith.constant 0 : i32
    %c0_i32_0 = arith.constant 0 : i32
    %c0_i32_1 = arith.constant 0 : i32
    %c0_i32_2 = arith.constant 0 : i32
    return %arg0, %c0_i32, %c0_i32_0, %c0_i32_1 : i32, i32, i32, i32
  }
  func.func @transform_23(%arg0: i32) -> (i32, i32, i32) {
    %c0_i32 = arith.constant 0 : i32
    %c0_i32_0 = arith.constant 0 : i32
    %c0_i32_1 = arith.constant 0 : i32
    return %arg0, %c0_i32, %c0_i32_0 : i32, i32, i32
  }
  func.func @transform_24(%arg0: i32) -> (i32, i32, i32) {
    %c0_i32 = arith.constant 0 : i32
    %c0_i32_0 = arith.constant 0 : i32
    %c0_i32_1 = arith.constant 0 : i32
    return %arg0, %c0_i32, %c0_i32_0 : i32, i32, i32
  }
}

module attributes {stable_mosaic.version = 11 : i64} {
  func.func @cross_modal_kernel(%arg0: i32, %arg1: memref<1x8x32xf32, #tpu.memory_space<vmem>>, %arg2: memref<1x8x32xf32, #tpu.memory_space<vmem>>, %arg3: memref<1x1x8xf32, #tpu.memory_space<vmem>>, %arg4: memref<32x32xbf16, #tpu.memory_space<vmem>>, %arg5: memref<1x32xf32, #tpu.memory_space<vmem>>, %arg6: memref<32x32xbf16, #tpu.memory_space<vmem>>, %arg7: memref<1x32xf32, #tpu.memory_space<vmem>>, %arg8: memref<32x32xbf16, #tpu.memory_space<vmem>>, %arg9: memref<1x32xf32, #tpu.memory_space<vmem>>, %arg10: memref<32x32xbf16, #tpu.memory_space<vmem>>, %arg11: memref<1x32xf32, #tpu.memory_space<vmem>>, %arg12: memref<1x32xf32, #tpu.memory_space<vmem>>, %arg13: memref<1x32xf32, #tpu.memory_space<vmem>>, %arg14: memref<32x64xbf16, #tpu.memory_space<vmem>>, %arg15: memref<1x64xf32, #tpu.memory_space<vmem>>, %arg16: memref<64x32xbf16, #tpu.memory_space<vmem>>, %arg17: memref<1x32xf32, #tpu.memory_space<vmem>>, %arg18: memref<1x32xf32, #tpu.memory_space<vmem>>, %arg19: memref<1x32xf32, #tpu.memory_space<vmem>>, %arg20: memref<1x32xf32, #tpu.memory_space<vmem>>, %arg21: memref<1x1xf32, #tpu.memory_space<vmem>>, %arg22: memref<1x8x32xf32, #tpu.memory_space<vmem>>, %arg23: memref<1x4x8x8xf32, #tpu.memory_space<vmem>>, %arg24: memref<1x1x8xf32, #tpu.memory_space<vmem>>, %arg25: memref<1x1x8xf32, #tpu.memory_space<vmem>>) attributes {dimension_semantics = [#tpu.dimension_semantics<parallel>], iteration_bounds = array<i64: 2>, scalar_prefetch = 0 : i64, scratch_operands = 0 : i64, tpu.core_type = #tpu.core_type<tc>, window_params = [{transform_indices = @transform_0, window_bounds = array<i64: 1, 8, 32>}, {transform_indices = @transform_1, window_bounds = array<i64: 1, 8, 32>}, {transform_indices = @transform_2, window_bounds = array<i64: 1, 1, 8>}, {pipeline_mode = #tpu.pipeline_mode<synchronous>, transform_indices = @transform_3, window_bounds = array<i64: 32, 32>}, {pipeline_mode = #tpu.pipeline_mode<synchronous>, transform_indices = @transform_4, window_bounds = array<i64: 1, 32>}, {pipeline_mode = #tpu.pipeline_mode<synchronous>, transform_indices = @transform_5, window_bounds = array<i64: 32, 32>}, {pipeline_mode = #tpu.pipeline_mode<synchronous>, transform_indices = @transform_6, window_bounds = array<i64: 1, 32>}, {pipeline_mode = #tpu.pipeline_mode<synchronous>, transform_indices = @transform_7, window_bounds = array<i64: 32, 32>}, {pipeline_mode = #tpu.pipeline_mode<synchronous>, transform_indices = @transform_8, window_bounds = array<i64: 1, 32>}, {pipeline_mode = #tpu.pipeline_mode<synchronous>, transform_indices = @transform_9, window_bounds = array<i64: 32, 32>}, {pipeline_mode = #tpu.pipeline_mode<synchronous>, transform_indices = @transform_10, window_bounds = array<i64: 1, 32>}, {pipeline_mode = #tpu.pipeline_mode<synchronous>, transform_indices = @transform_11, window_bounds = array<i64: 1, 32>}, {pipeline_mode = #tpu.pipeline_mode<synchronous>, transform_indices = @transform_12, window_bounds = array<i64: 1, 32>}, {pipeline_mode = #tpu.pipeline_mode<synchronous>, transform_indices = @transform_13, window_bounds = array<i64: 32, 64>}, {pipeline_mode = #tpu.pipeline_mode<synchronous>, transform_indices = @transform_14, window_bounds = array<i64: 1, 64>}, {pipeline_mode = #tpu.pipeline_mode<synchronous>, transform_indices = @transform_15, window_bounds = array<i64: 64, 32>}, {pipeline_mode = #tpu.pipeline_mode<synchronous>, transform_indices = @transform_16, window_bounds = array<i64: 1, 32>}, {pipeline_mode = #tpu.pipeline_mode<synchronous>, transform_indices = @transform_17, window_bounds = array<i64: 1, 32>}, {pipeline_mode = #tpu.pipeline_mode<synchronous>, transform_indices = @transform_18, window_bounds = array<i64: 1, 32>}, {pipeline_mode = #tpu.pipeline_mode<synchronous>, transform_indices = @transform_19, window_bounds = array<i64: 1, 32>}, {pipeline_mode = #tpu.pipeline_mode<synchronous>, transform_indices = @transform_20, window_bounds = array<i64: 1, 1>}, {transform_indices = @transform_21, window_bounds = array<i64: 1, 8, 32>}, {transform_indices = @transform_22, window_bounds = array<i64: 1, 4, 8, 8>}, {transform_indices = @transform_23, window_bounds = array<i64: 1, 1, 8>}, {transform_indices = @transform_24, window_bounds = array<i64: 1, 1, 8>}]} {
    %c0 = arith.constant 0 : index
    %c0_0 = arith.constant 0 : index
    %c0_1 = arith.constant 0 : index
    %0 = vector.load %arg1[%c0, %c0_0, %c0_1] : memref<1x8x32xf32, #tpu.memory_space<vmem>>, vector<1x8x32xf32>
    %1 = vector.shape_cast %0 : vector<1x8x32xf32> to vector<8x32xf32>
    %2 = arith.truncf %1 : vector<8x32xf32> to vector<8x32xbf16>
    %c0_2 = arith.constant 0 : index
    %c0_3 = arith.constant 0 : index
    %c0_4 = arith.constant 0 : index
    %3 = vector.load %arg2[%c0_2, %c0_3, %c0_4] : memref<1x8x32xf32, #tpu.memory_space<vmem>>, vector<1x8x32xf32>
    %4 = vector.shape_cast %3 : vector<1x8x32xf32> to vector<8x32xf32>
    %5 = arith.truncf %4 : vector<8x32xf32> to vector<8x32xbf16>
    %c0_5 = arith.constant 0 : index
    %c0_6 = arith.constant 0 : index
    %c0_7 = arith.constant 0 : index
    %6 = vector.load %arg3[%c0_5, %c0_6, %c0_7] : memref<1x1x8xf32, #tpu.memory_space<vmem>>, vector<1x1x8xf32>
    %7 = vector.shape_cast %6 : vector<1x1x8xf32> to vector<1x8xf32>
    %cst = arith.constant 5.000000e-01 : f32
    %8 = vector.broadcast %cst : f32 to vector<1x8xf32>
    %9 = arith.cmpf ogt, %7, %8 : vector<1x8xf32>
    %cst_8 = arith.constant 0.000000e+00 : f32
    %cst_9 = arith.constant -1.000000e+30 : f32
    %10 = vector.broadcast %cst_8 : f32 to vector<1x8xf32>
    %11 = vector.broadcast %cst_9 : f32 to vector<1x8xf32>
    %12 = arith.select %9, %10, %11 : vector<1x8xi1>, vector<1x8xf32>
    %13 = vector.shape_cast %12 : vector<1x8xf32> to vector<1x1x8xf32>
    %14 = vector.shape_cast %13 : vector<1x1x8xf32> to vector<1x1x8xf32>
    %15 = vector.broadcast %14 : vector<1x1x8xf32> to vector<1x4x8xf32>
    %16 = vector.shape_cast %15 : vector<1x4x8xf32> to vector<4x8xf32>
    %17 = vector.shape_cast %16 : vector<4x8xf32> to vector<4x1x8xf32>
    %c0_10 = arith.constant 0 : index
    %c0_11 = arith.constant 0 : index
    %18 = vector.load %arg4[%c0_10, %c0_11] : memref<32x32xbf16, #tpu.memory_space<vmem>>, vector<32x32xbf16>
    %cst_12 = arith.constant dense<0.000000e+00> : vector<8x32xf32>
    %19 = tpu.matmul %2, %18, %cst_12 {dimension_numbers = #tpu.dot_dimension_numbers<[1], [0], [0], [1], [0, 0, 1, 1], [], []>} : vector<8x32xbf16>, vector<32x32xbf16>, vector<8x32xf32> -> vector<8x32xf32>
    %c0_13 = arith.constant 0 : index
    %c0_14 = arith.constant 0 : index
    %20 = vector.load %arg5[%c0_13, %c0_14] : memref<1x32xf32, #tpu.memory_space<vmem>>, vector<1x32xf32>
    %21 = vector.broadcast %20 : vector<1x32xf32> to vector<8x32xf32>
    %22 = arith.addf %19, %21 : vector<8x32xf32>
    %c0_15 = arith.constant 0 : index
    %c0_16 = arith.constant 0 : index
    %23 = vector.load %arg6[%c0_15, %c0_16] : memref<32x32xbf16, #tpu.memory_space<vmem>>, vector<32x32xbf16>
    %cst_17 = arith.constant dense<0.000000e+00> : vector<8x32xf32>
    %24 = tpu.matmul %5, %23, %cst_17 {dimension_numbers = #tpu.dot_dimension_numbers<[1], [0], [0], [1], [0, 0, 1, 1], [], []>} : vector<8x32xbf16>, vector<32x32xbf16>, vector<8x32xf32> -> vector<8x32xf32>
    %c0_18 = arith.constant 0 : index
    %c0_19 = arith.constant 0 : index
    %25 = vector.load %arg7[%c0_18, %c0_19] : memref<1x32xf32, #tpu.memory_space<vmem>>, vector<1x32xf32>
    %26 = vector.broadcast %25 : vector<1x32xf32> to vector<8x32xf32>
    %27 = arith.addf %24, %26 : vector<8x32xf32>
    %c0_20 = arith.constant 0 : index
    %c0_21 = arith.constant 0 : index
    %28 = vector.load %arg8[%c0_20, %c0_21] : memref<32x32xbf16, #tpu.memory_space<vmem>>, vector<32x32xbf16>
    %cst_22 = arith.constant dense<0.000000e+00> : vector<8x32xf32>
    %29 = tpu.matmul %5, %28, %cst_22 {dimension_numbers = #tpu.dot_dimension_numbers<[1], [0], [0], [1], [0, 0, 1, 1], [], []>} : vector<8x32xbf16>, vector<32x32xbf16>, vector<8x32xf32> -> vector<8x32xf32>
    %c0_23 = arith.constant 0 : index
    %c0_24 = arith.constant 0 : index
    %30 = vector.load %arg9[%c0_23, %c0_24] : memref<1x32xf32, #tpu.memory_space<vmem>>, vector<1x32xf32>
    %31 = vector.broadcast %30 : vector<1x32xf32> to vector<8x32xf32>
    %32 = arith.addf %29, %31 : vector<8x32xf32>
    %33 = arith.truncf %22 : vector<8x32xf32> to vector<8x32xbf16>
    %34 = vector.extract_strided_slice %33 {offsets = [0, 0], sizes = [8, 8], strides = [1, 1]} : vector<8x32xbf16> to vector<8x8xbf16>
    %35 = vector.shape_cast %34 : vector<8x8xbf16> to vector<1x8x8xbf16>
    %36 = vector.extract_strided_slice %33 {offsets = [0, 8], sizes = [8, 8], strides = [1, 1]} : vector<8x32xbf16> to vector<8x8xbf16>
    %37 = vector.shape_cast %36 : vector<8x8xbf16> to vector<1x8x8xbf16>
    %38 = vector.extract_strided_slice %33 {offsets = [0, 16], sizes = [8, 8], strides = [1, 1]} : vector<8x32xbf16> to vector<8x8xbf16>
    %39 = vector.shape_cast %38 : vector<8x8xbf16> to vector<1x8x8xbf16>
    %40 = vector.extract_strided_slice %33 {offsets = [0, 24], sizes = [8, 8], strides = [1, 1]} : vector<8x32xbf16> to vector<8x8xbf16>
    %41 = vector.shape_cast %40 : vector<8x8xbf16> to vector<1x8x8xbf16>
    %42 = vector.shape_cast %35 : vector<1x8x8xbf16> to vector<1x1x8x8xbf16>
    %43 = vector.shape_cast %37 : vector<1x8x8xbf16> to vector<1x1x8x8xbf16>
    %44 = vector.shape_cast %39 : vector<1x8x8xbf16> to vector<1x1x8x8xbf16>
    %45 = vector.shape_cast %41 : vector<1x8x8xbf16> to vector<1x1x8x8xbf16>
    %46 = tpu.concatenate %42, %43, %44, %45 in 1 : vector<1x1x8x8xbf16>, vector<1x1x8x8xbf16>, vector<1x1x8x8xbf16>, vector<1x1x8x8xbf16> -> vector<1x4x8x8xbf16>
    %47 = vector.shape_cast %46 : vector<1x4x8x8xbf16> to vector<4x8x8xbf16>
    %48 = arith.truncf %27 : vector<8x32xf32> to vector<8x32xbf16>
    %49 = vector.extract_strided_slice %48 {offsets = [0, 0], sizes = [8, 8], strides = [1, 1]} : vector<8x32xbf16> to vector<8x8xbf16>
    %50 = vector.shape_cast %49 : vector<8x8xbf16> to vector<1x8x8xbf16>
    %51 = vector.extract_strided_slice %48 {offsets = [0, 8], sizes = [8, 8], strides = [1, 1]} : vector<8x32xbf16> to vector<8x8xbf16>
    %52 = vector.shape_cast %51 : vector<8x8xbf16> to vector<1x8x8xbf16>
    %53 = vector.extract_strided_slice %48 {offsets = [0, 16], sizes = [8, 8], strides = [1, 1]} : vector<8x32xbf16> to vector<8x8xbf16>
    %54 = vector.shape_cast %53 : vector<8x8xbf16> to vector<1x8x8xbf16>
    %55 = vector.extract_strided_slice %48 {offsets = [0, 24], sizes = [8, 8], strides = [1, 1]} : vector<8x32xbf16> to vector<8x8xbf16>
    %56 = vector.shape_cast %55 : vector<8x8xbf16> to vector<1x8x8xbf16>
    %57 = vector.shape_cast %50 : vector<1x8x8xbf16> to vector<1x1x8x8xbf16>
    %58 = vector.shape_cast %52 : vector<1x8x8xbf16> to vector<1x1x8x8xbf16>
    %59 = vector.shape_cast %54 : vector<1x8x8xbf16> to vector<1x1x8x8xbf16>
    %60 = vector.shape_cast %56 : vector<1x8x8xbf16> to vector<1x1x8x8xbf16>
    %61 = tpu.concatenate %57, %58, %59, %60 in 1 : vector<1x1x8x8xbf16>, vector<1x1x8x8xbf16>, vector<1x1x8x8xbf16>, vector<1x1x8x8xbf16> -> vector<1x4x8x8xbf16>
    %62 = vector.shape_cast %61 : vector<1x4x8x8xbf16> to vector<4x8x8xbf16>
    %63 = arith.truncf %32 : vector<8x32xf32> to vector<8x32xbf16>
    %64 = vector.extract_strided_slice %63 {offsets = [0, 0], sizes = [8, 8], strides = [1, 1]} : vector<8x32xbf16> to vector<8x8xbf16>
    %65 = vector.shape_cast %64 : vector<8x8xbf16> to vector<1x8x8xbf16>
    %66 = vector.extract_strided_slice %63 {offsets = [0, 8], sizes = [8, 8], strides = [1, 1]} : vector<8x32xbf16> to vector<8x8xbf16>
    %67 = vector.shape_cast %66 : vector<8x8xbf16> to vector<1x8x8xbf16>
    %68 = vector.extract_strided_slice %63 {offsets = [0, 16], sizes = [8, 8], strides = [1, 1]} : vector<8x32xbf16> to vector<8x8xbf16>
    %69 = vector.shape_cast %68 : vector<8x8xbf16> to vector<1x8x8xbf16>
    %70 = vector.extract_strided_slice %63 {offsets = [0, 24], sizes = [8, 8], strides = [1, 1]} : vector<8x32xbf16> to vector<8x8xbf16>
    %71 = vector.shape_cast %70 : vector<8x8xbf16> to vector<1x8x8xbf16>
    %72 = vector.shape_cast %65 : vector<1x8x8xbf16> to vector<1x1x8x8xbf16>
    %73 = vector.shape_cast %67 : vector<1x8x8xbf16> to vector<1x1x8x8xbf16>
    %74 = vector.shape_cast %69 : vector<1x8x8xbf16> to vector<1x1x8x8xbf16>
    %75 = vector.shape_cast %71 : vector<1x8x8xbf16> to vector<1x1x8x8xbf16>
    %76 = tpu.concatenate %72, %73, %74, %75 in 1 : vector<1x1x8x8xbf16>, vector<1x1x8x8xbf16>, vector<1x1x8x8xbf16>, vector<1x1x8x8xbf16> -> vector<1x4x8x8xbf16>
    %77 = vector.shape_cast %76 : vector<1x4x8x8xbf16> to vector<4x8x8xbf16>
    "tpu.trace_start"() <{level = 10 : i32, message = "gpj,gtj->gpt"}> : () -> ()
    %cst_25 = arith.constant dense<0.000000e+00> : vector<4x8x8xf32>
    %78 = tpu.matmul %47, %62, %cst_25 {dimension_numbers = #tpu.dot_dimension_numbers<[2], [2], [1], [1], [0, 0, 0, 1, 1, 1], [0], [0]>} : vector<4x8x8xbf16>, vector<4x8x8xbf16>, vector<4x8x8xf32> -> vector<4x8x8xf32>
    "tpu.trace_stop"() : () -> ()
    %79 = vector.broadcast %17 : vector<4x1x8xf32> to vector<4x8x8xf32>
    %80 = arith.addf %78, %79 : vector<4x8x8xf32>
    %cst_26 = arith.constant dense<0xFF800000> : vector<4x8xf32>
    %81 = vector.multi_reduction <maximumf>, %80, %cst_26 [2] : vector<4x8x8xf32> to vector<4x8xf32>
    %82 = vector.shape_cast %81 : vector<4x8xf32> to vector<4x8x1xf32>
    %83 = vector.broadcast %82 : vector<4x8x1xf32> to vector<4x8x8xf32>
    %84 = arith.subf %80, %83 : vector<4x8x8xf32>
    %85 = math.exp %84 : vector<4x8x8xf32>
    %cst_27 = arith.constant dense<0.000000e+00> : vector<4x8xf32>
    %86 = vector.multi_reduction <add>, %85, %cst_27 [2] : vector<4x8x8xf32> to vector<4x8xf32>
    %87 = vector.shape_cast %86 : vector<4x8xf32> to vector<4x8x1xf32>
    %88 = tpu.reciprocal %87 : vector<4x8x1xf32> -> vector<4x8x1xf32>
    %89 = vector.broadcast %88 : vector<4x8x1xf32> to vector<4x8x8xf32>
    %90 = arith.mulf %85, %89 : vector<4x8x8xf32>
    %91 = vector.shape_cast %90 : vector<4x8x8xf32> to vector<1x4x8x8xf32>
    %c0_28 = arith.constant 0 : index
    %c0_29 = arith.constant 0 : index
    %c0_30 = arith.constant 0 : index
    %c0_31 = arith.constant 0 : index
    %92 = vector.load %arg23[%c0_28, %c0_29, %c0_30, %c0_31] : memref<1x4x8x8xf32, #tpu.memory_space<vmem>>, vector<1x4x8x8xf32>
    tpu.vector_store %arg23[%c0_28, %c0_29, %c0_30, %c0_31], %91 {strides = array<i32>} : memref<1x4x8x8xf32, #tpu.memory_space<vmem>>, vector<1x4x8x8xf32>,
    %93 = arith.truncf %90 : vector<4x8x8xf32> to vector<4x8x8xbf16>
    "tpu.trace_start"() <{level = 10 : i32, message = "gpt,gtj->gpj"}> : () -> ()
    %cst_32 = arith.constant dense<0.000000e+00> : vector<4x8x8xf32>
    %94 = tpu.matmul %93, %77, %cst_32 {dimension_numbers = #tpu.dot_dimension_numbers<[2], [1], [1], [2], [0, 0, 0, 1, 1, 2], [0], [0]>} : vector<4x8x8xbf16>, vector<4x8x8xbf16>, vector<4x8x8xf32> -> vector<4x8x8xf32>
    "tpu.trace_stop"() : () -> ()
    %95 = arith.truncf %94 : vector<4x8x8xf32> to vector<4x8x8xbf16>
    %96 = vector.shape_cast %95 : vector<4x8x8xbf16> to vector<1x4x8x8xbf16>
    %97 = vector.extract_strided_slice %96 {offsets = [0, 0, 0, 0], sizes = [1, 1, 8, 8], strides = [1, 1, 1, 1]} : vector<1x4x8x8xbf16> to vector<1x1x8x8xbf16>
    %98 = vector.shape_cast %97 : vector<1x1x8x8xbf16> to vector<1x8x8xbf16>
    %99 = vector.shape_cast %98 : vector<1x8x8xbf16> to vector<8x8xbf16>
    %100 = vector.extract_strided_slice %96 {offsets = [0, 1, 0, 0], sizes = [1, 1, 8, 8], strides = [1, 1, 1, 1]} : vector<1x4x8x8xbf16> to vector<1x1x8x8xbf16>
    %101 = vector.shape_cast %100 : vector<1x1x8x8xbf16> to vector<1x8x8xbf16>
    %102 = vector.shape_cast %101 : vector<1x8x8xbf16> to vector<8x8xbf16>
    %103 = vector.extract_strided_slice %96 {offsets = [0, 2, 0, 0], sizes = [1, 1, 8, 8], strides = [1, 1, 1, 1]} : vector<1x4x8x8xbf16> to vector<1x1x8x8xbf16>
    %104 = vector.shape_cast %103 : vector<1x1x8x8xbf16> to vector<1x8x8xbf16>
    %105 = vector.shape_cast %104 : vector<1x8x8xbf16> to vector<8x8xbf16>
    %106 = vector.extract_strided_slice %96 {offsets = [0, 3, 0, 0], sizes = [1, 1, 8, 8], strides = [1, 1, 1, 1]} : vector<1x4x8x8xbf16> to vector<1x1x8x8xbf16>
    %107 = vector.shape_cast %106 : vector<1x1x8x8xbf16> to vector<1x8x8xbf16>
    %108 = vector.shape_cast %107 : vector<1x8x8xbf16> to vector<8x8xbf16>
    %109 = tpu.concatenate %99, %102, %105, %108 in 1 : vector<8x8xbf16>, vector<8x8xbf16>, vector<8x8xbf16>, vector<8x8xbf16> -> vector<8x32xbf16>
    %c0_33 = arith.constant 0 : index
    %c0_34 = arith.constant 0 : index
    %110 = vector.load %arg10[%c0_33, %c0_34] : memref<32x32xbf16, #tpu.memory_space<vmem>>, vector<32x32xbf16>
    %cst_35 = arith.constant dense<0.000000e+00> : vector<8x32xf32>
    %111 = tpu.matmul %109, %110, %cst_35 {dimension_numbers = #tpu.dot_dimension_numbers<[1], [0], [0], [1], [0, 0, 1, 1], [], []>} : vector<8x32xbf16>, vector<32x32xbf16>, vector<8x32xf32> -> vector<8x32xf32>
    %c0_36 = arith.constant 0 : index
    %c0_37 = arith.constant 0 : index
    %112 = vector.load %arg11[%c0_36, %c0_37] : memref<1x32xf32, #tpu.memory_space<vmem>>, vector<1x32xf32>
    %113 = vector.broadcast %112 : vector<1x32xf32> to vector<8x32xf32>
    %114 = arith.addf %111, %113 : vector<8x32xf32>
    %c0_38 = arith.constant 0 : index
    %c0_39 = arith.constant 0 : index
    %c0_40 = arith.constant 0 : index
    %115 = vector.load %arg1[%c0_38, %c0_39, %c0_40] : memref<1x8x32xf32, #tpu.memory_space<vmem>>, vector<1x8x32xf32>
    %116 = vector.shape_cast %115 : vector<1x8x32xf32> to vector<8x32xf32>
    %117 = arith.addf %116, %114 : vector<8x32xf32>
    %c0_41 = arith.constant 0 : index
    %c0_42 = arith.constant 0 : index
    %118 = vector.load %arg12[%c0_41, %c0_42] : memref<1x32xf32, #tpu.memory_space<vmem>>, vector<1x32xf32>
    %c0_43 = arith.constant 0 : index
    %c0_44 = arith.constant 0 : index
    %119 = vector.load %arg13[%c0_43, %c0_44] : memref<1x32xf32, #tpu.memory_space<vmem>>, vector<1x32xf32>
    %cst_45 = arith.constant dense<0.000000e+00> : vector<8xf32>
    %120 = vector.multi_reduction <add>, %117, %cst_45 [1] : vector<8x32xf32> to vector<8xf32>
    %121 = vector.shape_cast %120 : vector<8xf32> to vector<8x1xf32>
    %cst_46 = arith.constant 3.200000e+01 : f32
    %122 = vector.broadcast %cst_46 : f32 to vector<8x1xf32>
    %123 = arith.divf %121, %122 : vector<8x1xf32>
    %124 = vector.broadcast %123 : vector<8x1xf32> to vector<8x32xf32>
    %125 = arith.subf %117, %124 : vector<8x32xf32>
    %126 = arith.mulf %125, %125 : vector<8x32xf32>
    %cst_47 = arith.constant dense<0.000000e+00> : vector<8xf32>
    %127 = vector.multi_reduction <add>, %126, %cst_47 [1] : vector<8x32xf32> to vector<8xf32>
    %128 = vector.shape_cast %127 : vector<8xf32> to vector<8x1xf32>
    %cst_48 = arith.constant 3.200000e+01 : f32
    %129 = vector.broadcast %cst_48 : f32 to vector<8x1xf32>
    %130 = arith.divf %128, %129 : vector<8x1xf32>
    %131 = vector.broadcast %123 : vector<8x1xf32> to vector<8x32xf32>
    %132 = arith.subf %117, %131 : vector<8x32xf32>
    %cst_49 = arith.constant 9.99999974E-6 : f32
    %133 = vector.broadcast %cst_49 : f32 to vector<8x1xf32>
    %134 = arith.addf %130, %133 : vector<8x1xf32>
    %135 = math.rsqrt %134 : vector<8x1xf32>
    %136 = vector.broadcast %135 : vector<8x1xf32> to vector<8x32xf32>
    %137 = arith.mulf %132, %136 : vector<8x32xf32>
    %138 = vector.broadcast %118 : vector<1x32xf32> to vector<8x32xf32>
    %139 = arith.mulf %137, %138 : vector<8x32xf32>
    %140 = vector.broadcast %119 : vector<1x32xf32> to vector<8x32xf32>
    %141 = arith.addf %139, %140 : vector<8x32xf32>
    %142 = arith.truncf %141 : vector<8x32xf32> to vector<8x32xbf16>
    %c0_50 = arith.constant 0 : index
    %c0_51 = arith.constant 0 : index
    %143 = vector.load %arg14[%c0_50, %c0_51] : memref<32x64xbf16, #tpu.memory_space<vmem>>, vector<32x64xbf16>
    %cst_52 = arith.constant dense<0.000000e+00> : vector<8x64xf32>
    %144 = tpu.matmul %142, %143, %cst_52 {dimension_numbers = #tpu.dot_dimension_numbers<[1], [0], [0], [1], [0, 0, 1, 1], [], []>} : vector<8x32xbf16>, vector<32x64xbf16>, vector<8x64xf32> -> vector<8x64xf32>
    %c0_53 = arith.constant 0 : index
    %c0_54 = arith.constant 0 : index
    %145 = vector.load %arg15[%c0_53, %c0_54] : memref<1x64xf32, #tpu.memory_space<vmem>>, vector<1x64xf32>
    %146 = vector.broadcast %145 : vector<1x64xf32> to vector<8x64xf32>
    %147 = arith.addf %144, %146 : vector<8x64xf32>
    %cst_55 = arith.constant 0.000000e+00 : f32
    %148 = vector.broadcast %cst_55 : f32 to vector<8x64xf32>
    %149 = arith.maximumf %147, %148 : vector<8x64xf32>
    %150 = arith.truncf %149 : vector<8x64xf32> to vector<8x64xbf16>
    %c0_56 = arith.constant 0 : index
    %c0_57 = arith.constant 0 : index
    %151 = vector.load %arg16[%c0_56, %c0_57] : memref<64x32xbf16, #tpu.memory_space<vmem>>, vector<64x32xbf16>
    %cst_58 = arith.constant dense<0.000000e+00> : vector<8x32xf32>
    %152 = tpu.matmul %150, %151, %cst_58 {dimension_numbers = #tpu.dot_dimension_numbers<[1], [0], [0], [1], [0, 0, 1, 1], [], []>} : vector<8x64xbf16>, vector<64x32xbf16>, vector<8x32xf32> -> vector<8x32xf32>
    %c0_59 = arith.constant 0 : index
    %c0_60 = arith.constant 0 : index
    %153 = vector.load %arg17[%c0_59, %c0_60] : memref<1x32xf32, #tpu.memory_space<vmem>>, vector<1x32xf32>
    %154 = vector.broadcast %153 : vector<1x32xf32> to vector<8x32xf32>
    %155 = arith.addf %152, %154 : vector<8x32xf32>
    %156 = arith.addf %141, %155 : vector<8x32xf32>
    %c0_61 = arith.constant 0 : index
    %c0_62 = arith.constant 0 : index
    %157 = vector.load %arg18[%c0_61, %c0_62] : memref<1x32xf32, #tpu.memory_space<vmem>>, vector<1x32xf32>
    %c0_63 = arith.constant 0 : index
    %c0_64 = arith.constant 0 : index
    %158 = vector.load %arg19[%c0_63, %c0_64] : memref<1x32xf32, #tpu.memory_space<vmem>>, vector<1x32xf32>
    %cst_65 = arith.constant dense<0.000000e+00> : vector<8xf32>
    %159 = vector.multi_reduction <add>, %156, %cst_65 [1] : vector<8x32xf32> to vector<8xf32>
    %160 = vector.shape_cast %159 : vector<8xf32> to vector<8x1xf32>
    %cst_66 = arith.constant 3.200000e+01 : f32
    %161 = vector.broadcast %cst_66 : f32 to vector<8x1xf32>
    %162 = arith.divf %160, %161 : vector<8x1xf32>
    %163 = vector.broadcast %162 : vector<8x1xf32> to vector<8x32xf32>
    %164 = arith.subf %156, %163 : vector<8x32xf32>
    %165 = arith.mulf %164, %164 : vector<8x32xf32>
    %cst_67 = arith.constant dense<0.000000e+00> : vector<8xf32>
    %166 = vector.multi_reduction <add>, %165, %cst_67 [1] : vector<8x32xf32> to vector<8xf32>
    %167 = vector.shape_cast %166 : vector<8xf32> to vector<8x1xf32>
    %cst_68 = arith.constant 3.200000e+01 : f32
    %168 = vector.broadcast %cst_68 : f32 to vector<8x1xf32>
    %169 = arith.divf %167, %168 : vector<8x1xf32>
    %170 = vector.broadcast %162 : vector<8x1xf32> to vector<8x32xf32>
    %171 = arith.subf %156, %170 : vector<8x32xf32>
    %cst_69 = arith.constant 9.99999974E-6 : f32
    %172 = vector.broadcast %cst_69 : f32 to vector<8x1xf32>
    %173 = arith.addf %169, %172 : vector<8x1xf32>
    %174 = math.rsqrt %173 : vector<8x1xf32>
    %175 = vector.broadcast %174 : vector<8x1xf32> to vector<8x32xf32>
    %176 = arith.mulf %171, %175 : vector<8x32xf32>
    %177 = vector.broadcast %157 : vector<1x32xf32> to vector<8x32xf32>
    %178 = arith.mulf %176, %177 : vector<8x32xf32>
    %179 = vector.broadcast %158 : vector<1x32xf32> to vector<8x32xf32>
    %180 = arith.addf %178, %179 : vector<8x32xf32>
    %181 = vector.shape_cast %180 : vector<8x32xf32> to vector<1x8x32xf32>
    %c0_70 = arith.constant 0 : index
    %c0_71 = arith.constant 0 : index
    %c0_72 = arith.constant 0 : index
    %182 = vector.load %arg22[%c0_70, %c0_71, %c0_72] : memref<1x8x32xf32, #tpu.memory_space<vmem>>, vector<1x8x32xf32>
    tpu.vector_store %arg22[%c0_70, %c0_71, %c0_72], %181 {strides = array<i32>} : memref<1x8x32xf32, #tpu.memory_space<vmem>>, vector<1x8x32xf32>,
    %183 = vector.shape_cast %180 : vector<8x32xf32> to vector<1x8x32xf32>
    %c0_73 = arith.constant 0 : index
    %c0_74 = arith.constant 0 : index
    %184 = vector.load %arg20[%c0_73, %c0_74] : memref<1x32xf32, #tpu.memory_space<vmem>>, vector<1x32xf32>
    %185 = vector.shape_cast %184 : vector<1x32xf32> to vector<1x1x32xf32>
    %186 = vector.broadcast %185 : vector<1x1x32xf32> to vector<1x8x32xf32>
    %187 = arith.mulf %183, %186 : vector<1x8x32xf32>
    %cst_75 = arith.constant dense<0.000000e+00> : vector<1x8xf32>
    %188 = vector.multi_reduction <add>, %187, %cst_75 [2] : vector<1x8x32xf32> to vector<1x8xf32>
    %c0_76 = arith.constant 0 : index
    %c0_77 = arith.constant 0 : index
    %189 = vector.load %arg21[%c0_76, %c0_77] : memref<1x1xf32, #tpu.memory_space<vmem>>, vector<1x1xf32>
    %190 = vector.broadcast %189 : vector<1x1xf32> to vector<1x8xf32>
    %191 = arith.addf %188, %190 : vector<1x8xf32>
    %192 = vector.shape_cast %191 : vector<1x8xf32> to vector<1x1x8xf32>
    %c0_78 = arith.constant 0 : index
    %c0_79 = arith.constant 0 : index
    %c0_80 = arith.constant 0 : index
    %193 = vector.load %arg24[%c0_78, %c0_79, %c0_80] : memref<1x1x8xf32, #tpu.memory_space<vmem>>, vector<1x1x8xf32>
    tpu.vector_store %arg24[%c0_78, %c0_79, %c0_80], %192 {strides = array<i32>} : memref<1x1x8xf32, #tpu.memory_space<vmem>>, vector<1x1x8xf32>,
    %194 = arith.negf %191 : vector<1x8xf32>
    %195 = math.exp %194 : vector<1x8xf32>
    %cst_81 = arith.constant 1.000000e+00 : f32
    %196 = vector.broadcast %cst_81 : f32 to vector<1x8xf32>
    %197 = arith.addf %196, %195 : vector<1x8xf32>
    %198 = arith.divf %196, %197 : vector<1x8xf32>
    %199 = vector.shape_cast %198 : vector<1x8xf32> to vector<1x1x8xf32>
    %c0_82 = arith.constant 0 : index
    %c0_83 = arith.constant 0 : index
    %c0_84 = arith.constant 0 : index
    %200 = vector.load %arg25[%c0_82, %c0_83, %c0_84] : memref<1x1x8xf32, #tpu.memory_space<vmem>>, vector<1x1x8xf32>
    tpu.vector_store %arg25[%c0_82, %c0_83, %c0_84], %199 {strides = array<i32>} : memref<1x1x8xf32, #tpu.memory_space<vmem>>, vector<1x1x8xf32>,
    return
  }
  func.func @transform_0(%arg0: i32) -> (i32, i32, i32) {
    %c0_i32 = arith.constant 0 : i32
    %c0_i32_0 = arith.constant 0 : i32
    %c0_i32_1 = arith.constant 0 : i32
    return %arg0, %c0_i32, %c0_i32_0 : i32, i32, i32
  }
  func.func @transform_1(%arg0: i32) -> (i32, i32, i32) {
    %c0_i32 = arith.constant 0 : i32
    %c0_i32_0 = arith.constant 0 : i32
    %c0_i32_1 = arith.constant 0 : i32
    return %arg0, %c0_i32, %c0_i32_0 : i32, i32, i32
  }
  func.func @transform_2(%arg0: i32) -> (i32, i32, i32) {
    %c0_i32 = arith.constant 0 : i32
    %c0_i32_0 = arith.constant 0 : i32
    %c0_i32_1 = arith.constant 0 : i32
    return %arg0, %c0_i32, %c0_i32_0 : i32, i32, i32
  }
  func.func @transform_3(%arg0: i32) -> (i32, i32) {
    %c0_i32 = arith.constant 0 : i32
    %c0_i32_0 = arith.constant 0 : i32
    %c0_i32_1 = arith.constant 0 : i32
    return %c0_i32, %c0_i32_0 : i32, i32
  }
  func.func @transform_4(%arg0: i32) -> (i32, i32) {
    %c0_i32 = arith.constant 0 : i32
    %c0_i32_0 = arith.constant 0 : i32
    %c0_i32_1 = arith.constant 0 : i32
    return %c0_i32, %c0_i32_0 : i32, i32
  }
  func.func @transform_5(%arg0: i32) -> (i32, i32) {
    %c0_i32 = arith.constant 0 : i32
    %c0_i32_0 = arith.constant 0 : i32
    %c0_i32_1 = arith.constant 0 : i32
    return %c0_i32, %c0_i32_0 : i32, i32
  }
  func.func @transform_6(%arg0: i32) -> (i32, i32) {
    %c0_i32 = arith.constant 0 : i32
    %c0_i32_0 = arith.constant 0 : i32
    %c0_i32_1 = arith.constant 0 : i32
    return %c0_i32, %c0_i32_0 : i32, i32
  }
  func.func @transform_7(%arg0: i32) -> (i32, i32) {
    %c0_i32 = arith.constant 0 : i32
    %c0_i32_0 = arith.constant 0 : i32
    %c0_i32_1 = arith.constant 0 : i32
    return %c0_i32, %c0_i32_0 : i32, i32
  }
  func.func @transform_8(%arg0: i32) -> (i32, i32) {
    %c0_i32 = arith.constant 0 : i32
    %c0_i32_0 = arith.constant 0 : i32
    %c0_i32_1 = arith.constant 0 : i32
    return %c0_i32, %c0_i32_0 : i32, i32
  }
  func.func @transform_9(%arg0: i32) -> (i32, i32) {
    %c0_i32 = arith.constant 0 : i32
    %c0_i32_0 = arith.constant 0 : i32
    %c0_i32_1 = arith.constant 0 : i32
    return %c0_i32, %c0_i32_0 : i32, i32
  }
  func.func @transform_10(%arg0: i32) -> (i32, i32) {
    %c0_i32 = arith.constant 0 : i32
    %c0_i32_0 = arith.constant 0 : i32
    %c0_i32_1 = arith.constant 0 : i32
    return %c0_i32, %c0_i32_0 : i32, i32
  }
  func.func @transform_11(%arg0: i32) -> (i32, i32) {
    %c0_i32 = arith.constant 0 : i32
    %c0_i32_0 = arith.constant 0 : i32
    %c0_i32_1 = arith.constant 0 : i32
    return %c0_i32, %c0_i32_0 : i32, i32
  }
  func.func @transform_12(%arg0: i32) -> (i32, i32) {
    %c0_i32 = arith.constant 0 : i32
    %c0_i32_0 = arith.constant 0 : i32
    %c0_i32_1 = arith.constant 0 : i32
    return %c0_i32, %c0_i32_0 : i32, i32
  }
  func.func @transform_13(%arg0: i32) -> (i32, i32) {
    %c0_i32 = arith.constant 0 : i32
    %c0_i32_0 = arith.constant 0 : i32
    %c0_i32_1 = arith.constant 0 : i32
    return %c0_i32, %c0_i32_0 : i32, i32
  }
  func.func @transform_14(%arg0: i32) -> (i32, i32) {
    %c0_i32 = arith.constant 0 : i32
    %c0_i32_0 = arith.constant 0 : i32
    %c0_i32_1 = arith.constant 0 : i32
    return %c0_i32, %c0_i32_0 : i32, i32
  }
  func.func @transform_15(%arg0: i32) -> (i32, i32) {
    %c0_i32 = arith.constant 0 : i32
    %c0_i32_0 = arith.constant 0 : i32
    %c0_i32_1 = arith.constant 0 : i32
    return %c0_i32, %c0_i32_0 : i32, i32
  }
  func.func @transform_16(%arg0: i32) -> (i32, i32) {
    %c0_i32 = arith.constant 0 : i32
    %c0_i32_0 = arith.constant 0 : i32
    %c0_i32_1 = arith.constant 0 : i32
    return %c0_i32, %c0_i32_0 : i32, i32
  }
  func.func @transform_17(%arg0: i32) -> (i32, i32) {
    %c0_i32 = arith.constant 0 : i32
    %c0_i32_0 = arith.constant 0 : i32
    %c0_i32_1 = arith.constant 0 : i32
    return %c0_i32, %c0_i32_0 : i32, i32
  }
  func.func @transform_18(%arg0: i32) -> (i32, i32) {
    %c0_i32 = arith.constant 0 : i32
    %c0_i32_0 = arith.constant 0 : i32
    %c0_i32_1 = arith.constant 0 : i32
    return %c0_i32, %c0_i32_0 : i32, i32
  }
  func.func @transform_19(%arg0: i32) -> (i32, i32) {
    %c0_i32 = arith.constant 0 : i32
    %c0_i32_0 = arith.constant 0 : i32
    %c0_i32_1 = arith.constant 0 : i32
    return %c0_i32, %c0_i32_0 : i32, i32
  }
  func.func @transform_20(%arg0: i32) -> (i32, i32) {
    %c0_i32 = arith.constant 0 : i32
    %c0_i32_0 = arith.constant 0 : i32
    %c0_i32_1 = arith.constant 0 : i32
    return %c0_i32, %c0_i32_0 : i32, i32
  }
  func.func @transform_21(%arg0: i32) -> (i32, i32, i32) {
    %c0_i32 = arith.constant 0 : i32
    %c0_i32_0 = arith.constant 0 : i32
    %c0_i32_1 = arith.constant 0 : i32
    return %arg0, %c0_i32, %c0_i32_0 : i32, i32, i32
  }
  func.func @transform_22(%arg0: i32) -> (i32, i32, i32, i32) {
    %c0_i32 = arith.constant 0 : i32
    %c0_i32_0 = arith.constant 0 : i32
    %c0_i32_1 = arith.constant 0 : i32
    %c0_i32_2 = arith.constant 0 : i32
    return %arg0, %c0_i32, %c0_i32_0, %c0_i32_1 : i32, i32, i32, i32
  }
  func.func @transform_23(%arg0: i32) -> (i32, i32, i32) {
    %c0_i32 = arith.constant 0 : i32
    %c0_i32_0 = arith.constant 0 : i32
    %c0_i32_1 = arith.constant 0 : i32
    return %arg0, %c0_i32, %c0_i32_0 : i32, i32, i32
  }
  func.func @transform_24(%arg0: i32) -> (i32, i32, i32) {
    %c0_i32 = arith.constant 0 : i32
    %c0_i32_0 = arith.constant 0 : i32
    %c0_i32_1 = arith.constant 0 : i32
    return %arg0, %c0_i32, %c0_i32_0 : i32, i32, i32
  }
}

</mosaic_0001>

<bundles_post_ra>
// kernel: tpu_custom_call.1
= control target key start
LH: loop header
LB: loop body
LE: loop exit
PB: predicated region body
PF: predicated region fallthrough
CT: control target
= control target key end

     0   :  { %s3456_s0 = inlined_call_operand.vmem [shape: f32[2,8,32], index: 0, kind: input, shape index: {}]   ;;  %s3457_s1 = inlined_call_operand.vmem [shape: f32[2,8,32], index: 1, kind: input, shape index: {}]   ;;  %s3458_s2 = inlined_call_operand.hbm [shape: f32[2,1,8], index: 2, kind: input, shape index: {}]   ;;  %s3459_s3 = inlined_call_operand.vmem [shape: bf16[32,32], index: 3, kind: input, shape index: {}]   ;;  %s3460_s4 = inlined_call_operand.hbm [shape: f32[1,32], index: 4, kind: input, shape index: {}]   ;;  %s3461_s5 = inlined_call_operand.hbm [shape: bf16[32,32], index: 5, kind: input, shape index: {}]   ;;  %s3462_s6 = inlined_call_operand.hbm [shape: f32[1,32], index: 6, kind: input, shape index: {}]   ;;  %s3463_s7 = inlined_call_operand.hbm [shape: bf16[32,32], index: 7, kind: input, shape index: {}]   ;;  %s3464_s8 = inlined_call_operand.hbm [shape: f32[1,32], index: 8, kind: input, shape index: {}]   ;;  %s3465_s9 = inlined_call_operand.hbm [shape: bf16[32,32], index: 9, kind: input, shape index: {}]   ;;  %s3466_s10 = inlined_call_operand.hbm [shape: f32[1,32], index: 10, kind: input, shape index: {}]   ;;  %s3467_s11 = inlined_call_operand.hbm [shape: f32[1,32], index: 11, kind: input, shape index: {}]   ;;  %s3468_s12 = inlined_call_operand.hbm [shape: f32[1,32], index: 12, kind: input, shape index: {}]   ;;  %s3469_s13 = inlined_call_operand.hbm [shape: bf16[32,64], index: 13, kind: input, shape index: {}]   ;;  %s3470_s14 = inlined_call_operand.hbm [shape: f32[1,64], index: 14, kind: input, shape index: {}]   ;;  %s3471_s15 = inlined_call_operand.vmem [shape: bf16[64,32], index: 15, kind: input, shape index: {}]   ;;  %s3472_s16 = inlined_call_operand.vmem [shape: f32[1,32], index: 16, kind: input, shape index: {}]   ;;  %s3473_s17 = inlined_call_operand.vmem [shape: f32[1,32], index: 17, kind: input, shape index: {}]   ;;  %s3474_s18 = inlined_call_operand.vmem [shape: f32[1,32], index: 18, kind: input, shape index: {}]   ;;  %s3475_s19 = inlined_call_operand.vmem [shape: f32[1,32], index: 19, kind: input, shape index: {}]   ;;  %s3476_s20 = inlined_call_operand.<no memory space> [shape: f32[1,1], index: 20, kind: input, shape index: {}]   ;;  %s3477_s21 = inlined_call_operand.hbm [shape: f32[2,8,32], index: 21, kind: output, shape index: {0}]   ;;  %s3478_s22 = inlined_call_operand.hbm [shape: f32[2,4,8,8], index: 22, kind: output, shape index: {1}]   ;;  %s3479_s23 = inlined_call_operand.hbm [shape: f32[2,1,8], index: 23, kind: output, shape index: {2}]   ;;  %s3480_s24 = inlined_call_operand.hbm [shape: f32[2,1,8], index: 24, kind: output, shape index: {3}]  }
   0x1   :  { %3491 = sst [smem:[#allocation39_spill]] %s3456_s0  ;;  %v30_v0 = vstv %s3476_s20 }
   0x2   :  { %3492 = sst [smem:[#allocation40_spill]] %s3457_s1  ;;  %31 = vst [vmem:[#allocation2] sm:$0x1] %v30_v0 }
   0x3   :  { %3493 = sst [smem:[#allocation41_spill]] %s3458_s2 }
   0x4   :  { %3494 = sst [smem:[#allocation42_spill]] %s3459_s3 }
   0x5   :  { %3495 = sst [smem:[#allocation43_spill]] %s3460_s4 }
   0x6   :  { %3496 = sst [smem:[#allocation44_spill]] %s3461_s5 }
   0x7   :  { %3497 = sst [smem:[#allocation45_spill]] %s3462_s6 }
   0x8   :  { %3498 = sst [smem:[#allocation46_spill]] %s3463_s7 }
   0x9   :  { %3499 = sst [smem:[#allocation47_spill]] %s3464_s8 }
   0xa   :  { %3500 = sst [smem:[#allocation48_spill]] %s3465_s9 }
   0xb   :  { %3501 = sst [smem:[#allocation49_spill]] %s3466_s10 }
   0xc   :  { %3502 = sst [smem:[#allocation50_spill]] %s3467_s11 }
   0xd   :  { %3503 = sst [smem:[#allocation51_spill]] %s3468_s12 }
   0xe   :  { %3504 = sst [smem:[#allocation52_spill]] %s3469_s13 }
   0xf   :  { %3505 = sst [smem:[#allocation53_spill]] %s3470_s14 }
  0x10   :  { %3506 = sst [smem:[#allocation54_spill]] %s3471_s15 }
  0x11   :  { %3507 = sst [smem:[#allocation55_spill]] %s3472_s16 }
  0x12   :  { %3508 = sst [smem:[#allocation56_spill]] %s3475_s19 }
  0x13   :  { %3509 = sst [smem:[#allocation57_spill]] %s3477_s21 }
  0x14   :  { %3510 = sst [smem:[#allocation58_spill]] %s3478_s22 }
  0x15   :  { %3511 = sst [smem:[#allocation59_spill]] %s3479_s23 }
  0x16   :  { %3512 = sst [smem:[#allocation60_spill]] %s3480_s24 }
  0x17   :  { %32 = vsyncpa [#allocation4], 0 }
  0x18   :  { %34 = vsyncpa [#allocation4 + $0x1], 0 }
  0x19   :  { %35 = vsyncpa [#allocation7], 0 }
  0x1a   :  { %36 = vsyncpa [#allocation10], 0 }
  0x1b   :  { %37 = vsyncpa [#allocation13], 0 }
  0x1c   :  { %38 = vsyncpa [#allocation16], 0 }
  0x1d   :  { %39 = vsyncpa [#allocation19], 0 }
  0x1e   :  { %40 = vsyncpa [#allocation22], 0 }
  0x1f   :  { %41 = vsyncpa [#allocation5], 0 }
  0x20   :  { %43 = vsyncpa [#allocation5 + $0x1], 0 }
  0x21   :  { %44 = vsyncpa [#allocation25], 0 }
  0x22   :  { %46 = vsyncpa [#allocation25 + $0x1], 0 }
  0x23   :  { %47 = vsyncpa [#allocation28], 0 }
  0x24   :  { %49 = vsyncpa [#allocation28 + $0x1], 0  ;;  %s3049_s27 = smov 0   ;;  %s3051_s28 = smov 0  }
  0x25   :  { %s3053_s20 = smov 0   ;;  %s3055_s6 = smov 0  }
  0x26 LB: > { %s3513_s0 = sld [smem:[#allocation43_spill]]  ;;  %s3073_s30 = sadd.s32 4294967295, %s2896_s6   ;;  %s2896_s6 = sphi %s3055_s6, %s3548_s6   ;;  %s2892_s20 = sphi %s3053_s20, %s3547_s20   ;;  %s2888_s28 = sphi %s3051_s28, %s3546_s28   ;;  %s2884_s27 = sphi %s3049_s27, %s3545_s27  }
  0x27   : > { %p2010_p0 = scmp.ge.s32.totalorder %s2896_s6, 1  ;;  %p128_p1 = scmp.eq.s32.totalorder %s3073_s30, 0 }
  0x28   : > { %p620_p2 = scmp.lt.s32.totalorder %s2896_s6, 3  ;;  %s2898_s25 = smov [#allocation6]  }
  0x29   : > { %s637_s8 = sshll.u32 %s2898_s25, 4  ;;  %s3515_s5 = sld [smem:[#allocation45_spill]]  ;;  %s638_s8 = int_to_ptr.vmem [resolvable:$true] %s637_s8 }
  0x2a   : > { %p3078_p3 = pnand %p2010_p0, %p620_p2  ;;  %s2899_s29 = smov [#allocation9]  }
  0x2b   : > { %s3517_s23 = sld [smem:[#allocation47_spill]]  ;;  %s2900_s22 = smov [#allocation12]  }
  0x2c   : > { %s635_s7 = sshll.u32 %s3513_s0, 4  ;;  %p2186_p5 = pneg %p3078_p3  ;;  %s636_s7 = int_to_ptr.hbm [resolvable:$true] %s635_s7 }
  0x2d   : > { %s663_s0 = sshll.u32 %s2899_s29, 4  ;;  %s3518_s10 = sld [smem:[#allocation49_spill]]  ;;  %s664_s0 = int_to_ptr.vmem [resolvable:$true] %s663_s0 }
  0x2e   : > { %p3090_p6 = pnand %p2186_p5, %p128_p1  ;;  %s689_s19 = sshll.u32 %s2900_s22, 4  ;;  %s690_s19 = int_to_ptr.vmem [resolvable:$true] %s689_s19 }
  0x2f   : > { %s661_s26 = sshll.u32 %s3515_s5, 4  ;;  %s2901_s29 = smov [#allocation15]   ;;  %s662_s26 = int_to_ptr.hbm [resolvable:$true] %s661_s26 }
  0x30   : > { %2189 = dma.hbm_to_vmem [thread:$0]  (!%p3090_p6), %s636_s7, 16, %s638_s8, [#allocation7]  }
  0x31   : > { %s687_s21 = sshll.u32 %s3517_s23, 4  ;;  %s715_s24 = sshll.u32 %s2901_s29, 4  ;;  %s688_s21 = int_to_ptr.hbm [resolvable:$true] %s687_s21  ;;  %s716_s24 = int_to_ptr.vmem [resolvable:$true] %s715_s24 }
  0x32   : > { %2195 = dma.hbm_to_vmem [thread:$0]  (!%p3090_p6), %s662_s26, 16, %s664_s0, [#allocation10]  }
  0x33   : > { %s713_s5 = sshll.u32 %s3518_s10, 4  ;;  %s3519_s12 = sld [smem:[#allocation51_spill]]  ;;  %s714_s5 = int_to_ptr.hbm [resolvable:$true] %s713_s5 }
  0x34   : > { %2201 = dma.hbm_to_vmem [thread:$0]  (!%p3090_p6), %s688_s21, 16, %s690_s19, [#allocation13]  }
  0x35   : > { %2207 = dma.hbm_to_vmem [thread:$0]  (!%p3090_p6), %s714_s5, 16, %s716_s24, [#allocation16]  }
  0x36   : > { %s3520_s0 = sld [smem:[#allocation44_spill]]  ;;  %s2902_s22 = smov [#allocation18]  }
  0x37   : > { %s739_s1 = sshll.u32 %s2902_s22, 4  ;;  %s2903_s19 = smov [#allocation8]   ;;  %s740_s1 = int_to_ptr.vmem [resolvable:$true] %s739_s1 }
  0x38   : > { %s648_s21 = sshll.u32 %s2903_s19, 4  ;;  %s2904_s29 = smov 64   ;;  %s649_s21 = int_to_ptr.vmem [resolvable:$true] %s648_s21 }
  0x39   : > { %s737_s7 = sshll.u32 %s3519_s12, 4  ;;  %s2905_s25 = smov 4   ;;  %s738_s7 = int_to_ptr.hbm [resolvable:$true] %s737_s7 }
  0x3a   : > { %2213 = dma.hbm_to_vmem [thread:$0]  (!%p3090_p6), %s738_s7, 16, %s740_s1, [#allocation19]  }
  0x3b   : > { %s3521_s23 = sld [smem:[#allocation46_spill]]  ;;  %s2906_s26 = smov [#allocation11]  }
  0x3c   : > { %s646_s4 = sshll.u32 %s3520_s0, 4  ;;  %s674_s0 = sshll.u32 %s2906_s26, 4  ;;  %s647_s4 = int_to_ptr.hbm [resolvable:$true] %s646_s4  ;;  %s675_s0 = int_to_ptr.vmem [resolvable:$true] %s674_s0 }
  0x3d   : > { %2192 = dma.hbm_to_vmem [thread:$0]  (!%p3090_p6), %s647_s4, 256, %s649_s21, [#allocation7], %s2904_s29, %s2904_s29, %s2905_s25  }
  0x3e   : > { %s3522_s9 = sld [smem:[#allocation48_spill]]  ;;  %s2907_s4 = smov [#allocation14]  }
  0x3f   : > { %s700_s19 = sshll.u32 %s2907_s4, 4  ;;  %s3523_s11 = sld [smem:[#allocation50_spill]]  ;;  %s701_s19 = int_to_ptr.vmem [resolvable:$true] %s700_s19 }
  0x40   : > { %s3524_s13 = sld [smem:[#allocation52_spill]]  ;;  %s2909_s22 = smov [#allocation20]  }
  0x41   : > { %s672_s8 = sshll.u32 %s3521_s23, 4  ;;  %s3525_s14 = sld [smem:[#allocation53_spill]]  ;;  %s673_s8 = int_to_ptr.hbm [resolvable:$true] %s672_s8 }
  0x42   : > { %2198 = dma.hbm_to_vmem [thread:$0]  (!%p3090_p6), %s673_s8, 256, %s675_s0, [#allocation10], %s2904_s29, %s2904_s29, %s2905_s25  }
  0x43   : > { %s2908_s0 = smov [#allocation17]   ;;  %s2910_s5 = smov [#allocation21]  }
  0x44   : > { %s698_s1 = sshll.u32 %s3522_s9, 4  ;;  %s727_s7 = sshll.u32 %s2908_s0, 4  ;;  %s699_s1 = int_to_ptr.hbm [resolvable:$true] %s698_s1  ;;  %s728_s7 = int_to_ptr.vmem [resolvable:$true] %s727_s7 }
  0x45   : > { %s725_s24 = sshll.u32 %s3523_s11, 4  ;;  %s3487_s23 = sadd.s32 4294967294, %s2896_s6   ;;  %s726_s24 = int_to_ptr.hbm [resolvable:$true] %s725_s24 }
  0x46   : > { %2204 = dma.hbm_to_vmem [thread:$0]  (!%p3090_p6), %s699_s1, 256, %s701_s19, [#allocation13], %s2904_s29, %s2904_s29, %s2905_s25  }
  0x47   : > { %s748_s8 = sshll.u32 %s3524_s13, 4  ;;  %s750_s1 = sshll.u32 %s2909_s22, 4  ;;  %s749_s8 = int_to_ptr.hbm [resolvable:$true] %s748_s8  ;;  %s751_s1 = int_to_ptr.vmem [resolvable:$true] %s750_s1 }
  0x48   : > { %2210 = dma.hbm_to_vmem [thread:$0]  (!%p3090_p6), %s726_s24, 16, %s728_s7, [#allocation16]  }
  0x49   : > { %s763_s21 = sshll.u32 %s3525_s14, 4  ;;  %s765_s24 = sshll.u32 %s2910_s5, 4  ;;  %s764_s21 = int_to_ptr.hbm [resolvable:$true] %s763_s21  ;;  %s766_s24 = int_to_ptr.vmem [resolvable:$true] %s765_s24 }
  0x4a   : > { %2216 = dma.hbm_to_vmem [thread:$0]  (!%p3090_p6), %s749_s8, 256, %s751_s1, [#allocation19], %s2904_s29, %s2904_s29, %s2905_s25  }
  0x4b   : > { %2219 = dma.hbm_to_vmem [thread:$0]  (!%p3090_p6), %s764_s21, 16, %s766_s24, [#allocation22]  }
  0x4c   : > { %s3157_s26 = sadd.s32 1, %s2896_s6   ;;  %s114_s0 = sadd.s32 1, %s2892_s20 }
  0x4d   : > { %s111_s7 = ssub.s32 %s2896_s6, %s3157_s26  ;;  %p121_p7 = scmp.ne.s32.totalorder %s2892_s20, %s2888_s28 }
  0x4e   : > { %p112_p8 = scmp.eq.s32.totalorder %s111_s7, 0  ;;  %p122_p9 = scmp.eq.s32.totalorder %s2896_s6, 0 }
  0x4f   : > { %p127_p10 = scmp.ne.s32.totalorder %s2888_s28, %s2884_s27  ;;  %p529_p11 = scmp.eq.s32.totalorder %s3073_s30, 1 }
  0x50   : > { %s3169_s29 = scalar_select %p112_p8, %s2892_s20, %s114_s0  }
  0x51   : > { %p3173_p12 = por %p128_p1, %p127_p10  ;;  %p3177_p13 = por %p529_p11, %p121_p7 }
  0x52   : > { %p535_p0 = scmp.eq.s32.totalorder %s3487_s23, 1  ;;  %p123_p2 = por %p122_p9, %p121_p7 }
  0x53   : > { %s808_s8 = sand.u32 1, %s2892_s20   ;;  %p2248_p6 = scmp.lt.s32.totalorder %s2896_s6, 2 }
  0x54   : > { %p3184_p5 = por %p535_p0, %p127_p10  ;;  %s3529_s19 = sld [smem:[#allocation41_spill]] }
  0x55   : > { %s811_s24 = scalar_lea.vmem [#allocation3], %s808_s8  ;;  %p3193_p8 = pnand %p2248_p6, %p123_p2 }
  0x56   : > { %s818_s0 = sshll.u32 %s811_s24, 4  ;;  %s809_s23 = scalar_lea.sflag [#allocation4], %s808_s8  ;;  %s819_s0 = int_to_ptr.vmem [resolvable:$true] %s818_s0 }
  0x57   : > { %p2688_p9 = pneg %p3193_p8 }
  0x5a   : > { %s814_s21 = scalar_lea.hbm %s3529_s19, %s2896_s6 }
  0x5b   : > { %s816_s5 = sshll.u32 %s814_s21, 4  ;;  %s2691_s21 = scalar_lea.hbm %s3529_s19, 2  ;;  %s817_s5 = int_to_ptr.hbm [resolvable:$true] %s816_s5 }
  0x5c   : > { %s2684_s9 = sshra.s32 %s817_s5, 4  ;;  %s2685_s9 = int_to_ptr.hbm [resolvable:$true] %s2684_s9 }
  0x5d   : > { %s2686_s10 = scalar_lea.hbm %s2685_s9, 1  ;;  %p2692_p0 = scmp.lt.s32.totalorder %s2685_s9, %s3529_s19 }
  0x5e   : > { %p2687_p7 = scmp.ne.s32.totalorder %s2685_s9, %s2686_s10  ;;  %p2693_p2 = scmp.lt.s32.totalorder %s2691_s21, %s2686_s10 }
  0x60   : > { %p2689_p10 = pnand %p2688_p9, %p2687_p7  ;;  %p2694_p6 = por %p2693_p2, %p2692_p0 }
  0x62   : > { %p2690_p11 = pneg %p2689_p10 }
  0x64   : > { %p2695_p4 = pnand %p2694_p6, %p2690_p11 }
  0x66   : > { %2698 = shalt.err (!%p2695_p4)
}
  0x67   : > { %2223 = dma.hbm_to_vmem [thread:$0]  (!%p3193_p8), %s817_s5, 16, %s819_s0, %s809_s23  }
  0x68   : > { %827 = sbr.rel (%p3078_p3) target bundleno = 2132 (0x854), region = 104  ;;  %s3210_s8 = sand.u32 (!%p3078_p3), 1, %s2888_s28  }
  0x69   : > { %s830_s1 = scalar_lea.sflag (!%p3078_p3), [#allocation4], %s3210_s8 }
  0x6d   : > { %2843 = dma.done.wait (%p3173_p12), %s830_s1, 16  }
  0x6e   : > { %2845 = vsyncadd (%p3173_p12), %s830_s1, 4294967280 }
  0x6f   : > { %2847 = dma.done.wait (%p128_p1), [#allocation7], 272  }
  0x70   : > { %2849 = vsyncadd (%p128_p1), [#allocation7], 4294967024 }
  0x71   : > { %2851 = dma.done.wait (%p128_p1), [#allocation10], 272  }
  0x72   : > { %2853 = vsyncadd (%p128_p1), [#allocation10], 4294967024 }
  0x73   : > { %2855 = dma.done.wait (%p128_p1), [#allocation13], 272  }
  0x74   : > { %2857 = vsyncadd (%p128_p1), [#allocation13], 4294967024 }
  0x75   : > { %2859 = dma.done.wait (%p128_p1), [#allocation16], 32  }
  0x76   : > { %2861 = vsyncadd (%p128_p1), [#allocation16], 4294967264 }
  0x77   : > { %2863 = dma.done.wait (%p128_p1), [#allocation19], 272  }
  0x78   : > { %2865 = vsyncadd (%p128_p1), [#allocation19], 4294967024 }
  0x79   : > { %2867 = dma.done.wait (%p128_p1), [#allocation22], 16  }
  0x7a   : > { %2869 = vsyncadd (%p128_p1), [#allocation22], 4294967280  ;;  %p973_p3 = scmp.lt.s32.totalorder %s3073_s30, 1  ;;  %s3531_s23 = sld [smem:[#allocation40_spill]]  ;;  %v2120_v1 = vld [vmem:[#allocation8 + $0x8] sm:$0xff]  ;;  %v2119_v3 = vld [vmem:[#allocation8] sm:$0xff] }
  0x7b   : > { %s3532_s7 = sld [smem:[#allocation39_spill]]  ;;  %1055 = vmatpush.bf16.msra.mxu1 %v2120_v1  ;;  %vm1009_vm0 = vcmask 261120   ;;  %v2317_v9 = vld [vmem:[#allocation9] ss:$0 sm:$0xff]  ;;  %v2318_v10 = vld [vmem:[#allocation6] ss:$0 sm:$0xff] }
  0x7c   : > { %s974_s9 = scalar_select %p973_p3, %s3073_s30, 1  ;;  %vm1122_vm1 = vcmask 64512   ;;  %v2122_v20 = vld [vmem:[#allocation11 + $0x8] sm:$0xff]  ;;  %v2121_v21 = vld [vmem:[#allocation11] sm:$0xff]  ;;  %v2319_v33 = vld [vmem:[#allocation12] ss:$0 sm:$0xff] }
  0x7d   : > { %s3533_s4 = sld [smem:[#allocation42_spill]]  ;;  %s2911_s12 = smov 120   ;;  %1088 = vmatpush.bf16.msra.mxu2 %v2122_v20  ;;  %vm1306_vm2 = vcmask 1043456   ;;  %v2914_v40 = vmov -1e+30  }
  0x7e   : > { %s2037_s10 = sshll.u32 %s974_s9, 3  ;;  %s2912_s13 = smov 104  }
  0x7f   : > { %1056 = vmatpush.bf16.msra.mxu1 %v2119_v3  ;;  %s2913_s9 = smov 112   ;;  %s2036_s11 = sshll.u32 %s3210_s8, 5 }
  0x80   : > { %s980_s2 = scalar_lea.vmem %s3531_s23, %s2037_s10  ;;  %s3302_s3 = scalar_lea.vmem [#allocation24], %s2036_s11 }
  0x81   : > { %s976_s21 = scalar_lea.vmem %s3532_s7, %s2037_s10  ;;  %v984_v5 = vld [vmem:[%s980_s2] sm:$0xff]  ;;  %1089 = vmatpush.bf16.msra.mxu2 %v2121_v21  ;;  %s3534_s10 = scalar_lea.vmem [#allocation3], %s3210_s8 }
  0x82   : > { %v3256_v6 = vld [vmem:[%s976_s21] sm:$0xff]  ;;  %v985_v7 = vpack.c.bf16 %v984_v5, %v984_v5  ;;  %s3488_s23 = smov 8   ;;  %s2916_s2 = smov 16  }
  0x83   : > { %v2118_v2 = vld [vmem:[%s3533_s4 + $0x8] sm:$0xff]  ;;  %v2117_v4 = vld [vmem:[%s3533_s4] sm:$0xff]  ;;  %v983_v8 = vpack.c.bf16 %v3256_v6, %v3256_v6  ;;  %s2917_s5 = smov 24   ;;  %s3535_s15 = sld [smem:[#allocation54_spill]] }
  0x84   : > { %1019 = vmatpush.bf16.msra.mxu0 %v2118_v2  ;;  %2056 = vmatmul.msk.bf16.vlgmr.msra.gmra.mxu1 %vm1009_vm0, %v985_v7  ;;  %v986_v39 = vld [vmem:[%s3534_s10] sm:$0x1]  ;;  %s3536_s16 = sld [smem:[#allocation55_spill]]  ;;  %s2035_s21 = sshll.u32 %s3210_s8, 3 }
  0x85   : > { %2065 = vmatmul.msk.bf16.vlgmr.msra.gmra.mxu2 %vm1009_vm0, %v985_v7  ;;  %vm987_vm3 = vcmp.gt.f32.partialorder %v986_v39, 0.5  ;;  %s1661_s10 = sand.u32 1, %s3073_s30   ;;  %s1696_s7 = sshll.u32 %s3302_s3, 4  ;;  %s1697_s7 = int_to_ptr.vmem [resolvable:$true] %s1696_s7 }
  0x86   : > { %v988_v41 = vsel %vm987_vm3, 0.0, %v2914_v40  ;;  %s3372_s1 = scalar_lea.sflag [#allocation25], %s1661_s10 }
  0x87   : > { %v1120_v42 = vperm.slane %v988_v41, 0 }
  0x88   : > { %1020 = vmatpush.bf16.msra.mxu0 %v2117_v4 }
  0x8b   : > { %2047 = vmatmul.msk.bf16.vlgmr.msra.gmra.mxu0 %vm1009_vm0, %v983_v8 }
 0x101   : > { %v1058_v11 = vpop.f32.mrf.mxu1 }
 0x102   : > { %v1059_v13 = vadd.f32 %v2317_v9, %v1058_v11 }
 0x104   : > { %v1103_v15 = vpack.c.bf16 %v1059_v13, %v1059_v13 }
 0x106   : > { %1105 = vrot.lane.b32.xlu1 %v1103_v15, %s2911_s12  ;;  %1109 = vrot.lane.b32.xlu0 %v1103_v15, %s2912_s13  ;;  %v1127_v17 = vsel %vm1122_vm1, %v1103_v15, 0 }
 0x107   : > { %1136 = vmatpush.bf16.xpose.msra.mxu3 %v1127_v17 }
 0x108   : > { %v1022_v12 = vpop.f32.mrf.mxu0  ;;  %v1091_v34 = vpop.f32.mrf.mxu2 }
 0x109   : > { %v1023_v14 = vadd.f32 %v2318_v10, %v1022_v12  ;;  %v1060_v18 = vpop.f32.mrf.mxu1  ;;  %v1092_v35 = vadd.f32 %v2319_v33, %v1091_v34 }
 0x10b   : > { %v1095_v16 = vpack.c.bf16 %v1023_v14, %v1023_v14  ;;  %v1111_v36 = vpack.c.bf16 %v1092_v35, %v1092_v35 }
 0x10d   : > { %1097 = vrot.lane.b32.xlu2 %v1095_v16, %s2911_s12  ;;  %v1308_v37 = vsel %vm1306_vm2, %v1111_v36, 0 }
 0x10e   : > { %1107 = vrot.lane.b32.xlu1 %v1103_v15, %s2913_s9  ;;  %1101 = vrot.lane.b32.xlu0 %v1095_v16, %s2912_s13 }
 0x10f   : > { %2066 = vmatmul.msk.bf16.vlgmr.msra.gmra.mxu3 %vm1122_vm1, %v1095_v16 }
 0x110   : > { %v1024_v19 = vpop.f32.mrf.mxu0  ;;  %1317 = vmatpush.bf16.msrb.mxu3 %v1308_v37  ;;  %v1093_v38 = vpop.f32.mrf.mxu2 }
 0x115   : > { %1099 = vrot.lane.b32.xlu2 %v1095_v16, %s2913_s9 }
 0x167   : > { %v1098_v26 = vpop.permute.xlu2 %1097 }
 0x16f   : > { %v1100_v30 = vpop.permute.xlu2 %1099 }
 0x178   : > { %v1106_v22 = vpop.permute.xlu1 %1105  ;;  %v1110_v23 = vpop.permute.xlu0 %1109 }
 0x179   : > { %v1146_v24 = vsel %vm1122_vm1, %v1106_v22, 0  ;;  %v1184_v25 = vsel %vm1122_vm1, %v1110_v23, 0 }
 0x17a   : > { %1155 = vmatpush.bf16.xpose.msrb.mxu0 %v1146_v24  ;;  %1193 = vmatpush.bf16.xpose.msrb.mxu2 %v1184_v25 }
 0x180   : > { %v1108_v27 = vpop.permute.xlu1 %1107  ;;  %v1102_v28 = vpop.permute.xlu0 %1101 }
 0x181   : > { %2067 = vmatmul.msk.bf16.vlgmr.msrb.gmra.mxu0 %vm1122_vm1, %v1098_v26  ;;  %2069 = vmatmul.msk.bf16.vlgmr.msrb.gmra.mxu2 %vm1122_vm1, %v1102_v28  ;;  %v1165_v29 = vsel %vm1122_vm1, %v1108_v27, 0 }
 0x182   : > { %1174 = vmatpush.bf16.xpose.msrb.mxu1 %v1165_v29 }
 0x189   : > { %2068 = vmatmul.msk.bf16.vlgmr.msrb.gmra.mxu1 %vm1122_vm1, %v1100_v30 }
 0x192   : > { %v1138_v31 = vpop.f32.mrf.mxu3 }
 0x193   : > { %v1139_v54 = vadd.f32 %v1138_v31, %v1120_v42 }
 0x195   : > { %v1199_v56 = vsel %vm1122_vm1, %v1139_v54, -inf }
 0x19a   : > { %v1140_v32 = vpop.f32.mrf.mxu3 }
 0x1fe   : > { %v1157_v43 = vpop.f32.mrf.mxu0 }
 0x1ff   : > { %v1158_v44 = vadd.f32 %v1157_v43, %v1120_v42 }
 0x201   : > { %v1202_v45 = vsel %vm1122_vm1, %v1158_v44, -inf }
 0x202   : > { %1203 = vmax.xlane.f32.xlu1 %v1202_v45 }
 0x204   : > { %v1195_v46 = vpop.f32.mrf.mxu2 }
 0x205   : > { %v1196_v47 = vadd.f32 %v1195_v46, %v1120_v42 }
 0x206   : > { %v1159_v48 = vpop.f32.mrf.mxu0  ;;  %v1176_v49 = vpop.f32.mrf.mxu1 }
 0x207   : > { %v1177_v50 = vadd.f32 %v1176_v49, %v1120_v42  ;;  %v1208_v51 = vsel %vm1122_vm1, %v1196_v47, -inf }
 0x208   : > { %1209 = vmax.xlane.f32.xlu0 %v1208_v51 }
 0x209   : > { %v1205_v52 = vsel %vm1122_vm1, %v1177_v50, -inf }
 0x20a   : > { %1206 = vmax.xlane.f32.xlu2 %v1205_v52 }
 0x20c   : > { %v1197_v53 = vpop.f32.mrf.mxu2 }
 0x20e   : > { %v1178_v55 = vpop.f32.mrf.mxu1 }
 0x212   : > { %1200 = vmax.xlane.f32.xlu2 %v1199_v56 }
 0x275   : > { %v1204_v57 = vpop.xlane.xlu1 %1203 }
 0x276   : > { %v1212_v58 = vsub.f32 %v1158_v44, %v1204_v57 }
 0x278   : > { %v1217_v59 = vmul.f32 1.442695, %v1212_v58 }
 0x27a   : > { %2328 = vpow2.f32 %v1217_v59 }
 0x27b   : > { %v1210_v60 = vpop.xlane.xlu0 %1209 }
 0x27c   : > { %v1214_v61 = vsub.f32 %v1196_v47, %v1210_v60 }
 0x27d   : > { %v1207_v62 = vpop.xlane.xlu2 %1206 }
 0x27e   : > { %v1221_v63 = vmul.f32 1.442695, %v1214_v61  ;;  %v1213_v0 = vsub.f32 %v1177_v50, %v1207_v62 }
 0x280   : > { %v2329_v1 = vpop.eup %2328  ;;  %2330 = vpow2.f32 %v1221_v63  ;;  %v1219_v2 = vmul.f32 1.442695, %v1213_v0 }
 0x281   : > { %v1226_v3 = vsel %vm1122_vm1, %v2329_v1, 0.0 }
 0x282   : > { %2332 = vpow2.f32 %v1219_v2  ;;  %1227 = vadd.xlane.f32.xlu1 %v1226_v3 }
 0x285   : > { %v1201_v9 = vpop.xlane.xlu2 %1200 }
 0x286   : > { %v3285_v4 = vpop.eup %2330  ;;  %v1211_v10 = vsub.f32 %v1139_v54, %v1201_v9 }
 0x287   : > { %v1232_v5 = vsel %vm1122_vm1, %v3285_v4, 0.0 }
 0x288   : > { %v3289_v7 = vpop.eup %2332  ;;  %1233 = vadd.xlane.f32.xlu0 %v1232_v5  ;;  %v1215_v11 = vmul.f32 1.442695, %v1211_v10 }
 0x289   : > { %v1229_v8 = vsel %vm1122_vm1, %v3289_v7, 0.0 }
 0x28a   : > { %1230 = vadd.xlane.f32.xlu2 %v1229_v8  ;;  %2334 = vpow2.f32 %v1215_v11 }
 0x290   : > { %v3296_v12 = vpop.eup %2334 }
 0x291   : > { %v1223_v13 = vsel %vm1122_vm1, %v3296_v12, 0.0 }
 0x29b   : > { %1113 = vrot.lane.b32.xlu1 %v1111_v36, %s2911_s12  ;;  %s3537_s12 = sld [smem:[#allocation56_spill]] }
 0x29c   : > { %1117 = vrot.lane.b32.xlu0 %v1111_v36, %s2912_s13  ;;  %s3361_s13 = scalar_lea.vmem [#allocation23], %s2035_s21 }
 0x2a2   : > { %1115 = vrot.lane.b32.xlu2 %v1111_v36, %s2913_s9  ;;  %s2131_s9 = sshll.u32 %s3073_s30, 5 }
 0x2c6   : > { %1224 = vadd.xlane.f32.xlu0 %v1223_v13 }
 0x2f5   : > { %v1228_v14 = vpop.xlane.xlu1 %1227 }
 0x2f6   : > { %2336 = vrcp.f32 %v1228_v14  ;;  %v1260_v20 = vand.u32 2147483648, %v1228_v14  ;;  %v1258_v22 = vand.u32 2147483647, %v1228_v14  ;;  %vm1254_vm5 = vweird.f32 %v1228_v14 }
 0x2f8   : > { %v1261_v27 = vor.u32 1.1754944e-38, %v1260_v20  ;;  %vm1259_vm7 = vcmp.eq.f32.partialorder %v1258_v22, 8.507059e+37 }
 0x2fb   : > { %v1234_v15 = vpop.xlane.xlu0 %1233 }
 0x2fc   : > { %v2337_v16 = vpop.eup %2336  ;;  %2338 = vrcp.f32 %v1234_v15  ;;  %v1286_v33 = vand.u32 2147483647, %v1234_v15  ;;  %v1288_v34 = vand.u32 2147483648, %v1234_v15  ;;  %vm1282_vm9 = vweird.f32 %v1234_v15 }
 0x2fd   : > { %v1250_v17 = vmul.f32 %v2337_v16, %v1228_v14  ;;  %v1231_v18 = vpop.xlane.xlu2 %1230  ;;  %vm1255_vm4 = vweird.f32 %v2337_v16 }
 0x2fe   : > { %2340 = vrcp.f32 %v1231_v18  ;;  %vm1256_vm6 = vmor %vm1254_vm5, %vm1255_vm4  ;;  %v1274_v39 = vand.u32 2147483648, %v1231_v18  ;;  %v1272_v42 = vand.u32 2147483647, %v1231_v18  ;;  %v1289_v43 = vor.u32 1.1754944e-38, %v1288_v34 }
 0x2ff   : > { %v1251_v19 = vsub.f32 1.0, %v1250_v17  ;;  %vm1287_vm12 = vcmp.eq.f32.partialorder %v1286_v33, 8.507059e+37  ;;  %vm1268_vm13 = vweird.f32 %v1231_v18 }
 0x300   : > { %v1275_v47 = vor.u32 1.1754944e-38, %v1274_v39  ;;  %vm1273_vm15 = vcmp.eq.f32.partialorder %v1272_v42, 8.507059e+37 }
 0x301   : > { %v1252_v21 = vmul.f32 %v2337_v16, %v1251_v19 }
 0x302   : > { %v2339_v23 = vpop.eup %2338 }
 0x303   : > { %v1253_v24 = vadd.f32 %v2337_v16, %v1252_v21  ;;  %v1278_v25 = vmul.f32 %v2339_v23, %v1234_v15  ;;  %vm1283_vm8 = vweird.f32 %v2339_v23 }
 0x304   : > { %v2341_v26 = vpop.eup %2340  ;;  %vm1284_vm11 = vmor %vm1282_vm9, %vm1283_vm8 }
 0x305   : > { %v1257_v28 = vsel %vm1256_vm6, %v2337_v16, %v1253_v24  ;;  %v1279_v29 = vsub.f32 1.0, %v1278_v25  ;;  %v1264_v30 = vmul.f32 %v2341_v26, %v1231_v18  ;;  %v1116_v31 = vpop.permute.xlu2 %1115  ;;  %vm1269_vm10 = vweird.f32 %v2341_v26 }
 0x306   : > { %v1262_v32 = vsel %vm1259_vm7, %v1261_v27, %v1257_v28  ;;  %v1346_v35 = vsel %vm1306_vm2, %v1116_v31, 0  ;;  %vm1270_vm14 = vmor %vm1268_vm13, %vm1269_vm10  ;;  %v2123_v27 = vld [vmem:[#allocation14] sm:$0xff]  ;;  %vm1402_vm6 = vcmask 130048   ;;  %vm1405_vm7 = vcmask 195584  }
 0x307   : > { %v1292_v36 = vmul.f32 %v2329_v1, %v1262_v32  ;;  %v1280_v37 = vmul.f32 %v2339_v23, %v1279_v29  ;;  %v1265_v38 = vsub.f32 1.0, %v1264_v30  ;;  %1355 = vmatpush.bf16.msra.mxu1 %v1346_v35  ;;  %v2320_v35 = vld [vmem:[#allocation15] ss:$0 sm:$0xff] }
 0x309   : > { %1296 = vst.msk [vmem:[%s3302_s3 + $0x8] sm:$0xff] %vm1122_vm1, %v1292_v36  ;;  %v1281_v40 = vadd.f32 %v2339_v23, %v1280_v37  ;;  %v1266_v41 = vmul.f32 %v2341_v26, %v1265_v38  ;;  %v1300_v56 = vpack.c.bf16 %v1292_v36, %v1292_v36 }
 0x30b   : > { %v1285_v44 = vsel %vm1284_vm11, %v2339_v23, %v1281_v40  ;;  %v1267_v45 = vadd.f32 %v2341_v26, %v1266_v41  ;;  %v2918_v41 = vmov 32.0   ;;  %vm1559_vm11 = vcmask 523264  }
 0x30c   : > { %v1290_v46 = vsel %vm1287_vm12, %v1289_v43, %v1285_v44 }
 0x30d   : > { %v1294_v48 = vmul.f32 %v3285_v4, %v1290_v46  ;;  %v1271_v49 = vsel %vm1270_vm14, %v2341_v26, %v1267_v45  ;;  %v1114_v50 = vpop.permute.xlu1 %1113  ;;  %v2124_v26 = vld [vmem:[#allocation14 + $0x8] sm:$0xff] }
 0x30e   : > { %v1276_v51 = vsel %vm1273_vm15, %v1275_v47, %v1271_v49  ;;  %v1327_v52 = vsel %vm1306_vm2, %v1114_v50, 0  ;;  %v1118_v53 = vpop.permute.xlu0 %1117  ;;  %1436 = vmatpush.bf16.msra.mxu3 %v2124_v26 }
 0x30f   : > { %1298 = vst.msk [vmem:[%s3302_s3 + $0x18] sm:$0xff] %vm1122_vm1, %v1294_v48  ;;  %v1293_v54 = vmul.f32 %v3289_v7, %v1276_v51  ;;  %v1365_v55 = vsel %vm1306_vm2, %v1118_v53, 0  ;;  %1336 = vmatpush.bf16.msra.mxu0 %v1327_v52  ;;  %v1302_v58 = vpack.c.bf16 %v1294_v48, %v1294_v48  ;;  %v2126_v52 = vld [vmem:[#allocation20 + $0x8] sm:$0xff]  ;;  %v2125_v53 = vld [vmem:[#allocation20] sm:$0xff] }
 0x310   : > { %1374 = vmatpush.bf16.msra.mxu2 %v1365_v55 }
 0x311   : > { %1297 = vst.msk [vmem:[%s3302_s3 + $0x10] sm:$0xff] %vm1122_vm1, %v1293_v54  ;;  %v1301_v57 = vpack.c.bf16 %v1293_v54, %v1293_v54  ;;  %v2130_v54 = vld [vmem:[%s3535_s15 + $0x18] sm:$0xff] }
 0x312   : > { %2071 = vmatmul.msk.bf16.vlgmr.msra.gmra.mxu0 %vm1122_vm1, %v1300_v56  ;;  %1437 = vmatpush.bf16.msra.mxu3 %v2123_v27 }
 0x313   : > { %2072 = vmatmul.msk.bf16.vlgmr.msra.gmra.mxu1 %vm1122_vm1, %v1301_v57  ;;  %2073 = vmatmul.msk.bf16.vlgmr.msra.gmra.mxu2 %vm1122_vm1, %v1302_v58  ;;  %v2129_v57 = vld [vmem:[%s3535_s15 + $0x10] sm:$0xff] }
 0x314   : > { %1514 = vmatpush.bf16.msrb.mxu0 %v2126_v52  ;;  %1567 = vmatpush.bf16.msrb.mxu1 %v2130_v54 }
 0x318   : > { %1515 = vmatpush.bf16.msrb.mxu0 %v2125_v53  ;;  %1568 = vmatpush.bf16.msrb.mxu1 %v2129_v57 }
 0x339   : > { %v1225_v59 = vpop.xlane.xlu0 %1224 }
 0x33a   : > { %2342 = vrcp.f32 %v1225_v59  ;;  %v1246_v63 = vand.u32 2147483648, %v1225_v59  ;;  %v1244_v1 = vand.u32 2147483647, %v1225_v59  ;;  %vm1240_vm3 = vweird.f32 %v1225_v59 }
 0x33b   : > { %2344 = vrcp.f32 %v2918_v41 }
 0x33c   : > { %v1247_v3 = vor.u32 1.1754944e-38, %v1246_v63  ;;  %vm1245_vm5 = vcmp.eq.f32.partialorder %v1244_v1, 8.507059e+37  ;;  %v2321_v1 = vld [vmem:[#allocation17] ss:$0 sm:$0xff] }
 0x340   : > { %v2343_v60 = vpop.eup %2342 }
 0x341   : > { %v1236_v61 = vmul.f32 %v2343_v60, %v1225_v59  ;;  %vm1241_vm2 = vweird.f32 %v2343_v60  ;;  %v2345_v42 = vpop.eup %2344 }
 0x342   : > { %vm1242_vm4 = vmor %vm1240_vm3, %vm1241_vm2  ;;  %v1451_v43 = vmul.f32 32.0, %v2345_v42 }
 0x343   : > { %v1237_v62 = vsub.f32 1.0, %v1236_v61 }
 0x344   : > { %v1452_v44 = vsub.f32 1.0, %v1451_v43 }
 0x345   : > { %v1238_v0 = vmul.f32 %v2343_v60, %v1237_v62 }
 0x346   : > { %v1453_v45 = vmul.f32 %v2345_v42, %v1452_v44  ;;  %v2327_v44 = vld [vmem:[%s3537_s12] ss:$0 sm:$0xff] }
 0x347   : > { %v1239_v2 = vadd.f32 %v2343_v60, %v1238_v0 }
 0x348   : > { %v1454_v46 = vadd.f32 %v2345_v42, %v1453_v45 }
 0x349   : > { %v1243_v4 = vsel %vm1242_vm4, %v2343_v60, %v1239_v2 }
 0x34a   : > { %v1248_v5 = vsel %vm1245_vm5, %v1247_v3, %v1243_v4  ;;  %v2322_v3 = vld [vmem:[#allocation18] ss:$0 sm:$0xff] }
 0x34b   : > { %v1291_v7 = vmul.f32 %v3296_v12, %v1248_v5 }
 0x34d   : > { %1295 = vst.msk [vmem:[%s3302_s3] sm:$0xff] %vm1122_vm1, %v1291_v7  ;;  %v1299_v8 = vpack.c.bf16 %v1291_v7, %v1291_v7 }
 0x34f   : > { %2070 = vmatmul.msk.bf16.vlgmr.msrb.gmra.mxu3 %vm1122_vm1, %v1299_v8 }
 0x38f   : > { %v1338_v9 = vpop.f32.mrf.mxu0 }
 0x390   : > { %v1381_v10 = vpack.c.bf16 %v1338_v9, %v1338_v9  ;;  %v1357_v11 = vpop.f32.mrf.mxu1  ;;  %v2128_v9 = vld [vmem:[%s3535_s15 + $0x8] sm:$0xff] }
 0x391   : > { %v1382_v13 = vpack.c.bf16 %v1357_v11, %v1357_v11  ;;  %1569 = vmatpush.bf16.msrb.mxu1 %v2128_v9  ;;  %v2323_v11 = vld [vmem:[#allocation21] ss:$0 sm:$0xff] }
 0x392   : > { %v1385_v14 = vunpack.c.l.b16 %v1381_v10  ;;  %v2127_v10 = vld [vmem:[%s3535_s15] sm:$0xff] }
 0x393   : > { %v1390_v15 = vunpack.c.l.b16 %v1382_v13 }
 0x394   : > { %v1386_v16 = vpack.c.b16 %v1385_v14, %v1385_v14 }
 0x395   : > { %v1391_v17 = vpack.c.b16 %v1390_v15, %v1390_v15  ;;  %1570 = vmatpush.bf16.msrb.mxu1 %v2127_v10 }
 0x396   : > { %1387 = vrot.lane.b32.xlu1 %v1386_v16, %s3488_s23  ;;  %v1376_v18 = vpop.f32.mrf.mxu2 }
 0x397   : > { %v1383_v19 = vpack.c.bf16 %v1376_v18, %v1376_v18  ;;  %v1340_v20 = vpop.f32.mrf.mxu0  ;;  %1392 = vrot.lane.b32.xlu2 %v1391_v17, %s2916_s2  ;;  %v2324_v18 = vld [vmem:[%s3536_s16] ss:$0 sm:$0xff] }
 0x398   : > { %v1359_v12 = vpop.f32.mrf.mxu1 }
 0x399   : > { %v1395_v21 = vunpack.c.l.b16 %v1383_v19 }
 0x39b   : > { %v1396_v22 = vpack.c.b16 %v1395_v21, %v1395_v21 }
 0x39e   : > { %1397 = vrot.lane.b32.xlu1 %v1396_v22, %s2917_s5  ;;  %v1378_v23 = vpop.f32.mrf.mxu2  ;;  %s3538_s5 = sld [smem:[#allocation58_spill]] }
 0x3a4   : > { %s1695_s0 = scalar_lea.hbm %s3538_s5, %s2131_s9  ;;  %s2734_s14 = scalar_lea.hbm %s3538_s5, 64 }
 0x3a5   : > { %s1698_s24 = sshll.u32 %s1695_s0, 4  ;;  %s1699_s24 = int_to_ptr.hbm [resolvable:$true] %s1698_s24 }
 0x3a6   : > { %s2728_s21 = sshra.s32 %s1699_s24, 4  ;;  %s2729_s21 = int_to_ptr.hbm [resolvable:$true] %s2728_s21 }
 0x3a7   : > { %s2730_s12 = scalar_lea.hbm %s2729_s21, 32  ;;  %p2735_p8 = scmp.lt.s32.totalorder %s2729_s21, %s3538_s5 }
 0x3a8   : > { %p2731_p1 = scmp.ne.s32.totalorder %s2729_s21, %s2730_s12  ;;  %p2736_p7 = scmp.lt.s32.totalorder %s2734_s14, %s2730_s12 }
 0x3aa   : > { %p2732_p4 = pnand %p2731_p1, %p3177_p13  ;;  %p2737_p9 = por %p2736_p7, %p2735_p8 }
 0x3ac   : > { %p2733_p12 = pneg %p2732_p4 }
 0x3ae   : > { %p2738_p10 = pnand %p2737_p9, %p2733_p12 }
 0x3d2   : > { %v1319_v24 = vpop.f32.mrf.mxu3 }
 0x3d3   : > { %v1380_v29 = vpack.c.bf16 %v1319_v24, %v1319_v24 }
 0x3da   : > { %v1321_v25 = vpop.f32.mrf.mxu3 }
 0x3f1   : > { %v1393_v31 = vpop.permute.xlu2 %1392 }
 0x408   : > { %v1388_v28 = vpop.permute.xlu1 %1387 }
 0x409   : > { %v1401_v30 = vsel %vm1122_vm1, %v1380_v29, %v1388_v28  ;;  %vm1455_vm1 = vweird.f32 %v2345_v42  ;;  %v1618_v28 = vld [vmem:[#allocation2] sm:$0x1]  ;;  %v2919_v29 = vmov 0  }
 0x40a   : > { %v1404_v33 = vsel %vm1402_vm6, %v1401_v30, %v1393_v31  ;;  %v3326_v47 = vsel %vm1455_vm1, %v2345_v42, %v1454_v46  ;;  %2316 = vset.pattern.permute.xlu0 %v2919_v29  ;;  %v2326_v42 = vld [vmem:[%s3474_s18] ss:$0 sm:$0xff] }
 0x410   : > { %v1398_v32 = vpop.permute.xlu1 %1397 }
 0x411   : > { %v1407_v34 = vsel %vm1405_vm7, %v1404_v33, %v1398_v32 }
 0x412   : > { %2082 = vmatmul.msk.bf16.vlgmr.msra.gmra.mxu3 %vm1009_vm0, %v1407_v34 }
 0x495   : > { %v1439_v36 = vpop.f32.mrf.mxu3 }
 0x496   : > { %v1440_v37 = vadd.f32 %v2320_v35, %v1439_v36 }
 0x498   : > { %v1444_v38 = vadd.f32 %v1440_v37, %v3256_v6 }
 0x49a   : > { %v1447_v39 = vsel %vm1009_vm0, %v1444_v38, 0.0 }
 0x49b   : > { %1448 = vadd.xlane.f32.xlu2 %v1447_v39  ;;  %v2325_v39 = vld [vmem:[%s3473_s17] ss:$0 sm:$0xff] }
 0x49d   : > { %v1441_v40 = vpop.f32.mrf.mxu3 }
 0x50e   : > { %v1449_v48 = vpop.xlane.xlu2 %1448 }
 0x50f   : > { %v1457_v49 = vmul.f32 %v3326_v47, %v1449_v48 }
 0x511   : > { %v1458_v50 = vsub.f32 %v1444_v38, %v1457_v49 }
 0x513   : > { %v1459_v51 = vmul.f32 %v1458_v50, %v1458_v50 }
 0x515   : > { %v1460_v6 = vsel %vm1009_vm0, %v1459_v51, 0.0 }
 0x516   : > { %1461 = vadd.xlane.f32.xlu1 %v1460_v6 }
 0x589   : > { %v1462_v55 = vpop.xlane.xlu1 %1461 }
 0x58a   : > { %v1463_v56 = vmul.f32 %v1462_v55, %v3326_v47 }
 0x58c   : > { %v1464_v58 = vadd.f32 1e-05, %v1463_v56 }
 0x58e   : > { %2346 = vrsqrt.f32 %v1464_v58  ;;  %vm1471_vm9 = vweird.f32 %v1464_v58 }
 0x594   : > { %v2347_v59 = vpop.eup %2346 }
 0x595   : > { %v1466_v60 = vmul.f32 %v2347_v59, %v1464_v58  ;;  %vm1472_vm8 = vweird.f32 %v2347_v59 }
 0x596   : > { %vm1473_vm10 = vmor %vm1471_vm9, %vm1472_vm8 }
 0x597   : > { %v1467_v61 = vmul.f32 %v2347_v59, %v1466_v60 }
 0x599   : > { %v1468_v62 = vmul.f32 0.5, %v1467_v61 }
 0x59b   : > { %v1469_v63 = vsub.f32 1.5, %v1468_v62 }
 0x59d   : > { %v1470_v0 = vmul.f32 %v2347_v59, %v1469_v63 }
 0x59f   : > { %v1474_v2 = vsel %vm1473_vm10, %v2347_v59, %v1470_v0 }
 0x5a0   : > { %v1475_v4 = vmul.f32 %v1474_v2, %v1458_v50 }
 0x5a2   : > { %v1479_v5 = vmul.f32 %v2321_v1, %v1475_v4 }
 0x5a4   : > { %v1483_v7 = vadd.f32 %v2322_v3, %v1479_v5 }
 0x5a6   : > { %v1484_v8 = vpack.c.bf16 %v1483_v7, %v1483_v7 }
 0x5a8   : > { %2091 = vmatmul.msk.bf16.vlgmr.msrb.gmra.mxu0 %vm1009_vm0, %v1484_v8 }
 0x625   : > { %v1517_v13 = vpop.f32.mrf.mxu0 }
 0x626   : > { %v1518_v14 = vadd.f32 %v2323_v11, %v1517_v13 }
 0x628   : > { %v1521_v15 = vmax.f32 %v1518_v14, 0.0 }
 0x62a   : > { %v1522_v16 = vpack.c.bf16 %v1521_v15, %v1521_v15 }
 0x62c   : > { %2108 = vmatmul.msk.bf16.vlgmr.msrb.gmra.mxu1 %vm1559_vm11, %v1522_v16 }
 0x62d   : > { %v1519_v17 = vpop.f32.mrf.mxu0 }
 0x6a9   : > { %v1572_v19 = vpop.f32.mrf.mxu1 }
 0x6aa   : > { %v1573_v20 = vadd.f32 %v2324_v18, %v1572_v19 }
 0x6ac   : > { %v1576_v12 = vadd.f32 %v1573_v20, %v1483_v7 }
 0x6ae   : > { %v1579_v21 = vsel %vm1009_vm0, %v1576_v12, 0.0 }
 0x6af   : > { %1580 = vadd.xlane.f32.xlu0 %v1579_v21 }
 0x6b1   : > { %v1574_v22 = vpop.f32.mrf.mxu1 }
 0x722   : > { %v1581_v23 = vpop.xlane.xlu0 %1580 }
 0x723   : > { %v1582_v24 = vmul.f32 %v1581_v23, %v3326_v47 }
 0x725   : > { %v1583_v25 = vsub.f32 %v1576_v12, %v1582_v24 }
 0x727   : > { %v1584_v26 = vmul.f32 %v1583_v25, %v1583_v25 }
 0x729   : > { %v1585_v27 = vsel %vm1009_vm0, %v1584_v26, 0.0 }
 0x72a   : > { %1586 = vadd.xlane.f32.xlu0 %v1585_v27 }
 0x73e   : > { %1621 = vperm.xlu0 %2316, %v1618_v28  }
 0x79d   : > { %v1587_v30 = vpop.xlane.xlu0 %1586 }
 0x79e   : > { %v1588_v31 = vmul.f32 %v1587_v30, %v3326_v47 }
 0x7a0   : > { %v1589_v32 = vadd.f32 1e-05, %v1588_v31 }
 0x7a2   : > { %2348 = vrsqrt.f32 %v1589_v32  ;;  %vm1596_vm13 = vweird.f32 %v1589_v32 }
 0x7a8   : > { %v2349_v33 = vpop.eup %2348 }
 0x7a9   : > { %v1591_v34 = vmul.f32 %v2349_v33, %v1589_v32  ;;  %vm1597_vm12 = vweird.f32 %v2349_v33 }
 0x7aa   : > { %vm1598_vm14 = vmor %vm1596_vm13, %vm1597_vm12 }
 0x7ab   : > { %v1592_v35 = vmul.f32 %v2349_v33, %v1591_v34 }
 0x7ad   : > { %v1593_v36 = vmul.f32 0.5, %v1592_v35 }
 0x7af   : > { %v1594_v37 = vsub.f32 1.5, %v1593_v36 }
 0x7b1   : > { %v1595_v38 = vmul.f32 %v2349_v33, %v1594_v37 }
 0x7b3   : > { %v1599_v40 = vsel %vm1598_vm14, %v2349_v33, %v1595_v38 }
 0x7b4   : > { %v1600_v41 = vmul.f32 %v1599_v40, %v1583_v25 }
 0x7b6   : > { %v1604_v43 = vmul.f32 %v2325_v39, %v1600_v41 }
 0x7b8   : > { %v1608_v45 = vadd.f32 %v2326_v42, %v1604_v43 }
 0x7ba   : > { %v1614_v46 = vmul.f32 %v2327_v44, %v1608_v45  ;;  %1609 = vst.msk [vmem:[%s3361_s13] sm:$0xff] %vm1009_vm0, %v1608_v45 }
 0x7bc   : > { %v1615_v47 = vsel %vm1009_vm0, %v1614_v46, 0.0 }
 0x7bd   : > { %1616 = vadd.xlane.f32.xlu2 %v1615_v47 }
 0x7be   : > { %2741 = shalt.err (!%p2738_p10)
}
 0x7bf   : > { %s2920_s3 = smov 128   ;;  %s3539_s9 = smov 8  }
 0x7c0   : > { %2179 = dma.vmem_to_hbm [thread:$0]  (%p3177_p13), %s1697_s7, 512, %s1699_s24, %s3372_s1, %s2920_s3, %s2920_s3, %s3539_s9  }
 0x7c1   : > { %s2112_s4 = sshll.u32 %s3073_s30, 3  ;;  %s3540_s2 = sld [smem:[#allocation57_spill]] }
 0x7c2   : > { %s1682_s0 = sshll.u32 %s3361_s13, 4  ;;  %s1657_s21 = scalar_lea.sflag [#allocation5], %s3210_s8  ;;  %s1683_s0 = int_to_ptr.vmem [resolvable:$true] %s1682_s0 }
 0x7c7   : > { %s1680_s15 = scalar_lea.hbm %s3540_s2, %s2112_s4  ;;  %s2762_s7 = scalar_lea.hbm %s3540_s2, 16 }
 0x7c8   : > { %s1684_s14 = sshll.u32 %s1680_s15, 4  ;;  %s1685_s14 = int_to_ptr.hbm [resolvable:$true] %s1684_s14 }
 0x7c9   : > { %s2756_s12 = sshra.s32 %s1685_s14, 4  ;;  %s2757_s12 = int_to_ptr.hbm [resolvable:$true] %s2756_s12 }
 0x7ca   : > { %s2758_s11 = scalar_lea.hbm %s2757_s12, 8  ;;  %p2763_p6 = scmp.lt.s32.totalorder %s2757_s12, %s3540_s2 }
 0x7cb   : > { %p2759_p11 = scmp.ne.s32.totalorder %s2757_s12, %s2758_s11  ;;  %p2764_p3 = scmp.lt.s32.totalorder %s2762_s7, %s2758_s11 }
 0x7cd   : > { %p2760_p0 = pnand %p2759_p11, %p3177_p13  ;;  %p2765_p1 = por %p2764_p3, %p2763_p6 }
 0x7cf   : > { %p2761_p2 = pneg %p2760_p0 }
 0x7d1   : > { %p2766_p4 = pnand %p2765_p1, %p2761_p2 }
 0x7d3   : > { %2769 = shalt.err (!%p2766_p4)
}
 0x7d4   : > { %2178 = dma.vmem_to_hbm [thread:$0]  (%p3177_p13), %s1683_s0, 128, %s1685_s14, %s1657_s21   ;;  %v1622_v48 = vpop.permute.xlu0 %1621  ;;  %v1627_v49 = vlaneseq  ;;  %vm1631_vm0 = vcmask 57344  }
 0x7d5   : > { %v1624_v50 = vperm.slane %v1622_v48, 0  ;;  %s3541_s16 = sld [smem:[#allocation59_spill]]  ;;  %s966_s4 = scalar_lea.vmem [#allocation26], %s3210_s8 }
 0x7d6   : > { %v1628_v51 = vand.u32 127, %v1627_v49  ;;  %s1712_s23 = sshll.u32 %s966_s4, 4  ;;  %s1713_s23 = int_to_ptr.vmem [resolvable:$true] %s1712_s23 }
 0x7db   : > { %s1710_s5 = scalar_lea.hbm %s3541_s16, %s3073_s30  ;;  %s2790_s12 = scalar_lea.hbm %s3541_s16, 2 }
 0x7dc   : > { %s1714_s10 = sshll.u32 %s1710_s5, 4  ;;  %s1715_s10 = int_to_ptr.hbm [resolvable:$true] %s1714_s10 }
 0x7dd   : > { %s2784_s15 = sshra.s32 %s1715_s10, 4  ;;  %s2785_s15 = int_to_ptr.hbm [resolvable:$true] %s2784_s15 }
 0x7de   : > { %s2786_s0 = scalar_lea.hbm %s2785_s15, 1  ;;  %p2791_p9 = scmp.lt.s32.totalorder %s2785_s15, %s3541_s16 }
 0x7df   : > { %p2787_p12 = scmp.ne.s32.totalorder %s2785_s15, %s2786_s0  ;;  %p2792_p10 = scmp.lt.s32.totalorder %s2790_s12, %s2786_s0 }
 0x7e1   : > { %p2788_p8 = pnand %p2787_p12, %p3177_p13  ;;  %p2793_p11 = por %p2792_p10, %p2791_p9 }
 0x7e3   : > { %p2789_p7 = pneg %p2788_p8 }
 0x7e5   : > { %p2794_p0 = pnand %p2793_p11, %p2789_p7 }
 0x830   : > { %v1617_v6 = vpop.xlane.xlu2 %1616 }
 0x831   : > { %v1625_v52 = vadd.f32 %v1624_v50, %v1617_v6 }
 0x833   : > { %v1629_v53 = vperm.slane %v1625_v52, %v1628_v51  ;;  %v2109_v54 = vmul.f32 -1.442695, %v1625_v52 }
 0x835   : > { %2350 = vpow2.f32 %v2109_v54  ;;  %1632 = vst.msk [vmem:[%s966_s4] sm:$0x1] %vm1631_vm0, %v1629_v53 }
 0x836   : > { %2797 = shalt.err (!%p2794_p0)
}
 0x837   : > { %2180 = dma.vmem_to_hbm [thread:$0]  (%p3177_p13), %s1713_s23, 16, %s1715_s10, %s3372_s1  }
 0x838   : > { %s3542_s13 = sld [smem:[#allocation60_spill]]  ;;  %s972_s1 = scalar_lea.vmem [#allocation27], %s3210_s8 }
 0x839   : > { %s1725_s5 = sshll.u32 %s972_s1, 4  ;;  %s1671_s23 = scalar_lea.sflag [#allocation28], %s3210_s8  ;;  %s1726_s5 = int_to_ptr.vmem [resolvable:$true] %s1725_s5 }
 0x83b   : > { %v2351_v55 = vpop.eup %2350 }
 0x83c   : > { %v1636_v56 = vadd.f32 1.0, %v2351_v55 }
 0x83e   : > { %2352 = vrcp.f32 %v1636_v56  ;;  %v1648_v60 = vand.u32 2147483648, %v1636_v56  ;;  %v1646_v62 = vand.u32 2147483647, %v1636_v56  ;;  %s1723_s9 = scalar_lea.hbm %s3542_s13, %s3073_s30  ;;  %vm1642_vm2 = vweird.f32 %v1636_v56  ;;  %s2818_s14 = scalar_lea.hbm %s3542_s13, 2 }
 0x83f   : > { %s1727_s4 = sshll.u32 %s1723_s9, 4  ;;  %s1728_s4 = int_to_ptr.hbm [resolvable:$true] %s1727_s4 }
 0x840   : > { %v1649_v0 = vor.u32 1.1754944e-38, %v1648_v60  ;;  %vm1647_vm4 = vcmp.eq.f32.partialorder %v1646_v62, 8.507059e+37  ;;  %s2812_s10 = sshra.s32 %s1728_s4, 4  ;;  %s2813_s10 = int_to_ptr.hbm [resolvable:$true] %s2812_s10 }
 0x841   : > { %s2814_s30 = scalar_lea.hbm %s2813_s10, 1  ;;  %p2819_p1 = scmp.lt.s32.totalorder %s2813_s10, %s3542_s13 }
 0x842   : > { %p2815_p2 = scmp.ne.s32.totalorder %s2813_s10, %s2814_s30  ;;  %p2820_p4 = scmp.lt.s32.totalorder %s2818_s14, %s2814_s30 }
 0x844   : > { %v2353_v57 = vpop.eup %2352  ;;  %p2816_p6 = pnand %p2815_p2, %p3177_p13  ;;  %p2821_p12 = por %p2820_p4, %p2819_p1 }
 0x845   : > { %v1638_v58 = vmul.f32 %v2353_v57, %v1636_v56  ;;  %vm1643_vm15 = vweird.f32 %v2353_v57 }
 0x846   : > { %vm1644_vm3 = vmor %vm1642_vm2, %vm1643_vm15  ;;  %p2817_p3 = pneg %p2816_p6 }
 0x847   : > { %v1639_v59 = vsub.f32 1.0, %v1638_v58 }
 0x848   : > { %p2822_p8 = pnand %p2821_p12, %p2817_p3 }
 0x849   : > { %v1640_v61 = vmul.f32 %v2353_v57, %v1639_v59 }
 0x84b   : > { %v1641_v63 = vadd.f32 %v2353_v57, %v1640_v61 }
 0x84d   : > { %v1645_v1 = vsel %vm1644_vm3, %v2353_v57, %v1641_v63 }
 0x84e   : > { %v1650_v2 = vsel %vm1647_vm4, %v1649_v0, %v1645_v1 }
 0x84f   : > { %v1653_v3 = vperm.slane %v1650_v2, %v1628_v51 }
 0x851   : > { %1655 = vst.msk [vmem:[%s972_s1] sm:$0x1] %vm1631_vm0, %v1653_v3 }
 0x852   : > { %2825 = shalt.err (!%p2822_p8)
}
 0x853   : > { %2181 = dma.vmem_to_hbm [thread:$0]  (%p3177_p13), %s1726_s5, 16, %s1728_s4, %s1671_s23  }
 0x854 PF: > { %s1739_s8 = sand.u32 1, %s2884_s27   ;;  %p3543_p7 = scmp.ge.s32.totalorder %s2896_s6, 2 }
 0x855   : > { %s1740_s11 = scalar_lea.sflag [#allocation5], %s1739_s8 }
 0x856   : > { %p2225_p9 = pnand %p3543_p7, %p3184_p5 }
 0x858   : > { %p2226_p10 = pneg %p2225_p9 }
 0x85a   : > { %2871 = dma.done.wait (%p2226_p10), %s1740_s11, 128  }
 0x85b   : > { %2873 = vsyncadd (%p2226_p10), %s1740_s11, 4294967168  ;;  %s3544_s7 = sadd.s32 4294967294, %s2896_s6  }
 0x85c   : > { %s1749_s24 = sand.u32 1, %s3544_s7  }
 0x85d   : > { %s1750_s3 = scalar_lea.sflag [#allocation25], %s1749_s24 }
 0x85e   : > { %2875 = dma.done.wait (%p2226_p10), %s1750_s3, 528  }
 0x85f   : > { %2877 = vsyncadd (%p2226_p10), %s1750_s3, 4294966768  ;;  %s1769_s25 = scalar_lea.sflag [#allocation28], %s1739_s8 }
 0x860   : > { %2879 = dma.done.wait (%p2226_p10), %s1769_s25, 16  }
 0x861   : > { %2881 = vsyncadd (%p2226_p10), %s1769_s25, 4294967280  ;;  %p52_p13 = scmp.ge.s32.totalorder %s3157_s26, 4   ;;  %s3545_s27 = smov %s2888_s28 }
 0x862   : > { %s3546_s28 = smov %s2892_s20  ;;  %s3547_s20 = smov %s3169_s29 }
 0x863   : > { %s3548_s6 = smov %s3157_s26  ;;  %54 = sbr.rel (!%p52_p13) target bundleno = 38 (0x26), region = 248 }
 0x868   :  { %1774 = vsyncpa [#allocation4], 1 }
 0x869   :  { %1776 = vsyncpa [#allocation4 + $0x1], 1 }
 0x86a   :  { %1777 = vsyncpa [#allocation7], 1 }
 0x86b   :  { %1778 = vsyncpa [#allocation10], 1 }
 0x86c   :  { %1779 = vsyncpa [#allocation13], 1 }
 0x86d   :  { %1780 = vsyncpa [#allocation16], 1 }
 0x86e   :  { %1781 = vsyncpa [#allocation19], 1 }
 0x86f   :  { %1782 = vsyncpa [#allocation22], 1 }
 0x870   :  { %1783 = vsyncpa [#allocation5], 1 }
 0x871   :  { %1785 = vsyncpa [#allocation5 + $0x1], 1 }
 0x872   :  { %1786 = vsyncpa [#allocation25], 1 }
 0x873   :  { %1788 = vsyncpa [#allocation25 + $0x1], 1 }
 0x874   :  { %1789 = vsyncpa [#allocation28], 1 }
 0x875   :  { %1791 = vsyncpa [#allocation28 + $0x1], 1 }

// kernel: tpu_custom_call.1
= control target key start
LH: loop header
LB: loop body
LE: loop exit
PB: predicated region body
PF: predicated region fallthrough
CT: control target
= control target key end

     0   :  { %s3456_s0 = inlined_call_operand.vmem [shape: f32[2,8,32], index: 0, kind: input, shape index: {}]   ;;  %s3457_s1 = inlined_call_operand.vmem [shape: f32[2,8,32], index: 1, kind: input, shape index: {}]   ;;  %s3458_s2 = inlined_call_operand.hbm [shape: f32[2,1,8], index: 2, kind: input, shape index: {}]   ;;  %s3459_s3 = inlined_call_operand.vmem [shape: bf16[32,32], index: 3, kind: input, shape index: {}]   ;;  %s3460_s4 = inlined_call_operand.hbm [shape: f32[1,32], index: 4, kind: input, shape index: {}]   ;;  %s3461_s5 = inlined_call_operand.hbm [shape: bf16[32,32], index: 5, kind: input, shape index: {}]   ;;  %s3462_s6 = inlined_call_operand.hbm [shape: f32[1,32], index: 6, kind: input, shape index: {}]   ;;  %s3463_s7 = inlined_call_operand.hbm [shape: bf16[32,32], index: 7, kind: input, shape index: {}]   ;;  %s3464_s8 = inlined_call_operand.hbm [shape: f32[1,32], index: 8, kind: input, shape index: {}]   ;;  %s3465_s9 = inlined_call_operand.hbm [shape: bf16[32,32], index: 9, kind: input, shape index: {}]   ;;  %s3466_s10 = inlined_call_operand.hbm [shape: f32[1,32], index: 10, kind: input, shape index: {}]   ;;  %s3467_s11 = inlined_call_operand.hbm [shape: f32[1,32], index: 11, kind: input, shape index: {}]   ;;  %s3468_s12 = inlined_call_operand.hbm [shape: f32[1,32], index: 12, kind: input, shape index: {}]   ;;  %s3469_s13 = inlined_call_operand.hbm [shape: bf16[32,64], index: 13, kind: input, shape index: {}]   ;;  %s3470_s14 = inlined_call_operand.hbm [shape: f32[1,64], index: 14, kind: input, shape index: {}]   ;;  %s3471_s15 = inlined_call_operand.vmem [shape: bf16[64,32], index: 15, kind: input, shape index: {}]   ;;  %s3472_s16 = inlined_call_operand.vmem [shape: f32[1,32], index: 16, kind: input, shape index: {}]   ;;  %s3473_s17 = inlined_call_operand.vmem [shape: f32[1,32], index: 17, kind: input, shape index: {}]   ;;  %s3474_s18 = inlined_call_operand.vmem [shape: f32[1,32], index: 18, kind: input, shape index: {}]   ;;  %s3475_s19 = inlined_call_operand.vmem [shape: f32[1,32], index: 19, kind: input, shape index: {}]   ;;  %s3476_s20 = inlined_call_operand.<no memory space> [shape: f32[1,1], index: 20, kind: input, shape index: {}]   ;;  %s3477_s21 = inlined_call_operand.hbm [shape: f32[2,8,32], index: 21, kind: output, shape index: {0}]   ;;  %s3478_s22 = inlined_call_operand.hbm [shape: f32[2,4,8,8], index: 22, kind: output, shape index: {1}]   ;;  %s3479_s23 = inlined_call_operand.hbm [shape: f32[2,1,8], index: 23, kind: output, shape index: {2}]   ;;  %s3480_s24 = inlined_call_operand.hbm [shape: f32[2,1,8], index: 24, kind: output, shape index: {3}]  }
   0x1   :  { %3491 = sst [smem:[#allocation39_spill]] %s3456_s0  ;;  %v30_v0 = vstv %s3476_s20 }
   0x2   :  { %3492 = sst [smem:[#allocation40_spill]] %s3457_s1  ;;  %31 = vst [vmem:[#allocation2] sm:$0x1] %v30_v0 }
   0x3   :  { %3493 = sst [smem:[#allocation41_spill]] %s3458_s2 }
   0x4   :  { %3494 = sst [smem:[#allocation42_spill]] %s3459_s3 }
   0x5   :  { %3495 = sst [smem:[#allocation43_spill]] %s3460_s4 }
   0x6   :  { %3496 = sst [smem:[#allocation44_spill]] %s3461_s5 }
   0x7   :  { %3497 = sst [smem:[#allocation45_spill]] %s3462_s6 }
   0x8   :  { %3498 = sst [smem:[#allocation46_spill]] %s3463_s7 }
   0x9   :  { %3499 = sst [smem:[#allocation47_spill]] %s3464_s8 }
   0xa   :  { %3500 = sst [smem:[#allocation48_spill]] %s3465_s9 }
   0xb   :  { %3501 = sst [smem:[#allocation49_spill]] %s3466_s10 }
   0xc   :  { %3502 = sst [smem:[#allocation50_spill]] %s3467_s11 }
   0xd   :  { %3503 = sst [smem:[#allocation51_spill]] %s3468_s12 }
   0xe   :  { %3504 = sst [smem:[#allocation52_spill]] %s3469_s13 }
   0xf   :  { %3505 = sst [smem:[#allocation53_spill]] %s3470_s14 }
  0x10   :  { %3506 = sst [smem:[#allocation54_spill]] %s3471_s15 }
  0x11   :  { %3507 = sst [smem:[#allocation55_spill]] %s3472_s16 }
  0x12   :  { %3508 = sst [smem:[#allocation56_spill]] %s3475_s19 }
  0x13   :  { %3509 = sst [smem:[#allocation57_spill]] %s3477_s21 }
  0x14   :  { %3510 = sst [smem:[#allocation58_spill]] %s3478_s22 }
  0x15   :  { %3511 = sst [smem:[#allocation59_spill]] %s3479_s23 }
  0x16   :  { %3512 = sst [smem:[#allocation60_spill]] %s3480_s24 }
  0x17   :  { %32 = vsyncpa [#allocation4], 0 }
  0x18   :  { %34 = vsyncpa [#allocation4 + $0x1], 0 }
  0x19   :  { %35 = vsyncpa [#allocation7], 0 }
  0x1a   :  { %36 = vsyncpa [#allocation10], 0 }
  0x1b   :  { %37 = vsyncpa [#allocation13], 0 }
  0x1c   :  { %38 = vsyncpa [#allocation16], 0 }
  0x1d   :  { %39 = vsyncpa [#allocation19], 0 }
  0x1e   :  { %40 = vsyncpa [#allocation22], 0 }
  0x1f   :  { %41 = vsyncpa [#allocation5], 0 }
  0x20   :  { %43 = vsyncpa [#allocation5 + $0x1], 0 }
  0x21   :  { %44 = vsyncpa [#allocation25], 0 }
  0x22   :  { %46 = vsyncpa [#allocation25 + $0x1], 0 }
  0x23   :  { %47 = vsyncpa [#allocation28], 0 }
  0x24   :  { %49 = vsyncpa [#allocation28 + $0x1], 0  ;;  %s3049_s27 = smov 0   ;;  %s3051_s28 = smov 0  }
  0x25   :  { %s3053_s20 = smov 0   ;;  %s3055_s6 = smov 0  }
  0x26 LB: > { %s3513_s0 = sld [smem:[#allocation43_spill]]  ;;  %s3073_s30 = sadd.s32 4294967295, %s2896_s6   ;;  %s2896_s6 = sphi %s3055_s6, %s3548_s6   ;;  %s2892_s20 = sphi %s3053_s20, %s3547_s20   ;;  %s2888_s28 = sphi %s3051_s28, %s3546_s28   ;;  %s2884_s27 = sphi %s3049_s27, %s3545_s27  }
  0x27   : > { %p2010_p0 = scmp.ge.s32.totalorder %s2896_s6, 1  ;;  %p128_p1 = scmp.eq.s32.totalorder %s3073_s30, 0 }
  0x28   : > { %p620_p2 = scmp.lt.s32.totalorder %s2896_s6, 3  ;;  %s2898_s25 = smov [#allocation6]  }
  0x29   : > { %s637_s8 = sshll.u32 %s2898_s25, 4  ;;  %s3515_s5 = sld [smem:[#allocation45_spill]]  ;;  %s638_s8 = int_to_ptr.vmem [resolvable:$true] %s637_s8 }
  0x2a   : > { %p3078_p3 = pnand %p2010_p0, %p620_p2  ;;  %s2899_s29 = smov [#allocation9]  }
  0x2b   : > { %s3517_s23 = sld [smem:[#allocation47_spill]]  ;;  %s2900_s22 = smov [#allocation12]  }
  0x2c   : > { %s635_s7 = sshll.u32 %s3513_s0, 4  ;;  %p2186_p5 = pneg %p3078_p3  ;;  %s636_s7 = int_to_ptr.hbm [resolvable:$true] %s635_s7 }
  0x2d   : > { %s663_s0 = sshll.u32 %s2899_s29, 4  ;;  %s3518_s10 = sld [smem:[#allocation49_spill]]  ;;  %s664_s0 = int_to_ptr.vmem [resolvable:$true] %s663_s0 }
  0x2e   : > { %p3090_p6 = pnand %p2186_p5, %p128_p1  ;;  %s689_s19 = sshll.u32 %s2900_s22, 4  ;;  %s690_s19 = int_to_ptr.vmem [resolvable:$true] %s689_s19 }
  0x2f   : > { %s661_s26 = sshll.u32 %s3515_s5, 4  ;;  %s2901_s29 = smov [#allocation15]   ;;  %s662_s26 = int_to_ptr.hbm [resolvable:$true] %s661_s26 }
  0x30   : > { %2189 = dma.hbm_to_vmem [thread:$0]  (!%p3090_p6), %s636_s7, 16, %s638_s8, [#allocation7]  }
  0x31   : > { %s687_s21 = sshll.u32 %s3517_s23, 4  ;;  %s715_s24 = sshll.u32 %s2901_s29, 4  ;;  %s688_s21 = int_to_ptr.hbm [resolvable:$true] %s687_s21  ;;  %s716_s24 = int_to_ptr.vmem [resolvable:$true] %s715_s24 }
  0x32   : > { %2195 = dma.hbm_to_vmem [thread:$0]  (!%p3090_p6), %s662_s26, 16, %s664_s0, [#allocation10]  }
  0x33   : > { %s713_s5 = sshll.u32 %s3518_s10, 4  ;;  %s3519_s12 = sld [smem:[#allocation51_spill]]  ;;  %s714_s5 = int_to_ptr.hbm [resolvable:$true] %s713_s5 }
  0x34   : > { %2201 = dma.hbm_to_vmem [thread:$0]  (!%p3090_p6), %s688_s21, 16, %s690_s19, [#allocation13]  }
  0x35   : > { %2207 = dma.hbm_to_vmem [thread:$0]  (!%p3090_p6), %s714_s5, 16, %s716_s24, [#allocation16]  }
  0x36   : > { %s3520_s0 = sld [smem:[#allocation44_spill]]  ;;  %s2902_s22 = smov [#allocation18]  }
  0x37   : > { %s739_s1 = sshll.u32 %s2902_s22, 4  ;;  %s2903_s19 = smov [#allocation8]   ;;  %s740_s1 = int_to_ptr.vmem [resolvable:$true] %s739_s1 }
  0x38   : > { %s648_s21 = sshll.u32 %s2903_s19, 4  ;;  %s2904_s29 = smov 64   ;;  %s649_s21 = int_to_ptr.vmem [resolvable:$true] %s648_s21 }
  0x39   : > { %s737_s7 = sshll.u32 %s3519_s12, 4  ;;  %s2905_s25 = smov 4   ;;  %s738_s7 = int_to_ptr.hbm [resolvable:$true] %s737_s7 }
  0x3a   : > { %2213 = dma.hbm_to_vmem [thread:$0]  (!%p3090_p6), %s738_s7, 16, %s740_s1, [#allocation19]  }
  0x3b   : > { %s3521_s23 = sld [smem:[#allocation46_spill]]  ;;  %s2906_s26 = smov [#allocation11]  }
  0x3c   : > { %s646_s4 = sshll.u32 %s3520_s0, 4  ;;  %s674_s0 = sshll.u32 %s2906_s26, 4  ;;  %s647_s4 = int_to_ptr.hbm [resolvable:$true] %s646_s4  ;;  %s675_s0 = int_to_ptr.vmem [resolvable:$true] %s674_s0 }
  0x3d   : > { %2192 = dma.hbm_to_vmem [thread:$0]  (!%p3090_p6), %s647_s4, 256, %s649_s21, [#allocation7], %s2904_s29, %s2904_s29, %s2905_s25  }
  0x3e   : > { %s3522_s9 = sld [smem:[#allocation48_spill]]  ;;  %s2907_s4 = smov [#allocation14]  }
  0x3f   : > { %s700_s19 = sshll.u32 %s2907_s4, 4  ;;  %s3523_s11 = sld [smem:[#allocation50_spill]]  ;;  %s701_s19 = int_to_ptr.vmem [resolvable:$true] %s700_s19 }
  0x40   : > { %s3524_s13 = sld [smem:[#allocation52_spill]]  ;;  %s2909_s22 = smov [#allocation20]  }
  0x41   : > { %s672_s8 = sshll.u32 %s3521_s23, 4  ;;  %s3525_s14 = sld [smem:[#allocation53_spill]]  ;;  %s673_s8 = int_to_ptr.hbm [resolvable:$true] %s672_s8 }
  0x42   : > { %2198 = dma.hbm_to_vmem [thread:$0]  (!%p3090_p6), %s673_s8, 256, %s675_s0, [#allocation10], %s2904_s29, %s2904_s29, %s2905_s25  }
  0x43   : > { %s2908_s0 = smov [#allocation17]   ;;  %s2910_s5 = smov [#allocation21]  }
  0x44   : > { %s698_s1 = sshll.u32 %s3522_s9, 4  ;;  %s727_s7 = sshll.u32 %s2908_s0, 4  ;;  %s699_s1 = int_to_ptr.hbm [resolvable:$true] %s698_s1  ;;  %s728_s7 = int_to_ptr.vmem [resolvable:$true] %s727_s7 }
  0x45   : > { %s725_s24 = sshll.u32 %s3523_s11, 4  ;;  %s3487_s23 = sadd.s32 4294967294, %s2896_s6   ;;  %s726_s24 = int_to_ptr.hbm [resolvable:$true] %s725_s24 }
  0x46   : > { %2204 = dma.hbm_to_vmem [thread:$0]  (!%p3090_p6), %s699_s1, 256, %s701_s19, [#allocation13], %s2904_s29, %s2904_s29, %s2905_s25  }
  0x47   : > { %s748_s8 = sshll.u32 %s3524_s13, 4  ;;  %s750_s1 = sshll.u32 %s2909_s22, 4  ;;  %s749_s8 = int_to_ptr.hbm [resolvable:$true] %s748_s8  ;;  %s751_s1 = int_to_ptr.vmem [resolvable:$true] %s750_s1 }
  0x48   : > { %2210 = dma.hbm_to_vmem [thread:$0]  (!%p3090_p6), %s726_s24, 16, %s728_s7, [#allocation16]  }
  0x49   : > { %s763_s21 = sshll.u32 %s3525_s14, 4  ;;  %s765_s24 = sshll.u32 %s2910_s5, 4  ;;  %s764_s21 = int_to_ptr.hbm [resolvable:$true] %s763_s21  ;;  %s766_s24 = int_to_ptr.vmem [resolvable:$true] %s765_s24 }
  0x4a   : > { %2216 = dma.hbm_to_vmem [thread:$0]  (!%p3090_p6), %s749_s8, 256, %s751_s1, [#allocation19], %s2904_s29, %s2904_s29, %s2905_s25  }
  0x4b   : > { %2219 = dma.hbm_to_vmem [thread:$0]  (!%p3090_p6), %s764_s21, 16, %s766_s24, [#allocation22]  }
  0x4c   : > { %s3157_s26 = sadd.s32 1, %s2896_s6   ;;  %s114_s0 = sadd.s32 1, %s2892_s20 }
  0x4d   : > { %s111_s7 = ssub.s32 %s2896_s6, %s3157_s26  ;;  %p121_p7 = scmp.ne.s32.totalorder %s2892_s20, %s2888_s28 }
  0x4e   : > { %p112_p8 = scmp.eq.s32.totalorder %s111_s7, 0  ;;  %p122_p9 = scmp.eq.s32.totalorder %s2896_s6, 0 }
  0x4f   : > { %p127_p10 = scmp.ne.s32.totalorder %s2888_s28, %s2884_s27  ;;  %p529_p11 = scmp.eq.s32.totalorder %s3073_s30, 1 }
  0x50   : > { %s3169_s29 = scalar_select %p112_p8, %s2892_s20, %s114_s0  }
  0x51   : > { %p3173_p12 = por %p128_p1, %p127_p10  ;;  %p3177_p13 = por %p529_p11, %p121_p7 }
  0x52   : > { %p535_p0 = scmp.eq.s32.totalorder %s3487_s23, 1  ;;  %p123_p2 = por %p122_p9, %p121_p7 }
  0x53   : > { %s808_s8 = sand.u32 1, %s2892_s20   ;;  %p2248_p6 = scmp.lt.s32.totalorder %s2896_s6, 2 }
  0x54   : > { %p3184_p5 = por %p535_p0, %p127_p10  ;;  %s3529_s19 = sld [smem:[#allocation41_spill]] }
  0x55   : > { %s811_s24 = scalar_lea.vmem [#allocation3], %s808_s8  ;;  %p3193_p8 = pnand %p2248_p6, %p123_p2 }
  0x56   : > { %s818_s0 = sshll.u32 %s811_s24, 4  ;;  %s809_s23 = scalar_lea.sflag [#allocation4], %s808_s8  ;;  %s819_s0 = int_to_ptr.vmem [resolvable:$true] %s818_s0 }
  0x57   : > { %p2688_p9 = pneg %p3193_p8 }
  0x5a   : > { %s814_s21 = scalar_lea.hbm %s3529_s19, %s2896_s6 }
  0x5b   : > { %s816_s5 = sshll.u32 %s814_s21, 4  ;;  %s2691_s21 = scalar_lea.hbm %s3529_s19, 2  ;;  %s817_s5 = int_to_ptr.hbm [resolvable:$true] %s816_s5 }
  0x5c   : > { %s2684_s9 = sshra.s32 %s817_s5, 4  ;;  %s2685_s9 = int_to_ptr.hbm [resolvable:$true] %s2684_s9 }
  0x5d   : > { %s2686_s10 = scalar_lea.hbm %s2685_s9, 1  ;;  %p2692_p0 = scmp.lt.s32.totalorder %s2685_s9, %s3529_s19 }
  0x5e   : > { %p2687_p7 = scmp.ne.s32.totalorder %s2685_s9, %s2686_s10  ;;  %p2693_p2 = scmp.lt.s32.totalorder %s2691_s21, %s2686_s10 }
  0x60   : > { %p2689_p10 = pnand %p2688_p9, %p2687_p7  ;;  %p2694_p6 = por %p2693_p2, %p2692_p0 }
  0x62   : > { %p2690_p11 = pneg %p2689_p10 }
  0x64   : > { %p2695_p4 = pnand %p2694_p6, %p2690_p11 }
  0x66   : > { %2698 = shalt.err (!%p2695_p4)
}
  0x67   : > { %2223 = dma.hbm_to_vmem [thread:$0]  (!%p3193_p8), %s817_s5, 16, %s819_s0, %s809_s23  }
  0x68   : > { %827 = sbr.rel (%p3078_p3) target bundleno = 2132 (0x854), region = 104  ;;  %s3210_s8 = sand.u32 (!%p3078_p3), 1, %s2888_s28  }
  0x69   : > { %s830_s1 = scalar_lea.sflag (!%p3078_p3), [#allocation4], %s3210_s8 }
  0x6d   : > { %2843 = dma.done.wait (%p3173_p12), %s830_s1, 16  }
  0x6e   : > { %2845 = vsyncadd (%p3173_p12), %s830_s1, 4294967280 }
  0x6f   : > { %2847 = dma.done.wait (%p128_p1), [#allocation7], 272  }
  0x70   : > { %2849 = vsyncadd (%p128_p1), [#allocation7], 4294967024 }
  0x71   : > { %2851 = dma.done.wait (%p128_p1), [#allocation10], 272  }
  0x72   : > { %2853 = vsyncadd (%p128_p1), [#allocation10], 4294967024 }
  0x73   : > { %2855 = dma.done.wait (%p128_p1), [#allocation13], 272  }
  0x74   : > { %2857 = vsyncadd (%p128_p1), [#allocation13], 4294967024 }
  0x75   : > { %2859 = dma.done.wait (%p128_p1), [#allocation16], 32  }
  0x76   : > { %2861 = vsyncadd (%p128_p1), [#allocation16], 4294967264 }
  0x77   : > { %2863 = dma.done.wait (%p128_p1), [#allocation19], 272  }
  0x78   : > { %2865 = vsyncadd (%p128_p1), [#allocation19], 4294967024 }
  0x79   : > { %2867 = dma.done.wait (%p128_p1), [#allocation22], 16  }
  0x7a   : > { %2869 = vsyncadd (%p128_p1), [#allocation22], 4294967280  ;;  %p973_p3 = scmp.lt.s32.totalorder %s3073_s30, 1  ;;  %s3531_s23 = sld [smem:[#allocation40_spill]]  ;;  %v2120_v1 = vld [vmem:[#allocation8 + $0x8] sm:$0xff]  ;;  %v2119_v3 = vld [vmem:[#allocation8] sm:$0xff] }
  0x7b   : > { %s3532_s7 = sld [smem:[#allocation39_spill]]  ;;  %1055 = vmatpush.bf16.msra.mxu1 %v2120_v1  ;;  %vm1009_vm0 = vcmask 261120   ;;  %v2317_v9 = vld [vmem:[#allocation9] ss:$0 sm:$0xff]  ;;  %v2318_v10 = vld [vmem:[#allocation6] ss:$0 sm:$0xff] }
  0x7c   : > { %s974_s9 = scalar_select %p973_p3, %s3073_s30, 1  ;;  %vm1122_vm1 = vcmask 64512   ;;  %v2122_v20 = vld [vmem:[#allocation11 + $0x8] sm:$0xff]  ;;  %v2121_v21 = vld [vmem:[#allocation11] sm:$0xff]  ;;  %v2319_v33 = vld [vmem:[#allocation12] ss:$0 sm:$0xff] }
  0x7d   : > { %s3533_s4 = sld [smem:[#allocation42_spill]]  ;;  %s2911_s12 = smov 120   ;;  %1088 = vmatpush.bf16.msra.mxu2 %v2122_v20  ;;  %vm1306_vm2 = vcmask 1043456   ;;  %v2914_v40 = vmov -1e+30  }
  0x7e   : > { %s2037_s10 = sshll.u32 %s974_s9, 3  ;;  %s2912_s13 = smov 104  }
  0x7f   : > { %1056 = vmatpush.bf16.msra.mxu1 %v2119_v3  ;;  %s2913_s9 = smov 112   ;;  %s2036_s11 = sshll.u32 %s3210_s8, 5 }
  0x80   : > { %s980_s2 = scalar_lea.vmem %s3531_s23, %s2037_s10  ;;  %s3302_s3 = scalar_lea.vmem [#allocation24], %s2036_s11 }
  0x81   : > { %s976_s21 = scalar_lea.vmem %s3532_s7, %s2037_s10  ;;  %v984_v5 = vld [vmem:[%s980_s2] sm:$0xff]  ;;  %1089 = vmatpush.bf16.msra.mxu2 %v2121_v21  ;;  %s3534_s10 = scalar_lea.vmem [#allocation3], %s3210_s8 }
  0x82   : > { %v3256_v6 = vld [vmem:[%s976_s21] sm:$0xff]  ;;  %v985_v7 = vpack.c.bf16 %v984_v5, %v984_v5  ;;  %s3488_s23 = smov 8   ;;  %s2916_s2 = smov 16  }
  0x83   : > { %v2118_v2 = vld [vmem:[%s3533_s4 + $0x8] sm:$0xff]  ;;  %v2117_v4 = vld [vmem:[%s3533_s4] sm:$0xff]  ;;  %v983_v8 = vpack.c.bf16 %v3256_v6, %v3256_v6  ;;  %s2917_s5 = smov 24   ;;  %s3535_s15 = sld [smem:[#allocation54_spill]] }
  0x84   : > { %1019 = vmatpush.bf16.msra.mxu0 %v2118_v2  ;;  %2056 = vmatmul.msk.bf16.vlgmr.msra.gmra.mxu1 %vm1009_vm0, %v985_v7  ;;  %v986_v39 = vld [vmem:[%s3534_s10] sm:$0x1]  ;;  %s3536_s16 = sld [smem:[#allocation55_spill]]  ;;  %s2035_s21 = sshll.u32 %s3210_s8, 3 }
  0x85   : > { %2065 = vmatmul.msk.bf16.vlgmr.msra.gmra.mxu2 %vm1009_vm0, %v985_v7  ;;  %vm987_vm3 = vcmp.gt.f32.partialorder %v986_v39, 0.5  ;;  %s1661_s10 = sand.u32 1, %s3073_s30   ;;  %s1696_s7 = sshll.u32 %s3302_s3, 4  ;;  %s1697_s7 = int_to_ptr.vmem [resolvable:$true] %s1696_s7 }
  0x86   : > { %v988_v41 = vsel %vm987_vm3, 0.0, %v2914_v40  ;;  %s3372_s1 = scalar_lea.sflag [#allocation25], %s1661_s10 }
  0x87   : > { %v1120_v42 = vperm.slane %v988_v41, 0 }
  0x88   : > { %1020 = vmatpush.bf16.msra.mxu0 %v2117_v4 }
  0x8b   : > { %2047 = vmatmul.msk.bf16.vlgmr.msra.gmra.mxu0 %vm1009_vm0, %v983_v8 }
 0x101   : > { %v1058_v11 = vpop.f32.mrf.mxu1 }
 0x102   : > { %v1059_v13 = vadd.f32 %v2317_v9, %v1058_v11 }
 0x104   : > { %v1103_v15 = vpack.c.bf16 %v1059_v13, %v1059_v13 }
 0x106   : > { %1105 = vrot.lane.b32.xlu1 %v1103_v15, %s2911_s12  ;;  %1109 = vrot.lane.b32.xlu0 %v1103_v15, %s2912_s13  ;;  %v1127_v17 = vsel %vm1122_vm1, %v1103_v15, 0 }
 0x107   : > { %1136 = vmatpush.bf16.xpose.msra.mxu3 %v1127_v17 }
 0x108   : > { %v1022_v12 = vpop.f32.mrf.mxu0  ;;  %v1091_v34 = vpop.f32.mrf.mxu2 }
 0x109   : > { %v1023_v14 = vadd.f32 %v2318_v10, %v1022_v12  ;;  %v1060_v18 = vpop.f32.mrf.mxu1  ;;  %v1092_v35 = vadd.f32 %v2319_v33, %v1091_v34 }
 0x10b   : > { %v1095_v16 = vpack.c.bf16 %v1023_v14, %v1023_v14  ;;  %v1111_v36 = vpack.c.bf16 %v1092_v35, %v1092_v35 }
 0x10d   : > { %1097 = vrot.lane.b32.xlu2 %v1095_v16, %s2911_s12  ;;  %v1308_v37 = vsel %vm1306_vm2, %v1111_v36, 0 }
 0x10e   : > { %1107 = vrot.lane.b32.xlu1 %v1103_v15, %s2913_s9  ;;  %1101 = vrot.lane.b32.xlu0 %v1095_v16, %s2912_s13 }
 0x10f   : > { %2066 = vmatmul.msk.bf16.vlgmr.msra.gmra.mxu3 %vm1122_vm1, %v1095_v16 }
 0x110   : > { %v1024_v19 = vpop.f32.mrf.mxu0  ;;  %1317 = vmatpush.bf16.msrb.mxu3 %v1308_v37  ;;  %v1093_v38 = vpop.f32.mrf.mxu2 }
 0x115   : > { %1099 = vrot.lane.b32.xlu2 %v1095_v16, %s2913_s9 }
 0x167   : > { %v1098_v26 = vpop.permute.xlu2 %1097 }
 0x16f   : > { %v1100_v30 = vpop.permute.xlu2 %1099 }
 0x178   : > { %v1106_v22 = vpop.permute.xlu1 %1105  ;;  %v1110_v23 = vpop.permute.xlu0 %1109 }
 0x179   : > { %v1146_v24 = vsel %vm1122_vm1, %v1106_v22, 0  ;;  %v1184_v25 = vsel %vm1122_vm1, %v1110_v23, 0 }
 0x17a   : > { %1155 = vmatpush.bf16.xpose.msrb.mxu0 %v1146_v24  ;;  %1193 = vmatpush.bf16.xpose.msrb.mxu2 %v1184_v25 }
 0x180   : > { %v1108_v27 = vpop.permute.xlu1 %1107  ;;  %v1102_v28 = vpop.permute.xlu0 %1101 }
 0x181   : > { %2067 = vmatmul.msk.bf16.vlgmr.msrb.gmra.mxu0 %vm1122_vm1, %v1098_v26  ;;  %2069 = vmatmul.msk.bf16.vlgmr.msrb.gmra.mxu2 %vm1122_vm1, %v1102_v28  ;;  %v1165_v29 = vsel %vm1122_vm1, %v1108_v27, 0 }
 0x182   : > { %1174 = vmatpush.bf16.xpose.msrb.mxu1 %v1165_v29 }
 0x189   : > { %2068 = vmatmul.msk.bf16.vlgmr.msrb.gmra.mxu1 %vm1122_vm1, %v1100_v30 }
 0x192   : > { %v1138_v31 = vpop.f32.mrf.mxu3 }
 0x193   : > { %v1139_v54 = vadd.f32 %v1138_v31, %v1120_v42 }
 0x195   : > { %v1199_v56 = vsel %vm1122_vm1, %v1139_v54, -inf }
 0x19a   : > { %v1140_v32 = vpop.f32.mrf.mxu3 }
 0x1fe   : > { %v1157_v43 = vpop.f32.mrf.mxu0 }
 0x1ff   : > { %v1158_v44 = vadd.f32 %v1157_v43, %v1120_v42 }
 0x201   : > { %v1202_v45 = vsel %vm1122_vm1, %v1158_v44, -inf }
 0x202   : > { %1203 = vmax.xlane.f32.xlu1 %v1202_v45 }
 0x204   : > { %v1195_v46 = vpop.f32.mrf.mxu2 }
 0x205   : > { %v1196_v47 = vadd.f32 %v1195_v46, %v1120_v42 }
 0x206   : > { %v1159_v48 = vpop.f32.mrf.mxu0  ;;  %v1176_v49 = vpop.f32.mrf.mxu1 }
 0x207   : > { %v1177_v50 = vadd.f32 %v1176_v49, %v1120_v42  ;;  %v1208_v51 = vsel %vm1122_vm1, %v1196_v47, -inf }
 0x208   : > { %1209 = vmax.xlane.f32.xlu0 %v1208_v51 }
 0x209   : > { %v1205_v52 = vsel %vm1122_vm1, %v1177_v50, -inf }
 0x20a   : > { %1206 = vmax.xlane.f32.xlu2 %v1205_v52 }
 0x20c   : > { %v1197_v53 = vpop.f32.mrf.mxu2 }
 0x20e   : > { %v1178_v55 = vpop.f32.mrf.mxu1 }
 0x212   : > { %1200 = vmax.xlane.f32.xlu2 %v1199_v56 }
 0x275   : > { %v1204_v57 = vpop.xlane.xlu1 %1203 }
 0x276   : > { %v1212_v58 = vsub.f32 %v1158_v44, %v1204_v57 }
 0x278   : > { %v1217_v59 = vmul.f32 1.442695, %v1212_v58 }
 0x27a   : > { %2328 = vpow2.f32 %v1217_v59 }
 0x27b   : > { %v1210_v60 = vpop.xlane.xlu0 %1209 }
 0x27c   : > { %v1214_v61 = vsub.f32 %v1196_v47, %v1210_v60 }
 0x27d   : > { %v1207_v62 = vpop.xlane.xlu2 %1206 }
 0x27e   : > { %v1221_v63 = vmul.f32 1.442695, %v1214_v61  ;;  %v1213_v0 = vsub.f32 %v1177_v50, %v1207_v62 }
 0x280   : > { %v2329_v1 = vpop.eup %2328  ;;  %2330 = vpow2.f32 %v1221_v63  ;;  %v1219_v2 = vmul.f32 1.442695, %v1213_v0 }
 0x281   : > { %v1226_v3 = vsel %vm1122_vm1, %v2329_v1, 0.0 }
 0x282   : > { %2332 = vpow2.f32 %v1219_v2  ;;  %1227 = vadd.xlane.f32.xlu1 %v1226_v3 }
 0x285   : > { %v1201_v9 = vpop.xlane.xlu2 %1200 }
 0x286   : > { %v3285_v4 = vpop.eup %2330  ;;  %v1211_v10 = vsub.f32 %v1139_v54, %v1201_v9 }
 0x287   : > { %v1232_v5 = vsel %vm1122_vm1, %v3285_v4, 0.0 }
 0x288   : > { %v3289_v7 = vpop.eup %2332  ;;  %1233 = vadd.xlane.f32.xlu0 %v1232_v5  ;;  %v1215_v11 = vmul.f32 1.442695, %v1211_v10 }
 0x289   : > { %v1229_v8 = vsel %vm1122_vm1, %v3289_v7, 0.0 }
 0x28a   : > { %1230 = vadd.xlane.f32.xlu2 %v1229_v8  ;;  %2334 = vpow2.f32 %v1215_v11 }
 0x290   : > { %v3296_v12 = vpop.eup %2334 }
 0x291   : > { %v1223_v13 = vsel %vm1122_vm1, %v3296_v12, 0.0 }
 0x29b   : > { %1113 = vrot.lane.b32.xlu1 %v1111_v36, %s2911_s12  ;;  %s3537_s12 = sld [smem:[#allocation56_spill]] }
 0x29c   : > { %1117 = vrot.lane.b32.xlu0 %v1111_v36, %s2912_s13  ;;  %s3361_s13 = scalar_lea.vmem [#allocation23], %s2035_s21 }
 0x2a2   : > { %1115 = vrot.lane.b32.xlu2 %v1111_v36, %s2913_s9  ;;  %s2131_s9 = sshll.u32 %s3073_s30, 5 }
 0x2c6   : > { %1224 = vadd.xlane.f32.xlu0 %v1223_v13 }
 0x2f5   : > { %v1228_v14 = vpop.xlane.xlu1 %1227 }
 0x2f6   : > { %2336 = vrcp.f32 %v1228_v14  ;;  %v1260_v20 = vand.u32 2147483648, %v1228_v14  ;;  %v1258_v22 = vand.u32 2147483647, %v1228_v14  ;;  %vm1254_vm5 = vweird.f32 %v1228_v14 }
 0x2f8   : > { %v1261_v27 = vor.u32 1.1754944e-38, %v1260_v20  ;;  %vm1259_vm7 = vcmp.eq.f32.partialorder %v1258_v22, 8.507059e+37 }
 0x2fb   : > { %v1234_v15 = vpop.xlane.xlu0 %1233 }
 0x2fc   : > { %v2337_v16 = vpop.eup %2336  ;;  %2338 = vrcp.f32 %v1234_v15  ;;  %v1286_v33 = vand.u32 2147483647, %v1234_v15  ;;  %v1288_v34 = vand.u32 2147483648, %v1234_v15  ;;  %vm1282_vm9 = vweird.f32 %v1234_v15 }
 0x2fd   : > { %v1250_v17 = vmul.f32 %v2337_v16, %v1228_v14  ;;  %v1231_v18 = vpop.xlane.xlu2 %1230  ;;  %vm1255_vm4 = vweird.f32 %v2337_v16 }
 0x2fe   : > { %2340 = vrcp.f32 %v1231_v18  ;;  %vm1256_vm6 = vmor %vm1254_vm5, %vm1255_vm4  ;;  %v1274_v39 = vand.u32 2147483648, %v1231_v18  ;;  %v1272_v42 = vand.u32 2147483647, %v1231_v18  ;;  %v1289_v43 = vor.u32 1.1754944e-38, %v1288_v34 }
 0x2ff   : > { %v1251_v19 = vsub.f32 1.0, %v1250_v17  ;;  %vm1287_vm12 = vcmp.eq.f32.partialorder %v1286_v33, 8.507059e+37  ;;  %vm1268_vm13 = vweird.f32 %v1231_v18 }
 0x300   : > { %v1275_v47 = vor.u32 1.1754944e-38, %v1274_v39  ;;  %vm1273_vm15 = vcmp.eq.f32.partialorder %v1272_v42, 8.507059e+37 }
 0x301   : > { %v1252_v21 = vmul.f32 %v2337_v16, %v1251_v19 }
 0x302   : > { %v2339_v23 = vpop.eup %2338 }
 0x303   : > { %v1253_v24 = vadd.f32 %v2337_v16, %v1252_v21  ;;  %v1278_v25 = vmul.f32 %v2339_v23, %v1234_v15  ;;  %vm1283_vm8 = vweird.f32 %v2339_v23 }
 0x304   : > { %v2341_v26 = vpop.eup %2340  ;;  %vm1284_vm11 = vmor %vm1282_vm9, %vm1283_vm8 }
 0x305   : > { %v1257_v28 = vsel %vm1256_vm6, %v2337_v16, %v1253_v24  ;;  %v1279_v29 = vsub.f32 1.0, %v1278_v25  ;;  %v1264_v30 = vmul.f32 %v2341_v26, %v1231_v18  ;;  %v1116_v31 = vpop.permute.xlu2 %1115  ;;  %vm1269_vm10 = vweird.f32 %v2341_v26 }
 0x306   : > { %v1262_v32 = vsel %vm1259_vm7, %v1261_v27, %v1257_v28  ;;  %v1346_v35 = vsel %vm1306_vm2, %v1116_v31, 0  ;;  %vm1270_vm14 = vmor %vm1268_vm13, %vm1269_vm10  ;;  %v2123_v27 = vld [vmem:[#allocation14] sm:$0xff]  ;;  %vm1402_vm6 = vcmask 130048   ;;  %vm1405_vm7 = vcmask 195584  }
 0x307   : > { %v1292_v36 = vmul.f32 %v2329_v1, %v1262_v32  ;;  %v1280_v37 = vmul.f32 %v2339_v23, %v1279_v29  ;;  %v1265_v38 = vsub.f32 1.0, %v1264_v30  ;;  %1355 = vmatpush.bf16.msra.mxu1 %v1346_v35  ;;  %v2320_v35 = vld [vmem:[#allocation15] ss:$0 sm:$0xff] }
 0x309   : > { %1296 = vst.msk [vmem:[%s3302_s3 + $0x8] sm:$0xff] %vm1122_vm1, %v1292_v36  ;;  %v1281_v40 = vadd.f32 %v2339_v23, %v1280_v37  ;;  %v1266_v41 = vmul.f32 %v2341_v26, %v1265_v38  ;;  %v1300_v56 = vpack.c.bf16 %v1292_v36, %v1292_v36 }
 0x30b   : > { %v1285_v44 = vsel %vm1284_vm11, %v2339_v23, %v1281_v40  ;;  %v1267_v45 = vadd.f32 %v2341_v26, %v1266_v41  ;;  %v2918_v41 = vmov 32.0   ;;  %vm1559_vm11 = vcmask 523264  }
 0x30c   : > { %v1290_v46 = vsel %vm1287_vm12, %v1289_v43, %v1285_v44 }
 0x30d   : > { %v1294_v48 = vmul.f32 %v3285_v4, %v1290_v46  ;;  %v1271_v49 = vsel %vm1270_vm14, %v2341_v26, %v1267_v45  ;;  %v1114_v50 = vpop.permute.xlu1 %1113  ;;  %v2124_v26 = vld [vmem:[#allocation14 + $0x8] sm:$0xff] }
 0x30e   : > { %v1276_v51 = vsel %vm1273_vm15, %v1275_v47, %v1271_v49  ;;  %v1327_v52 = vsel %vm1306_vm2, %v1114_v50, 0  ;;  %v1118_v53 = vpop.permute.xlu0 %1117  ;;  %1436 = vmatpush.bf16.msra.mxu3 %v2124_v26 }
 0x30f   : > { %1298 = vst.msk [vmem:[%s3302_s3 + $0x18] sm:$0xff] %vm1122_vm1, %v1294_v48  ;;  %v1293_v54 = vmul.f32 %v3289_v7, %v1276_v51  ;;  %v1365_v55 = vsel %vm1306_vm2, %v1118_v53, 0  ;;  %1336 = vmatpush.bf16.msra.mxu0 %v1327_v52  ;;  %v1302_v58 = vpack.c.bf16 %v1294_v48, %v1294_v48  ;;  %v2126_v52 = vld [vmem:[#allocation20 + $0x8] sm:$0xff]  ;;  %v2125_v53 = vld [vmem:[#allocation20] sm:$0xff] }
 0x310   : > { %1374 = vmatpush.bf16.msra.mxu2 %v1365_v55 }
 0x311   : > { %1297 = vst.msk [vmem:[%s3302_s3 + $0x10] sm:$0xff] %vm1122_vm1, %v1293_v54  ;;  %v1301_v57 = vpack.c.bf16 %v1293_v54, %v1293_v54  ;;  %v2130_v54 = vld [vmem:[%s3535_s15 + $0x18] sm:$0xff] }
 0x312   : > { %2071 = vmatmul.msk.bf16.vlgmr.msra.gmra.mxu0 %vm1122_vm1, %v1300_v56  ;;  %1437 = vmatpush.bf16.msra.mxu3 %v2123_v27 }
 0x313   : > { %2072 = vmatmul.msk.bf16.vlgmr.msra.gmra.mxu1 %vm1122_vm1, %v1301_v57  ;;  %2073 = vmatmul.msk.bf16.vlgmr.msra.gmra.mxu2 %vm1122_vm1, %v1302_v58  ;;  %v2129_v57 = vld [vmem:[%s3535_s15 + $0x10] sm:$0xff] }
 0x314   : > { %1514 = vmatpush.bf16.msrb.mxu0 %v2126_v52  ;;  %1567 = vmatpush.bf16.msrb.mxu1 %v2130_v54 }
 0x318   : > { %1515 = vmatpush.bf16.msrb.mxu0 %v2125_v53  ;;  %1568 = vmatpush.bf16.msrb.mxu1 %v2129_v57 }
 0x339   : > { %v1225_v59 = vpop.xlane.xlu0 %1224 }
 0x33a   : > { %2342 = vrcp.f32 %v1225_v59  ;;  %v1246_v63 = vand.u32 2147483648, %v1225_v59  ;;  %v1244_v1 = vand.u32 2147483647, %v1225_v59  ;;  %vm1240_vm3 = vweird.f32 %v1225_v59 }
 0x33b   : > { %2344 = vrcp.f32 %v2918_v41 }
 0x33c   : > { %v1247_v3 = vor.u32 1.1754944e-38, %v1246_v63  ;;  %vm1245_vm5 = vcmp.eq.f32.partialorder %v1244_v1, 8.507059e+37  ;;  %v2321_v1 = vld [vmem:[#allocation17] ss:$0 sm:$0xff] }
 0x340   : > { %v2343_v60 = vpop.eup %2342 }
 0x341   : > { %v1236_v61 = vmul.f32 %v2343_v60, %v1225_v59  ;;  %vm1241_vm2 = vweird.f32 %v2343_v60  ;;  %v2345_v42 = vpop.eup %2344 }
 0x342   : > { %vm1242_vm4 = vmor %vm1240_vm3, %vm1241_vm2  ;;  %v1451_v43 = vmul.f32 32.0, %v2345_v42 }
 0x343   : > { %v1237_v62 = vsub.f32 1.0, %v1236_v61 }
 0x344   : > { %v1452_v44 = vsub.f32 1.0, %v1451_v43 }
 0x345   : > { %v1238_v0 = vmul.f32 %v2343_v60, %v1237_v62 }
 0x346   : > { %v1453_v45 = vmul.f32 %v2345_v42, %v1452_v44  ;;  %v2327_v44 = vld [vmem:[%s3537_s12] ss:$0 sm:$0xff] }
 0x347   : > { %v1239_v2 = vadd.f32 %v2343_v60, %v1238_v0 }
 0x348   : > { %v1454_v46 = vadd.f32 %v2345_v42, %v1453_v45 }
 0x349   : > { %v1243_v4 = vsel %vm1242_vm4, %v2343_v60, %v1239_v2 }
 0x34a   : > { %v1248_v5 = vsel %vm1245_vm5, %v1247_v3, %v1243_v4  ;;  %v2322_v3 = vld [vmem:[#allocation18] ss:$0 sm:$0xff] }
 0x34b   : > { %v1291_v7 = vmul.f32 %v3296_v12, %v1248_v5 }
 0x34d   : > { %1295 = vst.msk [vmem:[%s3302_s3] sm:$0xff] %vm1122_vm1, %v1291_v7  ;;  %v1299_v8 = vpack.c.bf16 %v1291_v7, %v1291_v7 }
 0x34f   : > { %2070 = vmatmul.msk.bf16.vlgmr.msrb.gmra.mxu3 %vm1122_vm1, %v1299_v8 }
 0x38f   : > { %v1338_v9 = vpop.f32.mrf.mxu0 }
 0x390   : > { %v1381_v10 = vpack.c.bf16 %v1338_v9, %v1338_v9  ;;  %v1357_v11 = vpop.f32.mrf.mxu1  ;;  %v2128_v9 = vld [vmem:[%s3535_s15 + $0x8] sm:$0xff] }
 0x391   : > { %v1382_v13 = vpack.c.bf16 %v1357_v11, %v1357_v11  ;;  %1569 = vmatpush.bf16.msrb.mxu1 %v2128_v9  ;;  %v2323_v11 = vld [vmem:[#allocation21] ss:$0 sm:$0xff] }
 0x392   : > { %v1385_v14 = vunpack.c.l.b16 %v1381_v10  ;;  %v2127_v10 = vld [vmem:[%s3535_s15] sm:$0xff] }
 0x393   : > { %v1390_v15 = vunpack.c.l.b16 %v1382_v13 }
 0x394   : > { %v1386_v16 = vpack.c.b16 %v1385_v14, %v1385_v14 }
 0x395   : > { %v1391_v17 = vpack.c.b16 %v1390_v15, %v1390_v15  ;;  %1570 = vmatpush.bf16.msrb.mxu1 %v2127_v10 }
 0x396   : > { %1387 = vrot.lane.b32.xlu1 %v1386_v16, %s3488_s23  ;;  %v1376_v18 = vpop.f32.mrf.mxu2 }
 0x397   : > { %v1383_v19 = vpack.c.bf16 %v1376_v18, %v1376_v18  ;;  %v1340_v20 = vpop.f32.mrf.mxu0  ;;  %1392 = vrot.lane.b32.xlu2 %v1391_v17, %s2916_s2  ;;  %v2324_v18 = vld [vmem:[%s3536_s16] ss:$0 sm:$0xff] }
 0x398   : > { %v1359_v12 = vpop.f32.mrf.mxu1 }
 0x399   : > { %v1395_v21 = vunpack.c.l.b16 %v1383_v19 }
 0x39b   : > { %v1396_v22 = vpack.c.b16 %v1395_v21, %v1395_v21 }
 0x39e   : > { %1397 = vrot.lane.b32.xlu1 %v1396_v22, %s2917_s5  ;;  %v1378_v23 = vpop.f32.mrf.mxu2  ;;  %s3538_s5 = sld [smem:[#allocation58_spill]] }
 0x3a4   : > { %s1695_s0 = scalar_lea.hbm %s3538_s5, %s2131_s9  ;;  %s2734_s14 = scalar_lea.hbm %s3538_s5, 64 }
 0x3a5   : > { %s1698_s24 = sshll.u32 %s1695_s0, 4  ;;  %s1699_s24 = int_to_ptr.hbm [resolvable:$true] %s1698_s24 }
 0x3a6   : > { %s2728_s21 = sshra.s32 %s1699_s24, 4  ;;  %s2729_s21 = int_to_ptr.hbm [resolvable:$true] %s2728_s21 }
 0x3a7   : > { %s2730_s12 = scalar_lea.hbm %s2729_s21, 32  ;;  %p2735_p8 = scmp.lt.s32.totalorder %s2729_s21, %s3538_s5 }
 0x3a8   : > { %p2731_p1 = scmp.ne.s32.totalorder %s2729_s21, %s2730_s12  ;;  %p2736_p7 = scmp.lt.s32.totalorder %s2734_s14, %s2730_s12 }
 0x3aa   : > { %p2732_p4 = pnand %p2731_p1, %p3177_p13  ;;  %p2737_p9 = por %p2736_p7, %p2735_p8 }
 0x3ac   : > { %p2733_p12 = pneg %p2732_p4 }
 0x3ae   : > { %p2738_p10 = pnand %p2737_p9, %p2733_p12 }
 0x3d2   : > { %v1319_v24 = vpop.f32.mrf.mxu3 }
 0x3d3   : > { %v1380_v29 = vpack.c.bf16 %v1319_v24, %v1319_v24 }
 0x3da   : > { %v1321_v25 = vpop.f32.mrf.mxu3 }
 0x3f1   : > { %v1393_v31 = vpop.permute.xlu2 %1392 }
 0x408   : > { %v1388_v28 = vpop.permute.xlu1 %1387 }
 0x409   : > { %v1401_v30 = vsel %vm1122_vm1, %v1380_v29, %v1388_v28  ;;  %vm1455_vm1 = vweird.f32 %v2345_v42  ;;  %v1618_v28 = vld [vmem:[#allocation2] sm:$0x1]  ;;  %v2919_v29 = vmov 0  }
 0x40a   : > { %v1404_v33 = vsel %vm1402_vm6, %v1401_v30, %v1393_v31  ;;  %v3326_v47 = vsel %vm1455_vm1, %v2345_v42, %v1454_v46  ;;  %2316 = vset.pattern.permute.xlu0 %v2919_v29  ;;  %v2326_v42 = vld [vmem:[%s3474_s18] ss:$0 sm:$0xff] }
 0x410   : > { %v1398_v32 = vpop.permute.xlu1 %1397 }
 0x411   : > { %v1407_v34 = vsel %vm1405_vm7, %v1404_v33, %v1398_v32 }
 0x412   : > { %2082 = vmatmul.msk.bf16.vlgmr.msra.gmra.mxu3 %vm1009_vm0, %v1407_v34 }
 0x495   : > { %v1439_v36 = vpop.f32.mrf.mxu3 }
 0x496   : > { %v1440_v37 = vadd.f32 %v2320_v35, %v1439_v36 }
 0x498   : > { %v1444_v38 = vadd.f32 %v1440_v37, %v3256_v6 }
 0x49a   : > { %v1447_v39 = vsel %vm1009_vm0, %v1444_v38, 0.0 }
 0x49b   : > { %1448 = vadd.xlane.f32.xlu2 %v1447_v39  ;;  %v2325_v39 = vld [vmem:[%s3473_s17] ss:$0 sm:$0xff] }
 0x49d   : > { %v1441_v40 = vpop.f32.mrf.mxu3 }
 0x50e   : > { %v1449_v48 = vpop.xlane.xlu2 %1448 }
 0x50f   : > { %v1457_v49 = vmul.f32 %v3326_v47, %v1449_v48 }
 0x511   : > { %v1458_v50 = vsub.f32 %v1444_v38, %v1457_v49 }
 0x513   : > { %v1459_v51 = vmul.f32 %v1458_v50, %v1458_v50 }
 0x515   : > { %v1460_v6 = vsel %vm1009_vm0, %v1459_v51, 0.0 }
 0x516   : > { %1461 = vadd.xlane.f32.xlu1 %v1460_v6 }
 0x589   : > { %v1462_v55 = vpop.xlane.xlu1 %1461 }
 0x58a   : > { %v1463_v56 = vmul.f32 %v1462_v55, %v3326_v47 }
 0x58c   : > { %v1464_v58 = vadd.f32 1e-05, %v1463_v56 }
 0x58e   : > { %2346 = vrsqrt.f32 %v1464_v58  ;;  %vm1471_vm9 = vweird.f32 %v1464_v58 }
 0x594   : > { %v2347_v59 = vpop.eup %2346 }
 0x595   : > { %v1466_v60 = vmul.f32 %v2347_v59, %v1464_v58  ;;  %vm1472_vm8 = vweird.f32 %v2347_v59 }
 0x596   : > { %vm1473_vm10 = vmor %vm1471_vm9, %vm1472_vm8 }
 0x597   : > { %v1467_v61 = vmul.f32 %v2347_v59, %v1466_v60 }
 0x599   : > { %v1468_v62 = vmul.f32 0.5, %v1467_v61 }
 0x59b   : > { %v1469_v63 = vsub.f32 1.5, %v1468_v62 }
 0x59d   : > { %v1470_v0 = vmul.f32 %v2347_v59, %v1469_v63 }
 0x59f   : > { %v1474_v2 = vsel %vm1473_vm10, %v2347_v59, %v1470_v0 }
 0x5a0   : > { %v1475_v4 = vmul.f32 %v1474_v2, %v1458_v50 }
 0x5a2   : > { %v1479_v5 = vmul.f32 %v2321_v1, %v1475_v4 }
 0x5a4   : > { %v1483_v7 = vadd.f32 %v2322_v3, %v1479_v5 }
 0x5a6   : > { %v1484_v8 = vpack.c.bf16 %v1483_v7, %v1483_v7 }
 0x5a8   : > { %2091 = vmatmul.msk.bf16.vlgmr.msrb.gmra.mxu0 %vm1009_vm0, %v1484_v8 }
 0x625   : > { %v1517_v13 = vpop.f32.mrf.mxu0 }
 0x626   : > { %v1518_v14 = vadd.f32 %v2323_v11, %v1517_v13 }
 0x628   : > { %v1521_v15 = vmax.f32 %v1518_v14, 0.0 }
 0x62a   : > { %v1522_v16 = vpack.c.bf16 %v1521_v15, %v1521_v15 }
 0x62c   : > { %2108 = vmatmul.msk.bf16.vlgmr.msrb.gmra.mxu1 %vm1559_vm11, %v1522_v16 }
 0x62d   : > { %v1519_v17 = vpop.f32.mrf.mxu0 }
 0x6a9   : > { %v1572_v19 = vpop.f32.mrf.mxu1 }
 0x6aa   : > { %v1573_v20 = vadd.f32 %v2324_v18, %v1572_v19 }
 0x6ac   : > { %v1576_v12 = vadd.f32 %v1573_v20, %v1483_v7 }
 0x6ae   : > { %v1579_v21 = vsel %vm1009_vm0, %v1576_v12, 0.0 }
 0x6af   : > { %1580 = vadd.xlane.f32.xlu0 %v1579_v21 }
 0x6b1   : > { %v1574_v22 = vpop.f32.mrf.mxu1 }
 0x722   : > { %v1581_v23 = vpop.xlane.xlu0 %1580 }
 0x723   : > { %v1582_v24 = vmul.f32 %v1581_v23, %v3326_v47 }
 0x725   : > { %v1583_v25 = vsub.f32 %v1576_v12, %v1582_v24 }
 0x727   : > { %v1584_v26 = vmul.f32 %v1583_v25, %v1583_v25 }
 0x729   : > { %v1585_v27 = vsel %vm1009_vm0, %v1584_v26, 0.0 }
 0x72a   : > { %1586 = vadd.xlane.f32.xlu0 %v1585_v27 }
 0x73e   : > { %1621 = vperm.xlu0 %2316, %v1618_v28  }
 0x79d   : > { %v1587_v30 = vpop.xlane.xlu0 %1586 }
 0x79e   : > { %v1588_v31 = vmul.f32 %v1587_v30, %v3326_v47 }
 0x7a0   : > { %v1589_v32 = vadd.f32 1e-05, %v1588_v31 }
 0x7a2   : > { %2348 = vrsqrt.f32 %v1589_v32  ;;  %vm1596_vm13 = vweird.f32 %v1589_v32 }
 0x7a8   : > { %v2349_v33 = vpop.eup %2348 }
 0x7a9   : > { %v1591_v34 = vmul.f32 %v2349_v33, %v1589_v32  ;;  %vm1597_vm12 = vweird.f32 %v2349_v33 }
 0x7aa   : > { %vm1598_vm14 = vmor %vm1596_vm13, %vm1597_vm12 }
 0x7ab   : > { %v1592_v35 = vmul.f32 %v2349_v33, %v1591_v34 }
 0x7ad   : > { %v1593_v36 = vmul.f32 0.5, %v1592_v35 }
 0x7af   : > { %v1594_v37 = vsub.f32 1.5, %v1593_v36 }
 0x7b1   : > { %v1595_v38 = vmul.f32 %v2349_v33, %v1594_v37 }
 0x7b3   : > { %v1599_v40 = vsel %vm1598_vm14, %v2349_v33, %v1595_v38 }
 0x7b4   : > { %v1600_v41 = vmul.f32 %v1599_v40, %v1583_v25 }
 0x7b6   : > { %v1604_v43 = vmul.f32 %v2325_v39, %v1600_v41 }
 0x7b8   : > { %v1608_v45 = vadd.f32 %v2326_v42, %v1604_v43 }
 0x7ba   : > { %v1614_v46 = vmul.f32 %v2327_v44, %v1608_v45  ;;  %1609 = vst.msk [vmem:[%s3361_s13] sm:$0xff] %vm1009_vm0, %v1608_v45 }
 0x7bc   : > { %v1615_v47 = vsel %vm1009_vm0, %v1614_v46, 0.0 }
 0x7bd   : > { %1616 = vadd.xlane.f32.xlu2 %v1615_v47 }
 0x7be   : > { %2741 = shalt.err (!%p2738_p10)
}
 0x7bf   : > { %s2920_s3 = smov 128   ;;  %s3539_s9 = smov 8  }
 0x7c0   : > { %2179 = dma.vmem_to_hbm [thread:$0]  (%p3177_p13), %s1697_s7, 512, %s1699_s24, %s3372_s1, %s2920_s3, %s2920_s3, %s3539_s9  }
 0x7c1   : > { %s2112_s4 = sshll.u32 %s3073_s30, 3  ;;  %s3540_s2 = sld [smem:[#allocation57_spill]] }
 0x7c2   : > { %s1682_s0 = sshll.u32 %s3361_s13, 4  ;;  %s1657_s21 = scalar_lea.sflag [#allocation5], %s3210_s8  ;;  %s1683_s0 = int_to_ptr.vmem [resolvable:$true] %s1682_s0 }
 0x7c7   : > { %s1680_s15 = scalar_lea.hbm %s3540_s2, %s2112_s4  ;;  %s2762_s7 = scalar_lea.hbm %s3540_s2, 16 }
 0x7c8   : > { %s1684_s14 = sshll.u32 %s1680_s15, 4  ;;  %s1685_s14 = int_to_ptr.hbm [resolvable:$true] %s1684_s14 }
 0x7c9   : > { %s2756_s12 = sshra.s32 %s1685_s14, 4  ;;  %s2757_s12 = int_to_ptr.hbm [resolvable:$true] %s2756_s12 }
 0x7ca   : > { %s2758_s11 = scalar_lea.hbm %s2757_s12, 8  ;;  %p2763_p6 = scmp.lt.s32.totalorder %s2757_s12, %s3540_s2 }
 0x7cb   : > { %p2759_p11 = scmp.ne.s32.totalorder %s2757_s12, %s2758_s11  ;;  %p2764_p3 = scmp.lt.s32.totalorder %s2762_s7, %s2758_s11 }
 0x7cd   : > { %p2760_p0 = pnand %p2759_p11, %p3177_p13  ;;  %p2765_p1 = por %p2764_p3, %p2763_p6 }
 0x7cf   : > { %p2761_p2 = pneg %p2760_p0 }
 0x7d1   : > { %p2766_p4 = pnand %p2765_p1, %p2761_p2 }
 0x7d3   : > { %2769 = shalt.err (!%p2766_p4)
}
 0x7d4   : > { %2178 = dma.vmem_to_hbm [thread:$0]  (%p3177_p13), %s1683_s0, 128, %s1685_s14, %s1657_s21   ;;  %v1622_v48 = vpop.permute.xlu0 %1621  ;;  %v1627_v49 = vlaneseq  ;;  %vm1631_vm0 = vcmask 57344  }
 0x7d5   : > { %v1624_v50 = vperm.slane %v1622_v48, 0  ;;  %s3541_s16 = sld [smem:[#allocation59_spill]]  ;;  %s966_s4 = scalar_lea.vmem [#allocation26], %s3210_s8 }
 0x7d6   : > { %v1628_v51 = vand.u32 127, %v1627_v49  ;;  %s1712_s23 = sshll.u32 %s966_s4, 4  ;;  %s1713_s23 = int_to_ptr.vmem [resolvable:$true] %s1712_s23 }
 0x7db   : > { %s1710_s5 = scalar_lea.hbm %s3541_s16, %s3073_s30  ;;  %s2790_s12 = scalar_lea.hbm %s3541_s16, 2 }
 0x7dc   : > { %s1714_s10 = sshll.u32 %s1710_s5, 4  ;;  %s1715_s10 = int_to_ptr.hbm [resolvable:$true] %s1714_s10 }
 0x7dd   : > { %s2784_s15 = sshra.s32 %s1715_s10, 4  ;;  %s2785_s15 = int_to_ptr.hbm [resolvable:$true] %s2784_s15 }
 0x7de   : > { %s2786_s0 = scalar_lea.hbm %s2785_s15, 1  ;;  %p2791_p9 = scmp.lt.s32.totalorder %s2785_s15, %s3541_s16 }
 0x7df   : > { %p2787_p12 = scmp.ne.s32.totalorder %s2785_s15, %s2786_s0  ;;  %p2792_p10 = scmp.lt.s32.totalorder %s2790_s12, %s2786_s0 }
 0x7e1   : > { %p2788_p8 = pnand %p2787_p12, %p3177_p13  ;;  %p2793_p11 = por %p2792_p10, %p2791_p9 }
 0x7e3   : > { %p2789_p7 = pneg %p2788_p8 }
 0x7e5   : > { %p2794_p0 = pnand %p2793_p11, %p2789_p7 }
 0x830   : > { %v1617_v6 = vpop.xlane.xlu2 %1616 }
 0x831   : > { %v1625_v52 = vadd.f32 %v1624_v50, %v1617_v6 }
 0x833   : > { %v1629_v53 = vperm.slane %v1625_v52, %v1628_v51  ;;  %v2109_v54 = vmul.f32 -1.442695, %v1625_v52 }
 0x835   : > { %2350 = vpow2.f32 %v2109_v54  ;;  %1632 = vst.msk [vmem:[%s966_s4] sm:$0x1] %vm1631_vm0, %v1629_v53 }
 0x836   : > { %2797 = shalt.err (!%p2794_p0)
}
 0x837   : > { %2180 = dma.vmem_to_hbm [thread:$0]  (%p3177_p13), %s1713_s23, 16, %s1715_s10, %s3372_s1  }
 0x838   : > { %s3542_s13 = sld [smem:[#allocation60_spill]]  ;;  %s972_s1 = scalar_lea.vmem [#allocation27], %s3210_s8 }
 0x839   : > { %s1725_s5 = sshll.u32 %s972_s1, 4  ;;  %s1671_s23 = scalar_lea.sflag [#allocation28], %s3210_s8  ;;  %s1726_s5 = int_to_ptr.vmem [resolvable:$true] %s1725_s5 }
 0x83b   : > { %v2351_v55 = vpop.eup %2350 }
 0x83c   : > { %v1636_v56 = vadd.f32 1.0, %v2351_v55 }
 0x83e   : > { %2352 = vrcp.f32 %v1636_v56  ;;  %v1648_v60 = vand.u32 2147483648, %v1636_v56  ;;  %v1646_v62 = vand.u32 2147483647, %v1636_v56  ;;  %s1723_s9 = scalar_lea.hbm %s3542_s13, %s3073_s30  ;;  %vm1642_vm2 = vweird.f32 %v1636_v56  ;;  %s2818_s14 = scalar_lea.hbm %s3542_s13, 2 }
 0x83f   : > { %s1727_s4 = sshll.u32 %s1723_s9, 4  ;;  %s1728_s4 = int_to_ptr.hbm [resolvable:$true] %s1727_s4 }
 0x840   : > { %v1649_v0 = vor.u32 1.1754944e-38, %v1648_v60  ;;  %vm1647_vm4 = vcmp.eq.f32.partialorder %v1646_v62, 8.507059e+37  ;;  %s2812_s10 = sshra.s32 %s1728_s4, 4  ;;  %s2813_s10 = int_to_ptr.hbm [resolvable:$true] %s2812_s10 }
 0x841   : > { %s2814_s30 = scalar_lea.hbm %s2813_s10, 1  ;;  %p2819_p1 = scmp.lt.s32.totalorder %s2813_s10, %s3542_s13 }
 0x842   : > { %p2815_p2 = scmp.ne.s32.totalorder %s2813_s10, %s2814_s30  ;;  %p2820_p4 = scmp.lt.s32.totalorder %s2818_s14, %s2814_s30 }
 0x844   : > { %v2353_v57 = vpop.eup %2352  ;;  %p2816_p6 = pnand %p2815_p2, %p3177_p13  ;;  %p2821_p12 = por %p2820_p4, %p2819_p1 }
 0x845   : > { %v1638_v58 = vmul.f32 %v2353_v57, %v1636_v56  ;;  %vm1643_vm15 = vweird.f32 %v2353_v57 }
 0x846   : > { %vm1644_vm3 = vmor %vm1642_vm2, %vm1643_vm15  ;;  %p2817_p3 = pneg %p2816_p6 }
 0x847   : > { %v1639_v59 = vsub.f32 1.0, %v1638_v58 }
 0x848   : > { %p2822_p8 = pnand %p2821_p12, %p2817_p3 }
 0x849   : > { %v1640_v61 = vmul.f32 %v2353_v57, %v1639_v59 }
 0x84b   : > { %v1641_v63 = vadd.f32 %v2353_v57, %v1640_v61 }
 0x84d   : > { %v1645_v1 = vsel %vm1644_vm3, %v2353_v57, %v1641_v63 }
 0x84e   : > { %v1650_v2 = vsel %vm1647_vm4, %v1649_v0, %v1645_v1 }
 0x84f   : > { %v1653_v3 = vperm.slane %v1650_v2, %v1628_v51 }
 0x851   : > { %1655 = vst.msk [vmem:[%s972_s1] sm:$0x1] %vm1631_vm0, %v1653_v3 }
 0x852   : > { %2825 = shalt.err (!%p2822_p8)
}
 0x853   : > { %2181 = dma.vmem_to_hbm [thread:$0]  (%p3177_p13), %s1726_s5, 16, %s1728_s4, %s1671_s23  }
 0x854 PF: > { %s1739_s8 = sand.u32 1, %s2884_s27   ;;  %p3543_p7 = scmp.ge.s32.totalorder %s2896_s6, 2 }
 0x855   : > { %s1740_s11 = scalar_lea.sflag [#allocation5], %s1739_s8 }
 0x856   : > { %p2225_p9 = pnand %p3543_p7, %p3184_p5 }
 0x858   : > { %p2226_p10 = pneg %p2225_p9 }
 0x85a   : > { %2871 = dma.done.wait (%p2226_p10), %s1740_s11, 128  }
 0x85b   : > { %2873 = vsyncadd (%p2226_p10), %s1740_s11, 4294967168  ;;  %s3544_s7 = sadd.s32 4294967294, %s2896_s6  }
 0x85c   : > { %s1749_s24 = sand.u32 1, %s3544_s7  }
 0x85d   : > { %s1750_s3 = scalar_lea.sflag [#allocation25], %s1749_s24 }
 0x85e   : > { %2875 = dma.done.wait (%p2226_p10), %s1750_s3, 528  }
 0x85f   : > { %2877 = vsyncadd (%p2226_p10), %s1750_s3, 4294966768  ;;  %s1769_s25 = scalar_lea.sflag [#allocation28], %s1739_s8 }
 0x860   : > { %2879 = dma.done.wait (%p2226_p10), %s1769_s25, 16  }
 0x861   : > { %2881 = vsyncadd (%p2226_p10), %s1769_s25, 4294967280  ;;  %p52_p13 = scmp.ge.s32.totalorder %s3157_s26, 4   ;;  %s3545_s27 = smov %s2888_s28 }
 0x862   : > { %s3546_s28 = smov %s2892_s20  ;;  %s3547_s20 = smov %s3169_s29 }
 0x863   : > { %s3548_s6 = smov %s3157_s26  ;;  %54 = sbr.rel (!%p52_p13) target bundleno = 38 (0x26), region = 248 }
 0x868   :  { %1774 = vsyncpa [#allocation4], 1 }
 0x869   :  { %1776 = vsyncpa [#allocation4 + $0x1], 1 }
 0x86a   :  { %1777 = vsyncpa [#allocation7], 1 }
 0x86b   :  { %1778 = vsyncpa [#allocation10], 1 }
 0x86c   :  { %1779 = vsyncpa [#allocation13], 1 }
 0x86d   :  { %1780 = vsyncpa [#allocation16], 1 }
 0x86e   :  { %1781 = vsyncpa [#allocation19], 1 }
 0x86f   :  { %1782 = vsyncpa [#allocation22], 1 }
 0x870   :  { %1783 = vsyncpa [#allocation5], 1 }
 0x871   :  { %1785 = vsyncpa [#allocation5 + $0x1], 1 }
 0x872   :  { %1786 = vsyncpa [#allocation25], 1 }
 0x873   :  { %1788 = vsyncpa [#allocation25 + $0x1], 1 }
 0x874   :  { %1789 = vsyncpa [#allocation28], 1 }
 0x875   :  { %1791 = vsyncpa [#allocation28 + $0x1], 1 }

</bundles_post_ra>
